<compile_context>
chip_gen: v7x
topology: tpu7x:2x2x1
jax: 0.10.0
libtpu: 0.0.40
codegen_flags: <defaults>
</compile_context>

<pallas_src>
from functools import partial

import numpy as np
import jax
import jax.numpy as jnp
from jax import lax
from jax.experimental import pallas as pl
from jax.experimental.pallas import tpu as pltpu

BN_EPS = 1e-5


# ----------------------------------------------------------------------------
# Single fused kernel: 3 conv/BN/ReLU/pool stages + MLP head, per batch block.
# ----------------------------------------------------------------------------
def _fused_net_kernel(x_ref,
                      wb1_ref, t1_ref, wb2_ref, t2_ref, wb3_ref, t3_ref,
                      wf1_ref, bf1_ref, wf2_ref, bf2_ref,
                      o_ref,
                      pad2_ref, pad3_ref,
                      *, couts):
    c1, c2, c3 = couts

    def conv_bn_relu_pool(src_ref, wb_ref, t_ref, cout):
        # src_ref: (h+2, Nb, L_in) H-padded activation (zero halo rows).
        # wb_ref : (3, L_in, L_out) band weights (W taps / padding / BN scale
        #          folded in).  t_ref: (1, L_out) folded bias/BN shift.
        hp, nb, l_in = src_ref.shape
        h = hp - 2
        l_out = wb_ref.shape[-1]
        # 3 banded GEMMs, one per kernel row; each operand is an aligned
        # leading-dim slab of the padded activation (no im2col copies).
        acc = jnp.dot(src_ref[0:h].reshape(h * nb, l_in), wb_ref[0],
                      preferred_element_type=jnp.float32)
        for dh in (1, 2):
            acc = acc + jnp.dot(src_ref[dh:dh + h].reshape(h * nb, l_in),
                                wb_ref[dh], preferred_element_type=jnp.float32)
        # Folded conv-bias + BatchNorm (eval) + ReLU.
        acc = jnp.maximum(acc + t_ref[...], 0.0)            # (h*nb, l_out)
        # 2x2 max pool:
        #  - H pairs: rows (2i, n) / (2i+1, n) are nb rows apart -> aligned
        #    slab selection (layout-free leading-dim regroup).
        y = acc.reshape(h // 2, 2, nb, l_out)
        hmax = jnp.maximum(y[:, 0], y[:, 1]).reshape(h // 2 * nb, l_out)
        #  - W pairs: columns j / j+1 sit `cout` lanes apart -> one XLU roll +
        #    VPU max.  Result stays un-compacted: valid data lives in the even
        #    column blocks, odd blocks hold finite garbage that the next
        #    stage's band weights (zero rows there) ignore.
        wmax = jnp.maximum(hmax, pltpu.roll(hmax, shift=l_out - cout, axis=1))
        return wmax.reshape(h // 2, nb, l_out)

    # ---- Stage 1 (input arrives H-padded from the wrapper) -----------------
    p1 = conv_bn_relu_pool(x_ref, wb1_ref, t1_ref, c1)       # (H/2, Nb, L1)

    # ---- Stage 2: direct hand-off into the H-padded VMEM scratch -----------
    # Only the 2 halo rows are zeroed (tiny), every step: the interior is fully
    # overwritten, and per-step zeroing stays correct when the "parallel"
    # batch grid is split across TensorCores (each core has its own scratch).
    zero2 = jnp.zeros(pad2_ref.shape[1:], jnp.float32)
    pad2_ref[0] = zero2
    pad2_ref[pad2_ref.shape[0] - 1] = zero2
    pad2_ref[1:pad2_ref.shape[0] - 1] = p1
    p2 = conv_bn_relu_pool(pad2_ref, wb2_ref, t2_ref, c2)    # (H/4, Nb, L2)

    # ---- Stage 3 ------------------------------------------------------------
    zero3 = jnp.zeros(pad3_ref.shape[1:], jnp.float32)
    pad3_ref[0] = zero3
    pad3_ref[pad3_ref.shape[0] - 1] = zero3
    pad3_ref[1:pad3_ref.shape[0] - 1] = p2
    p3 = conv_bn_relu_pool(pad3_ref, wb3_ref, t3_ref, c3)    # (H/8, Nb, L3)

    # ---- MLP head -----------------------------------------------------------
    # fc1 rows were scattered at trace time onto this stage's lane layout and
    # split per output spatial row, so PyTorch's NCHW flatten needs no
    # in-kernel data movement: hid = sum_h  p3[h] @ Wf1[h].
    acc_fc = jnp.dot(p3[0], wf1_ref[0], preferred_element_type=jnp.float32)
    for hh in range(1, p3.shape[0]):
        acc_fc = acc_fc + jnp.dot(p3[hh], wf1_ref[hh],
                                  preferred_element_type=jnp.float32)
    hid = jnp.maximum(acc_fc + bf1_ref[...], 0.0)             # (Nb, 128)
    # TODO(synk): nn.Dropout(p=0.5) is identity in eval mode; not applied.
    # fc2 (128 -> 1) as a VPU multiply + lane reduction (no 1-wide MXU op).
    z = jnp.sum(hid * wf2_ref[...], axis=-1, keepdims=True) + bf2_ref[...]
    o_ref[...] = 1.0 / (1.0 + jnp.exp(-z))                    # (Nb, 1)


def _pick_batch_block(n):
    # Batch is zero-padded to a multiple of Nb in the wrapper; Nb a multiple of
    # 8 keeps every in-kernel reshape layout-free.  Per-step VMEM is ~6 MiB on
    # every generation (fits v5e's 16 MiB scoped default and v7x's 64 MiB), so
    # the only tuning is keeping >=2 grid steps once the batch allows it
    # (cross-TensorCore parallelism on v7x; ~0.35 us/step cost elsewhere).
    if n <= 8:
        return 8
    return min(32, 8 * pl.cdiv(n, 16))


def net_forward(x, params):
    p = params
    N, H, W, Cin = x.shape
    C1 = p["w1"].shape[-1]
    C2 = p["w2"].shape[-1]
    C3 = p["w3"].shape[-1]
    Dh = p["fw1"].shape[1]
    assert H % 8 == 0 and W % 8 == 0
    Hf, Wf = H // 8, W // 8
    assert p["fw1"].shape[0] == C3 * Hf * Wf

    Nb = _pick_batch_block(N)
    Npad = Nb * pl.cdiv(N, Nb)

    def bn_fold(b, g, be, m, v):
        # bn(conv(x)+b) == conv(x)*s + (s*b + be - m*s)
        s = g / jnp.sqrt(v + BN_EPS)
        return s, s * b + be - m * s

    def band_weights(w, scale, w_in, col_off, l_in):
        """Fold the 3 W-taps, SAME W-padding, the input lane layout and the BN
        scale of one conv stage into 3 dense (l_in, w_in*cout) band matrices
        (one per kernel row).  Exact scatter (no matmul) -> f32-exact."""
        cin, cout = w.shape[2], w.shape[3]
        ip, ij, it, ic = [], [], [], []
        for t in range(3):                      # kernel column (dw)
            for j in range(w_in):               # output column
                jj = j + t - 1                  # input column feeding it
                if 0 <= jj < w_in:
                    for c in range(cin):
                        it.append(t); ij.append(j); ic.append(c)
                        ip.append(col_off[jj] + c)
        w_eff = (w * scale[None, None, None, :]).astype(jnp.float32)
        band = jnp.zeros((3, l_in, w_in, cout), jnp.float32)
        band = band.at[:, np.array(ip), np.array(ij), :].set(
            w_eff[:, np.array(it), np.array(ic), :])
        return band.reshape(3, l_in, w_in * cout)

    s1, t1 = bn_fold(p["b1"], p["g1"], p["be1"], p["m1"], p["v1"])
    s2, t2 = bn_fold(p["b2"], p["g2"], p["be2"], p["m2"], p["v2"])
    s3, t3 = bn_fold(p["b3"], p["g3"], p["be3"], p["m3"], p["v3"])

    # Lane layouts through the (lazy-pooled) pipeline.
    col0 = [Cin * j for j in range(W)]
    L0 = W * Cin
    wb1 = band_weights(p["w1"], s1, W, col0, L0)
    sh1 = jnp.tile(t1, W).reshape(1, W * C1)

    W1 = W // 2
    L1 = W * C1                                  # lane width unchanged by pool
    col1 = [2 * j * C1 for j in range(W1)]
    wb2 = band_weights(p["w2"], s2, W1, col1, L1)
    sh2 = jnp.tile(t2, W1).reshape(1, W1 * C2)

    W2 = W1 // 2
    L2 = W1 * C2
    col2 = [2 * j * C2 for j in range(W2)]
    wb3 = band_weights(p["w3"], s3, W2, col2, L2)
    sh3 = jnp.tile(t3, W2).reshape(1, W2 * C3)

    W3 = W2 // 2
    L3 = W2 * C3
    col3 = [2 * j * C3 for j in range(W3)]

    # fc1: scatter PyTorch's NCHW-flatten rows (r = c*Hf*Wf + h*Wf + w) onto
    # (output spatial row h, final lane p) so the kernel flatten is free.
    ih, ipp, ir = [], [], []
    for hh in range(Hf):
        for ww in range(Wf):
            for c in range(C3):
                ih.append(hh)
                ipp.append(col3[ww] + c)
                ir.append(c * (Hf * Wf) + hh * Wf + ww)
    wf1 = jnp.zeros((Hf, L3, Dh), jnp.float32)
    wf1 = wf1.at[np.array(ih), np.array(ipp), :].set(p["fw1"][np.array(ir), :])
    bf1 = p["fb1"].reshape(1, Dh)
    wf2 = p["fw2"].reshape(1, Dh)
    bf2 = p["fb2"].reshape(1, 1)

    # Input layout plumbing (wrapper side, tiny): (N,H,W,C) -> H-major,
    # H-padded (H+2, Npad, W*Cin).  Dense 96-wide DMA minor dim, aligned
    # leading-dim slab reads in the kernel, zero halo rows come for free.
    xr = jnp.transpose(x.reshape(N, H, W * Cin), (1, 0, 2))
    xr = jnp.pad(xr, ((1, 1), (0, Npad - N), (0, 0)))

    def cspec(shape):
        nd = len(shape)
        return pl.BlockSpec(tuple(shape), lambda n, _nd=nd: (0,) * _nd)

    kernel = partial(_fused_net_kernel, couts=(C1, C2, C3))

    out = pl.pallas_call(
        kernel,
        out_shape=jax.ShapeDtypeStruct((Npad, 1), jnp.float32),
        grid=(Npad // Nb,),
        in_specs=[
            pl.BlockSpec((H + 2, Nb, W * Cin), lambda n: (0, n, 0)),
            cspec(wb1.shape), cspec(sh1.shape),
            cspec(wb2.shape), cspec(sh2.shape),
            cspec(wb3.shape), cspec(sh3.shape),
            cspec(wf1.shape), cspec(bf1.shape),
            cspec(wf2.shape), cspec(bf2.shape),
        ],
        out_specs=pl.BlockSpec((Nb, 1), lambda n: (n, 0)),
        scratch_shapes=[
            pltpu.VMEM((H // 2 + 2, Nb, L1), jnp.float32),   # stage-2 H-padded
            pltpu.VMEM((H // 4 + 2, Nb, L2), jnp.float32),   # stage-3 H-padded
        ],
        compiler_params=pltpu.CompilerParams(
            dimension_semantics=("parallel",)),
    )(xr, wb1, sh1, wb2, sh2, wb3, sh3, wf1, bf1, wf2, bf2)
    return out[:N]


# ----------------------------------------------------------------------------
# Pure-JAX reference (correctness check only; HIGHEST precision = true f32)
# ----------------------------------------------------------------------------
def ref_forward(x, params):
    p = params
    prec = lax.Precision.HIGHEST

    def stage(x, w, b, gamma, beta, mean, var):
        y = lax.conv_general_dilated(
            x, w, window_strides=(1, 1), padding="SAME",
            dimension_numbers=("NHWC", "HWIO", "NHWC"), precision=prec) + b
        scale = gamma / jnp.sqrt(var + BN_EPS)
        y = jnp.maximum(y * scale + (beta - mean * scale), 0.0)
        return lax.reduce_window(y, -jnp.inf, lax.max,
                                 (1, 2, 2, 1), (1, 2, 2, 1), "VALID")

    h = stage(x, p["w1"], p["b1"], p["g1"], p["be1"], p["m1"], p["v1"])
    h = stage(h, p["w2"], p["b2"], p["g2"], p["be2"], p["m2"], p["v2"])
    h = stage(h, p["w3"], p["b3"], p["g3"], p["be3"], p["m3"], p["v3"])
    h = jnp.transpose(h, (0, 3, 1, 2)).reshape(h.shape[0], -1)   # NCHW flatten
    h = jnp.maximum(jnp.dot(h, p["fw1"], precision=prec) + p["fb1"], 0.0)
    return jax.nn.sigmoid(jnp.dot(h, p["fw2"], precision=prec) + p["fb2"])


# ----------------------------------------------------------------------------
# Deterministic parameter init (shapes match the PyTorch module; HWIO weights)
# ----------------------------------------------------------------------------
def init_params(key):
    ks = jax.random.split(key, 10)

    def conv_w(k, cin, cout):
        return 0.1 * jax.random.normal(k, (3, 3, cin, cout), jnp.float32)

    return {
        "w1": conv_w(ks[0], 6, 16),
        "b1": 0.01 * jax.random.normal(ks[1], (16,), jnp.float32),
        "g1": jnp.ones((16,), jnp.float32), "be1": jnp.zeros((16,), jnp.float32),
        "m1": jnp.zeros((16,), jnp.float32), "v1": jnp.ones((16,), jnp.float32),
        "w2": conv_w(ks[2], 16, 32),
        "b2": 0.01 * jax.random.normal(ks[3], (32,), jnp.float32),
        "g2": jnp.ones((32,), jnp.float32), "be2": jnp.zeros((32,), jnp.float32),
        "m2": jnp.zeros((32,), jnp.float32), "v2": jnp.ones((32,), jnp.float32),
        "w3": conv_w(ks[4], 32, 64),
        "b3": 0.01 * jax.random.normal(ks[5], (64,), jnp.float32),
        "g3": jnp.ones((64,), jnp.float32), "be3": jnp.zeros((64,), jnp.float32),
        "m3": jnp.zeros((64,), jnp.float32), "v3": jnp.ones((64,), jnp.float32),
        "fw1": 0.05 * jax.random.normal(ks[6], (256, 128), jnp.float32),
        "fb1": 0.01 * jax.random.normal(ks[7], (128,), jnp.float32),
        "fw2": 0.05 * jax.random.normal(ks[8], (128, 1), jnp.float32),
        "fb2": 0.01 * jax.random.normal(ks[9], (1,), jnp.float32),
    }


if __name__ == "__main__":
    key = jax.random.PRNGKey(0)
    pkey, xkey = jax.random.split(key)
    params = init_params(pkey)

    fwd = jax.jit(net_forward)

    # N=2 exercises the batch-padded single-step path; N=16 exercises the
    # 2-step "parallel" batch grid (one step per TensorCore on v7x).
    for n in (2, 16):
        x = jax.random.normal(jax.random.fold_in(xkey, n),
                              (n, 16, 16, 6), jnp.float32)
        out = jax.block_until_ready(fwd(x, params))
        assert out.shape == (n, 1), out.shape
        ref = jax.block_until_ready(ref_forward(x, params))
        err = float(jnp.max(jnp.abs(out - ref)))
        assert jnp.allclose(out, ref, atol=1e-4, rtol=1e-3), (n, err)

    print("KERNEL_OK")
</pallas_src>

<mosaic_0001>
module attributes {stable_mosaic.version = 11 : i64} {
  func.func @_fused_net_kernel(%arg0: i32, %arg1: memref<18x8x96xf32, #tpu.memory_space<vmem>>, %arg2: memref<3x96x256xf32, #tpu.memory_space<vmem>>, %arg3: memref<1x256xf32, #tpu.memory_space<vmem>>, %arg4: memref<3x256x256xf32, #tpu.memory_space<vmem>>, %arg5: memref<1x256xf32, #tpu.memory_space<vmem>>, %arg6: memref<3x256x256xf32, #tpu.memory_space<vmem>>, %arg7: memref<1x256xf32, #tpu.memory_space<vmem>>, %arg8: memref<2x256x128xf32, #tpu.memory_space<vmem>>, %arg9: memref<1x128xf32, #tpu.memory_space<vmem>>, %arg10: memref<1x128xf32, #tpu.memory_space<vmem>>, %arg11: memref<1x1xf32, #tpu.memory_space<vmem>>, %arg12: memref<8x1xf32, #tpu.memory_space<vmem>>, %arg13: memref<10x8x256xf32, #tpu.memory_space<vmem>>, %arg14: memref<6x8x256xf32, #tpu.memory_space<vmem>>) attributes {dimension_semantics = [#tpu.dimension_semantics<parallel>], iteration_bounds = array<i64: 1>, scalar_prefetch = 0 : i64, scratch_operands = 2 : i64, tpu.core_type = #tpu.core_type<tc>, window_params = [{transform_indices = @transform_0, window_bounds = array<i64: 18, 8, 96>}, {pipeline_mode = #tpu.pipeline_mode<synchronous>, transform_indices = @transform_1, window_bounds = array<i64: 3, 96, 256>}, {pipeline_mode = #tpu.pipeline_mode<synchronous>, transform_indices = @transform_2, window_bounds = array<i64: 1, 256>}, {pipeline_mode = #tpu.pipeline_mode<synchronous>, transform_indices = @transform_3, window_bounds = array<i64: 3, 256, 256>}, {pipeline_mode = #tpu.pipeline_mode<synchronous>, transform_indices = @transform_4, window_bounds = array<i64: 1, 256>}, {pipeline_mode = #tpu.pipeline_mode<synchronous>, transform_indices = @transform_5, window_bounds = array<i64: 3, 256, 256>}, {pipeline_mode = #tpu.pipeline_mode<synchronous>, transform_indices = @transform_6, window_bounds = array<i64: 1, 256>}, {pipeline_mode = #tpu.pipeline_mode<synchronous>, transform_indices = @transform_7, window_bounds = array<i64: 2, 256, 128>}, {pipeline_mode = #tpu.pipeline_mode<synchronous>, transform_indices = @transform_8, window_bounds = array<i64: 1, 128>}, {pipeline_mode = #tpu.pipeline_mode<synchronous>, transform_indices = @transform_9, window_bounds = array<i64: 1, 128>}, {pipeline_mode = #tpu.pipeline_mode<synchronous>, transform_indices = @transform_10, window_bounds = array<i64: 1, 1>}, {transform_indices = @transform_11, window_bounds = array<i64: 8, 1>}]} {
    %c0 = arith.constant 0 : index
    %c0_0 = arith.constant 0 : index
    %c0_1 = arith.constant 0 : index
    %0 = vector.load %arg1[%c0, %c0_0, %c0_1] : memref<18x8x96xf32, #tpu.memory_space<vmem>>, vector<16x8x96xf32>
    %1 = vector.shape_cast %0 : vector<16x8x96xf32> to vector<128x96xf32>
    %c0_2 = arith.constant 0 : index
    %c0_3 = arith.constant 0 : index
    %c0_4 = arith.constant 0 : index
    %2 = vector.load %arg2[%c0_2, %c0_3, %c0_4] : memref<3x96x256xf32, #tpu.memory_space<vmem>>, vector<1x96x256xf32>
    %3 = vector.shape_cast %2 : vector<1x96x256xf32> to vector<96x256xf32>
    %cst = arith.constant dense<0.000000e+00> : vector<128x256xf32>
    %4 = tpu.matmul %1, %3, %cst {dimension_numbers = #tpu.dot_dimension_numbers<[1], [0], [0], [1], [0, 0, 1, 1], [], []>} : vector<128x96xf32>, vector<96x256xf32>, vector<128x256xf32> -> vector<128x256xf32>
    %c1 = arith.constant 1 : index
    %c0_5 = arith.constant 0 : index
    %c0_6 = arith.constant 0 : index
    %5 = vector.load %arg1[%c1, %c0_5, %c0_6] : memref<18x8x96xf32, #tpu.memory_space<vmem>>, vector<16x8x96xf32>
    %6 = vector.shape_cast %5 : vector<16x8x96xf32> to vector<128x96xf32>
    %c1_7 = arith.constant 1 : index
    %c0_8 = arith.constant 0 : index
    %c0_9 = arith.constant 0 : index
    %7 = vector.load %arg2[%c1_7, %c0_8, %c0_9] : memref<3x96x256xf32, #tpu.memory_space<vmem>>, vector<1x96x256xf32>
    %8 = vector.shape_cast %7 : vector<1x96x256xf32> to vector<96x256xf32>
    %cst_10 = arith.constant dense<0.000000e+00> : vector<128x256xf32>
    %9 = tpu.matmul %6, %8, %cst_10 {dimension_numbers = #tpu.dot_dimension_numbers<[1], [0], [0], [1], [0, 0, 1, 1], [], []>} : vector<128x96xf32>, vector<96x256xf32>, vector<128x256xf32> -> vector<128x256xf32>
    %10 = arith.addf %4, %9 : vector<128x256xf32>
    %c2 = arith.constant 2 : index
    %c0_11 = arith.constant 0 : index
    %c0_12 = arith.constant 0 : index
    %11 = vector.load %arg1[%c2, %c0_11, %c0_12] : memref<18x8x96xf32, #tpu.memory_space<vmem>>, vector<16x8x96xf32>
    %12 = vector.shape_cast %11 : vector<16x8x96xf32> to vector<128x96xf32>
    %c2_13 = arith.constant 2 : index
    %c0_14 = arith.constant 0 : index
    %c0_15 = arith.constant 0 : index
    %13 = vector.load %arg2[%c2_13, %c0_14, %c0_15] : memref<3x96x256xf32, #tpu.memory_space<vmem>>, vector<1x96x256xf32>
    %14 = vector.shape_cast %13 : vector<1x96x256xf32> to vector<96x256xf32>
    %cst_16 = arith.constant dense<0.000000e+00> : vector<128x256xf32>
    %15 = tpu.matmul %12, %14, %cst_16 {dimension_numbers = #tpu.dot_dimension_numbers<[1], [0], [0], [1], [0, 0, 1, 1], [], []>} : vector<128x96xf32>, vector<96x256xf32>, vector<128x256xf32> -> vector<128x256xf32>
    %16 = arith.addf %10, %15 : vector<128x256xf32>
    %c0_17 = arith.constant 0 : index
    %c0_18 = arith.constant 0 : index
    %17 = vector.load %arg3[%c0_17, %c0_18] : memref<1x256xf32, #tpu.memory_space<vmem>>, vector<1x256xf32>
    %18 = vector.broadcast %17 : vector<1x256xf32> to vector<128x256xf32>
    %19 = arith.addf %16, %18 : vector<128x256xf32>
    %cst_19 = arith.constant 0.000000e+00 : f32
    %20 = vector.broadcast %cst_19 : f32 to vector<128x256xf32>
    %21 = arith.maximumf %19, %20 : vector<128x256xf32>
    %22 = vector.shape_cast %21 : vector<128x256xf32> to vector<8x2x8x256xf32>
    %23 = vector.extract_strided_slice %22 {offsets = [0, 0, 0, 0], sizes = [8, 1, 8, 256], strides = [1, 1, 1, 1]} : vector<8x2x8x256xf32> to vector<8x1x8x256xf32>
    %24 = vector.shape_cast %23 : vector<8x1x8x256xf32> to vector<8x8x256xf32>
    %25 = vector.extract_strided_slice %22 {offsets = [0, 1, 0, 0], sizes = [8, 1, 8, 256], strides = [1, 1, 1, 1]} : vector<8x2x8x256xf32> to vector<8x1x8x256xf32>
    %26 = vector.shape_cast %25 : vector<8x1x8x256xf32> to vector<8x8x256xf32>
    %27 = arith.maximumf %24, %26 : vector<8x8x256xf32>
    %28 = vector.shape_cast %27 : vector<8x8x256xf32> to vector<64x256xf32>
    %c240_i32 = arith.constant 240 : i32
    %29 = tpu.dynamic_rotate %28 by %c240_i32 dim 1 : vector<64x256xf32>, i32 -> vector<64x256xf32>
    %30 = arith.maximumf %28, %29 : vector<64x256xf32>
    %31 = vector.shape_cast %30 : vector<64x256xf32> to vector<8x8x256xf32>
    %cst_20 = arith.constant 0.000000e+00 : f32
    %32 = vector.broadcast %cst_20 : f32 to vector<8x256xf32>
    %c0_21 = arith.constant 0 : index
    %c0_22 = arith.constant 0 : index
    %c0_23 = arith.constant 0 : index
    %33 = vector.load %arg13[%c0_21, %c0_22, %c0_23] : memref<10x8x256xf32, #tpu.memory_space<vmem>>, vector<1x8x256xf32>
    %34 = vector.shape_cast %33 : vector<1x8x256xf32> to vector<8x256xf32>
    %35 = vector.shape_cast %32 : vector<8x256xf32> to vector<1x8x256xf32>
    tpu.vector_store %arg13[%c0_21, %c0_22, %c0_23], %35 {strides = array<i32>} : memref<10x8x256xf32, #tpu.memory_space<vmem>>, vector<1x8x256xf32>,
    %c9 = arith.constant 9 : index
    %c0_24 = arith.constant 0 : index
    %c0_25 = arith.constant 0 : index
    %36 = vector.load %arg13[%c9, %c0_24, %c0_25] : memref<10x8x256xf32, #tpu.memory_space<vmem>>, vector<1x8x256xf32>
    %37 = vector.shape_cast %36 : vector<1x8x256xf32> to vector<8x256xf32>
    %38 = vector.shape_cast %32 : vector<8x256xf32> to vector<1x8x256xf32>
    tpu.vector_store %arg13[%c9, %c0_24, %c0_25], %38 {strides = array<i32>} : memref<10x8x256xf32, #tpu.memory_space<vmem>>, vector<1x8x256xf32>,
    %c1_26 = arith.constant 1 : index
    %c0_27 = arith.constant 0 : index
    %c0_28 = arith.constant 0 : index
    %39 = vector.load %arg13[%c1_26, %c0_27, %c0_28] : memref<10x8x256xf32, #tpu.memory_space<vmem>>, vector<8x8x256xf32>
    tpu.vector_store %arg13[%c1_26, %c0_27, %c0_28], %31 {strides = array<i32>} : memref<10x8x256xf32, #tpu.memory_space<vmem>>, vector<8x8x256xf32>,
    %c0_29 = arith.constant 0 : index
    %c0_30 = arith.constant 0 : index
    %c0_31 = arith.constant 0 : index
    %40 = vector.load %arg13[%c0_29, %c0_30, %c0_31] : memref<10x8x256xf32, #tpu.memory_space<vmem>>, vector<8x8x256xf32>
    %41 = vector.shape_cast %40 : vector<8x8x256xf32> to vector<64x256xf32>
    %c0_32 = arith.constant 0 : index
    %c0_33 = arith.constant 0 : index
    %c0_34 = arith.constant 0 : index
    %42 = vector.load %arg4[%c0_32, %c0_33, %c0_34] : memref<3x256x256xf32, #tpu.memory_space<vmem>>, vector<1x256x256xf32>
    %43 = vector.shape_cast %42 : vector<1x256x256xf32> to vector<256x256xf32>
    %cst_35 = arith.constant dense<0.000000e+00> : vector<64x256xf32>
    %44 = tpu.matmul %41, %43, %cst_35 {dimension_numbers = #tpu.dot_dimension_numbers<[1], [0], [0], [1], [0, 0, 1, 1], [], []>} : vector<64x256xf32>, vector<256x256xf32>, vector<64x256xf32> -> vector<64x256xf32>
    %c1_36 = arith.constant 1 : index
    %c0_37 = arith.constant 0 : index
    %c0_38 = arith.constant 0 : index
    %45 = vector.load %arg13[%c1_36, %c0_37, %c0_38] : memref<10x8x256xf32, #tpu.memory_space<vmem>>, vector<8x8x256xf32>
    %46 = vector.shape_cast %45 : vector<8x8x256xf32> to vector<64x256xf32>
    %c1_39 = arith.constant 1 : index
    %c0_40 = arith.constant 0 : index
    %c0_41 = arith.constant 0 : index
    %47 = vector.load %arg4[%c1_39, %c0_40, %c0_41] : memref<3x256x256xf32, #tpu.memory_space<vmem>>, vector<1x256x256xf32>
    %48 = vector.shape_cast %47 : vector<1x256x256xf32> to vector<256x256xf32>
    %cst_42 = arith.constant dense<0.000000e+00> : vector<64x256xf32>
    %49 = tpu.matmul %46, %48, %cst_42 {dimension_numbers = #tpu.dot_dimension_numbers<[1], [0], [0], [1], [0, 0, 1, 1], [], []>} : vector<64x256xf32>, vector<256x256xf32>, vector<64x256xf32> -> vector<64x256xf32>
    %50 = arith.addf %44, %49 : vector<64x256xf32>
    %c2_43 = arith.constant 2 : index
    %c0_44 = arith.constant 0 : index
    %c0_45 = arith.constant 0 : index
    %51 = vector.load %arg13[%c2_43, %c0_44, %c0_45] : memref<10x8x256xf32, #tpu.memory_space<vmem>>, vector<8x8x256xf32>
    %52 = vector.shape_cast %51 : vector<8x8x256xf32> to vector<64x256xf32>
    %c2_46 = arith.constant 2 : index
    %c0_47 = arith.constant 0 : index
    %c0_48 = arith.constant 0 : index
    %53 = vector.load %arg4[%c2_46, %c0_47, %c0_48] : memref<3x256x256xf32, #tpu.memory_space<vmem>>, vector<1x256x256xf32>
    %54 = vector.shape_cast %53 : vector<1x256x256xf32> to vector<256x256xf32>
    %cst_49 = arith.constant dense<0.000000e+00> : vector<64x256xf32>
    %55 = tpu.matmul %52, %54, %cst_49 {dimension_numbers = #tpu.dot_dimension_numbers<[1], [0], [0], [1], [0, 0, 1, 1], [], []>} : vector<64x256xf32>, vector<256x256xf32>, vector<64x256xf32> -> vector<64x256xf32>
    %56 = arith.addf %50, %55 : vector<64x256xf32>
    %c0_50 = arith.constant 0 : index
    %c0_51 = arith.constant 0 : index
    %57 = vector.load %arg5[%c0_50, %c0_51] : memref<1x256xf32, #tpu.memory_space<vmem>>, vector<1x256xf32>
    %58 = vector.broadcast %57 : vector<1x256xf32> to vector<64x256xf32>
    %59 = arith.addf %56, %58 : vector<64x256xf32>
    %cst_52 = arith.constant 0.000000e+00 : f32
    %60 = vector.broadcast %cst_52 : f32 to vector<64x256xf32>
    %61 = arith.maximumf %59, %60 : vector<64x256xf32>
    %62 = vector.shape_cast %61 : vector<64x256xf32> to vector<4x2x8x256xf32>
    %63 = vector.extract_strided_slice %62 {offsets = [0, 0, 0, 0], sizes = [4, 1, 8, 256], strides = [1, 1, 1, 1]} : vector<4x2x8x256xf32> to vector<4x1x8x256xf32>
    %64 = vector.shape_cast %63 : vector<4x1x8x256xf32> to vector<4x8x256xf32>
    %65 = vector.extract_strided_slice %62 {offsets = [0, 1, 0, 0], sizes = [4, 1, 8, 256], strides = [1, 1, 1, 1]} : vector<4x2x8x256xf32> to vector<4x1x8x256xf32>
    %66 = vector.shape_cast %65 : vector<4x1x8x256xf32> to vector<4x8x256xf32>
    %67 = arith.maximumf %64, %66 : vector<4x8x256xf32>
    %68 = vector.shape_cast %67 : vector<4x8x256xf32> to vector<32x256xf32>
    %c224_i32 = arith.constant 224 : i32
    %69 = tpu.dynamic_rotate %68 by %c224_i32 dim 1 : vector<32x256xf32>, i32 -> vector<32x256xf32>
    %70 = arith.maximumf %68, %69 : vector<32x256xf32>
    %71 = vector.shape_cast %70 : vector<32x256xf32> to vector<4x8x256xf32>
    %cst_53 = arith.constant 0.000000e+00 : f32
    %72 = vector.broadcast %cst_53 : f32 to vector<8x256xf32>
    %c0_54 = arith.constant 0 : index
    %c0_55 = arith.constant 0 : index
    %c0_56 = arith.constant 0 : index
    %73 = vector.load %arg14[%c0_54, %c0_55, %c0_56] : memref<6x8x256xf32, #tpu.memory_space<vmem>>, vector<1x8x256xf32>
    %74 = vector.shape_cast %73 : vector<1x8x256xf32> to vector<8x256xf32>
    %75 = vector.shape_cast %72 : vector<8x256xf32> to vector<1x8x256xf32>
    tpu.vector_store %arg14[%c0_54, %c0_55, %c0_56], %75 {strides = array<i32>} : memref<6x8x256xf32, #tpu.memory_space<vmem>>, vector<1x8x256xf32>,
    %c5 = arith.constant 5 : index
    %c0_57 = arith.constant 0 : index
    %c0_58 = arith.constant 0 : index
    %76 = vector.load %arg14[%c5, %c0_57, %c0_58] : memref<6x8x256xf32, #tpu.memory_space<vmem>>, vector<1x8x256xf32>
    %77 = vector.shape_cast %76 : vector<1x8x256xf32> to vector<8x256xf32>
    %78 = vector.shape_cast %72 : vector<8x256xf32> to vector<1x8x256xf32>
    tpu.vector_store %arg14[%c5, %c0_57, %c0_58], %78 {strides = array<i32>} : memref<6x8x256xf32, #tpu.memory_space<vmem>>, vector<1x8x256xf32>,
    %c1_59 = arith.constant 1 : index
    %c0_60 = arith.constant 0 : index
    %c0_61 = arith.constant 0 : index
    %79 = vector.load %arg14[%c1_59, %c0_60, %c0_61] : memref<6x8x256xf32, #tpu.memory_space<vmem>>, vector<4x8x256xf32>
    tpu.vector_store %arg14[%c1_59, %c0_60, %c0_61], %71 {strides = array<i32>} : memref<6x8x256xf32, #tpu.memory_space<vmem>>, vector<4x8x256xf32>,
    %c0_62 = arith.constant 0 : index
    %c0_63 = arith.constant 0 : index
    %c0_64 = arith.constant 0 : index
    %80 = vector.load %arg14[%c0_62, %c0_63, %c0_64] : memref<6x8x256xf32, #tpu.memory_space<vmem>>, vector<4x8x256xf32>
    %81 = vector.shape_cast %80 : vector<4x8x256xf32> to vector<32x256xf32>
    %c0_65 = arith.constant 0 : index
    %c0_66 = arith.constant 0 : index
    %c0_67 = arith.constant 0 : index
    %82 = vector.load %arg6[%c0_65, %c0_66, %c0_67] : memref<3x256x256xf32, #tpu.memory_space<vmem>>, vector<1x256x256xf32>
    %83 = vector.shape_cast %82 : vector<1x256x256xf32> to vector<256x256xf32>
    %cst_68 = arith.constant dense<0.000000e+00> : vector<32x256xf32>
    %84 = tpu.matmul %81, %83, %cst_68 {dimension_numbers = #tpu.dot_dimension_numbers<[1], [0], [0], [1], [0, 0, 1, 1], [], []>} : vector<32x256xf32>, vector<256x256xf32>, vector<32x256xf32> -> vector<32x256xf32>
    %c1_69 = arith.constant 1 : index
    %c0_70 = arith.constant 0 : index
    %c0_71 = arith.constant 0 : index
    %85 = vector.load %arg14[%c1_69, %c0_70, %c0_71] : memref<6x8x256xf32, #tpu.memory_space<vmem>>, vector<4x8x256xf32>
    %86 = vector.shape_cast %85 : vector<4x8x256xf32> to vector<32x256xf32>
    %c1_72 = arith.constant 1 : index
    %c0_73 = arith.constant 0 : index
    %c0_74 = arith.constant 0 : index
    %87 = vector.load %arg6[%c1_72, %c0_73, %c0_74] : memref<3x256x256xf32, #tpu.memory_space<vmem>>, vector<1x256x256xf32>
    %88 = vector.shape_cast %87 : vector<1x256x256xf32> to vector<256x256xf32>
    %cst_75 = arith.constant dense<0.000000e+00> : vector<32x256xf32>
    %89 = tpu.matmul %86, %88, %cst_75 {dimension_numbers = #tpu.dot_dimension_numbers<[1], [0], [0], [1], [0, 0, 1, 1], [], []>} : vector<32x256xf32>, vector<256x256xf32>, vector<32x256xf32> -> vector<32x256xf32>
    %90 = arith.addf %84, %89 : vector<32x256xf32>
    %c2_76 = arith.constant 2 : index
    %c0_77 = arith.constant 0 : index
    %c0_78 = arith.constant 0 : index
    %91 = vector.load %arg14[%c2_76, %c0_77, %c0_78] : memref<6x8x256xf32, #tpu.memory_space<vmem>>, vector<4x8x256xf32>
    %92 = vector.shape_cast %91 : vector<4x8x256xf32> to vector<32x256xf32>
    %c2_79 = arith.constant 2 : index
    %c0_80 = arith.constant 0 : index
    %c0_81 = arith.constant 0 : index
    %93 = vector.load %arg6[%c2_79, %c0_80, %c0_81] : memref<3x256x256xf32, #tpu.memory_space<vmem>>, vector<1x256x256xf32>
    %94 = vector.shape_cast %93 : vector<1x256x256xf32> to vector<256x256xf32>
    %cst_82 = arith.constant dense<0.000000e+00> : vector<32x256xf32>
    %95 = tpu.matmul %92, %94, %cst_82 {dimension_numbers = #tpu.dot_dimension_numbers<[1], [0], [0], [1], [0, 0, 1, 1], [], []>} : vector<32x256xf32>, vector<256x256xf32>, vector<32x256xf32> -> vector<32x256xf32>
    %96 = arith.addf %90, %95 : vector<32x256xf32>
    %c0_83 = arith.constant 0 : index
    %c0_84 = arith.constant 0 : index
    %97 = vector.load %arg7[%c0_83, %c0_84] : memref<1x256xf32, #tpu.memory_space<vmem>>, vector<1x256xf32>
    %98 = vector.broadcast %97 : vector<1x256xf32> to vector<32x256xf32>
    %99 = arith.addf %96, %98 : vector<32x256xf32>
    %cst_85 = arith.constant 0.000000e+00 : f32
    %100 = vector.broadcast %cst_85 : f32 to vector<32x256xf32>
    %101 = arith.maximumf %99, %100 : vector<32x256xf32>
    %102 = vector.shape_cast %101 : vector<32x256xf32> to vector<2x2x8x256xf32>
    %103 = vector.extract_strided_slice %102 {offsets = [0, 0, 0, 0], sizes = [2, 1, 8, 256], strides = [1, 1, 1, 1]} : vector<2x2x8x256xf32> to vector<2x1x8x256xf32>
    %104 = vector.shape_cast %103 : vector<2x1x8x256xf32> to vector<2x8x256xf32>
    %105 = vector.extract_strided_slice %102 {offsets = [0, 1, 0, 0], sizes = [2, 1, 8, 256], strides = [1, 1, 1, 1]} : vector<2x2x8x256xf32> to vector<2x1x8x256xf32>
    %106 = vector.shape_cast %105 : vector<2x1x8x256xf32> to vector<2x8x256xf32>
    %107 = arith.maximumf %104, %106 : vector<2x8x256xf32>
    %108 = vector.shape_cast %107 : vector<2x8x256xf32> to vector<16x256xf32>
    %c192_i32 = arith.constant 192 : i32
    %109 = tpu.dynamic_rotate %108 by %c192_i32 dim 1 : vector<16x256xf32>, i32 -> vector<16x256xf32>
    %110 = arith.maximumf %108, %109 : vector<16x256xf32>
    %111 = vector.shape_cast %110 : vector<16x256xf32> to vector<2x8x256xf32>
    %112 = vector.extract_strided_slice %111 {offsets = [0, 0, 0], sizes = [1, 8, 256], strides = [1, 1, 1]} : vector<2x8x256xf32> to vector<1x8x256xf32>
    %113 = vector.shape_cast %112 : vector<1x8x256xf32> to vector<8x256xf32>
    %c0_86 = arith.constant 0 : index
    %c0_87 = arith.constant 0 : index
    %c0_88 = arith.constant 0 : index
    %114 = vector.load %arg8[%c0_86, %c0_87, %c0_88] : memref<2x256x128xf32, #tpu.memory_space<vmem>>, vector<1x256x128xf32>
    %115 = vector.shape_cast %114 : vector<1x256x128xf32> to vector<256x128xf32>
    %cst_89 = arith.constant dense<0.000000e+00> : vector<8x128xf32>
    %116 = tpu.matmul %113, %115, %cst_89 {dimension_numbers = #tpu.dot_dimension_numbers<[1], [0], [0], [1], [0, 0, 1, 1], [], []>} : vector<8x256xf32>, vector<256x128xf32>, vector<8x128xf32> -> vector<8x128xf32>
    %117 = vector.extract_strided_slice %111 {offsets = [1, 0, 0], sizes = [1, 8, 256], strides = [1, 1, 1]} : vector<2x8x256xf32> to vector<1x8x256xf32>
    %118 = vector.shape_cast %117 : vector<1x8x256xf32> to vector<8x256xf32>
    %c1_90 = arith.constant 1 : index
    %c0_91 = arith.constant 0 : index
    %c0_92 = arith.constant 0 : index
    %119 = vector.load %arg8[%c1_90, %c0_91, %c0_92] : memref<2x256x128xf32, #tpu.memory_space<vmem>>, vector<1x256x128xf32>
    %120 = vector.shape_cast %119 : vector<1x256x128xf32> to vector<256x128xf32>
    %cst_93 = arith.constant dense<0.000000e+00> : vector<8x128xf32>
    %121 = tpu.matmul %118, %120, %cst_93 {dimension_numbers = #tpu.dot_dimension_numbers<[1], [0], [0], [1], [0, 0, 1, 1], [], []>} : vector<8x256xf32>, vector<256x128xf32>, vector<8x128xf32> -> vector<8x128xf32>
    %122 = arith.addf %116, %121 : vector<8x128xf32>
    %c0_94 = arith.constant 0 : index
    %c0_95 = arith.constant 0 : index
    %123 = vector.load %arg9[%c0_94, %c0_95] : memref<1x128xf32, #tpu.memory_space<vmem>>, vector<1x128xf32>
    %124 = vector.broadcast %123 : vector<1x128xf32> to vector<8x128xf32>
    %125 = arith.addf %122, %124 : vector<8x128xf32>
    %cst_96 = arith.constant 0.000000e+00 : f32
    %126 = vector.broadcast %cst_96 : f32 to vector<8x128xf32>
    %127 = arith.maximumf %125, %126 : vector<8x128xf32>
    %c0_97 = arith.constant 0 : index
    %c0_98 = arith.constant 0 : index
    %128 = vector.load %arg10[%c0_97, %c0_98] : memref<1x128xf32, #tpu.memory_space<vmem>>, vector<1x128xf32>
    %129 = vector.broadcast %128 : vector<1x128xf32> to vector<8x128xf32>
    %130 = arith.mulf %127, %129 : vector<8x128xf32>
    %cst_99 = arith.constant dense<0.000000e+00> : vector<8xf32>
    %131 = vector.multi_reduction <add>, %130, %cst_99 [1] : vector<8x128xf32> to vector<8xf32>
    %132 = vector.shape_cast %131 : vector<8xf32> to vector<8x1xf32>
    %c0_100 = arith.constant 0 : index
    %c0_101 = arith.constant 0 : index
    %133 = vector.load %arg11[%c0_100, %c0_101] : memref<1x1xf32, #tpu.memory_space<vmem>>, vector<1x1xf32>
    %134 = vector.broadcast %133 : vector<1x1xf32> to vector<8x1xf32>
    %135 = arith.addf %132, %134 : vector<8x1xf32>
    %cst_102 = arith.constant 0.000000e+00 : f32
    %136 = vector.broadcast %cst_102 : f32 to vector<8x1xf32>
    %137 = arith.subf %136, %135 : vector<8x1xf32>
    %138 = math.exp %137 : vector<8x1xf32>
    %cst_103 = arith.constant 1.000000e+00 : f32
    %139 = vector.broadcast %cst_103 : f32 to vector<8x1xf32>
    %140 = arith.addf %139, %138 : vector<8x1xf32>
    %cst_104 = arith.constant 1.000000e+00 : f32
    %141 = vector.broadcast %cst_104 : f32 to vector<8x1xf32>
    %142 = arith.divf %141, %140 : vector<8x1xf32>
    %c0_105 = arith.constant 0 : index
    %c0_106 = arith.constant 0 : index
    %143 = vector.load %arg12[%c0_105, %c0_106] : memref<8x1xf32, #tpu.memory_space<vmem>>, vector<8x1xf32>
    tpu.vector_store %arg12[%c0_105, %c0_106], %142 {strides = array<i32>} : memref<8x1xf32, #tpu.memory_space<vmem>>, vector<8x1xf32>,
    return
  }
  func.func @transform_0(%arg0: i32) -> (i32, i32, i32) {
    %c0_i32 = arith.constant 0 : i32
    %c0_i32_0 = arith.constant 0 : i32
    %c0_i32_1 = arith.constant 0 : i32
    return %c0_i32, %arg0, %c0_i32_0 : i32, i32, i32
  }
  func.func @transform_1(%arg0: i32) -> (i32, i32, i32) {
    %c0_i32 = arith.constant 0 : i32
    %c0_i32_0 = arith.constant 0 : i32
    %c0_i32_1 = arith.constant 0 : i32
    %c0_i32_2 = arith.constant 0 : i32
    return %c0_i32, %c0_i32_0, %c0_i32_1 : i32, i32, i32
  }
  func.func @transform_2(%arg0: i32) -> (i32, i32) {
    %c0_i32 = arith.constant 0 : i32
    %c0_i32_0 = arith.constant 0 : i32
    %c0_i32_1 = arith.constant 0 : i32
    return %c0_i32, %c0_i32_0 : i32, i32
  }
  func.func @transform_3(%arg0: i32) -> (i32, i32, i32) {
    %c0_i32 = arith.constant 0 : i32
    %c0_i32_0 = arith.constant 0 : i32
    %c0_i32_1 = arith.constant 0 : i32
    %c0_i32_2 = arith.constant 0 : i32
    return %c0_i32, %c0_i32_0, %c0_i32_1 : i32, i32, i32
  }
  func.func @transform_4(%arg0: i32) -> (i32, i32) {
    %c0_i32 = arith.constant 0 : i32
    %c0_i32_0 = arith.constant 0 : i32
    %c0_i32_1 = arith.constant 0 : i32
    return %c0_i32, %c0_i32_0 : i32, i32
  }
  func.func @transform_5(%arg0: i32) -> (i32, i32, i32) {
    %c0_i32 = arith.constant 0 : i32
    %c0_i32_0 = arith.constant 0 : i32
    %c0_i32_1 = arith.constant 0 : i32
    %c0_i32_2 = arith.constant 0 : i32
    return %c0_i32, %c0_i32_0, %c0_i32_1 : i32, i32, i32
  }
  func.func @transform_6(%arg0: i32) -> (i32, i32) {
    %c0_i32 = arith.constant 0 : i32
    %c0_i32_0 = arith.constant 0 : i32
    %c0_i32_1 = arith.constant 0 : i32
    return %c0_i32, %c0_i32_0 : i32, i32
  }
  func.func @transform_7(%arg0: i32) -> (i32, i32, i32) {
    %c0_i32 = arith.constant 0 : i32
    %c0_i32_0 = arith.constant 0 : i32
    %c0_i32_1 = arith.constant 0 : i32
    %c0_i32_2 = arith.constant 0 : i32
    return %c0_i32, %c0_i32_0, %c0_i32_1 : i32, i32, i32
  }
  func.func @transform_8(%arg0: i32) -> (i32, i32) {
    %c0_i32 = arith.constant 0 : i32
    %c0_i32_0 = arith.constant 0 : i32
    %c0_i32_1 = arith.constant 0 : i32
    return %c0_i32, %c0_i32_0 : i32, i32
  }
  func.func @transform_9(%arg0: i32) -> (i32, i32) {
    %c0_i32 = arith.constant 0 : i32
    %c0_i32_0 = arith.constant 0 : i32
    %c0_i32_1 = arith.constant 0 : i32
    return %c0_i32, %c0_i32_0 : i32, i32
  }
  func.func @transform_10(%arg0: i32) -> (i32, i32) {
    %c0_i32 = arith.constant 0 : i32
    %c0_i32_0 = arith.constant 0 : i32
    %c0_i32_1 = arith.constant 0 : i32
    return %c0_i32, %c0_i32_0 : i32, i32
  }
  func.func @transform_11(%arg0: i32) -> (i32, i32) {
    %c0_i32 = arith.constant 0 : i32
    %c0_i32_0 = arith.constant 0 : i32
    return %arg0, %c0_i32 : i32, i32
  }
}

</mosaic_0001>

<bundles_post_ra>
// kernel: tile.18
= control target key start
LH: loop header
LB: loop body
LE: loop exit
PB: predicated region body
PF: predicated region fallthrough
CT: control target
= control target key end

     0   :  { %s28_s0 = inlined_call_operand.vmem [shape: f32[16], index: 0, kind: input, shape index: {}]   ;;  %s29_s1 = inlined_call_operand.vmem [shape: f32[16,16], index: 1, kind: output, shape index: {}]  }
   0x1   :  { %v4_v0 = vld [vmem:[%s28_s0] ss:$0 sm:$0xff] }
   0x2   :  { %5 = vst [vmem:[%s29_s1] sm:$0xff] %v4_v0  ;;  %8 = vst [vmem:[%s29_s1 + $0x8] sm:$0xff] %v4_v0 }

// kernel: tile.19
= control target key start
LH: loop header
LB: loop body
LE: loop exit
PB: predicated region body
PF: predicated region fallthrough
CT: control target
= control target key end

     0   :  { %s7_s6 = smov 3  ;;  %s21_s9 = smov 3  ;;  %vm4_vm0 = vcmask 130048   ;;  %vm11_vm1 = vcmask 1048448   ;;  %vm18_vm2 = vcmask 917248   ;;  %vm25_vm3 = vcmask 786048   ;;  %s128_s0 = inlined_call_operand.vmem [shape: f32[16,16], index: 0, kind: input, shape index: {}]   ;;  %s129_s1 = inlined_call_operand.vmem [shape: f32[1,256], index: 1, kind: output, shape index: {}]  }
   0x1   :  { %v66_v0 = vld [vmem:[%s128_s0 + $0x7] ss:$8 sm:%s7_s6]   ;;  %s81_s10 = smov 112   ;;  %v68_v1 = vld [vmem:[%s128_s0 + $0x5] ss:$8 sm:%s21_s9]   ;;  %s14_s13 = smov 3 }
   0x2   :  { %9 = vrot.lane.b32.xlu0 %v66_v0, %s81_s10  ;;  %s82_s14 = smov 80   ;;  %v67_v2 = vld [vmem:[%s128_s0 + $0x6] ss:$8 sm:%s14_s13]   ;;  %s28_s17 = smov 3  ;;  %vm32_vm4 = vcmask 654848   ;;  %vm39_vm5 = vcmask 523648  }
   0x3   :  { %23 = vrot.lane.b32.xlu1 %v68_v1, %s82_s14  ;;  %v69_v3 = vld [vmem:[%s128_s0 + $0x4] ss:$8 sm:%s28_s17]   ;;  %s35_s20 = smov 3  ;;  %s42_s21 = smov 3  ;;  %vm46_vm6 = vcmask 392448   ;;  %vm53_vm7 = vcmask 261248  }
   0x4   :  { %s83_s22 = smov 96   ;;  %s84_s23 = smov 64   ;;  %v70_v4 = vld [vmem:[%s128_s0 + $0x3] ss:$8 sm:%s35_s20]   ;;  %v71_v5 = vld [vmem:[%s128_s0 + $0x2] ss:$8 sm:%s42_s21]  }
   0x5   :  { %s2_s26 = smov 3  ;;  %s49_s29 = smov 3 }
   0x6   :  { %16 = vrot.lane.b32.xlu0 %v67_v2, %s83_s22  ;;  %v3_v6 = vld [vmem:[%s128_s0] ss:$8 sm:%s2_s26]   ;;  %s85_s3 = smov 48   ;;  %s86_s4 = smov 32  }
   0x7   :  { %30 = vrot.lane.b32.xlu1 %v69_v3, %s84_s23  ;;  %5 = vst.msk [vmem:[#allocation0] ss:$8 sm:$0x3] %vm4_vm0, %v3_v6   ;;  %v72_v7 = vld [vmem:[%s128_s0 + $0x1] ss:$8 sm:%s49_s29]   ;;  %s87_s0 = smov 16  }
   0xa   :  { %37 = vrot.lane.b32.xlu0 %v70_v4, %s85_s3 }
   0xb   :  { %44 = vrot.lane.b32.xlu1 %v71_v5, %s86_s4 }
   0xe   :  { %51 = vrot.lane.b32.xlu0 %v72_v7, %s87_s0 }
  0x74   :  { %v10_v8 = vpop.permute.xlu0 %9  }
  0x75   :  { %12 = vst.msk [vmem:[#allocation0] ss:$8 sm:$0x3] %vm11_vm1, %v10_v8   ;;  %v24_v9 = vpop.permute.xlu1 %23  }
  0x78   :  { %v17_v10 = vpop.permute.xlu0 %16  }
  0x79   :  { %19 = vst.msk [vmem:[#allocation0] ss:$8 sm:$0x3] %vm18_vm2, %v17_v10   ;;  %v31_v11 = vpop.permute.xlu1 %30  }
  0x7a   :  { %26 = vst.msk [vmem:[#allocation0] ss:$8 sm:$0x3] %vm25_vm3, %v24_v9  }
  0x7b   :  { %33 = vst.msk [vmem:[#allocation0] ss:$8 sm:$0x3] %vm32_vm4, %v31_v11  }
  0x7c   :  { %v38_v12 = vpop.permute.xlu0 %37  }
  0x7d   :  { %40 = vst.msk [vmem:[#allocation0] ss:$8 sm:$0x3] %vm39_vm5, %v38_v12   ;;  %v45_v13 = vpop.permute.xlu1 %44  }
  0x7e   :  { %47 = vst.msk [vmem:[#allocation0] ss:$8 sm:$0x3] %vm46_vm6, %v45_v13  }
  0x80   :  { %v52_v14 = vpop.permute.xlu0 %51  }
  0x81   :  { %54 = vst.msk [vmem:[#allocation0] ss:$8 sm:$0x3] %vm53_vm7, %v52_v14  }
  0x88   :  { %v58_v15 = vld [vmem:[#allocation0] sm:$0x1]  ;;  %v62_v16 = vld [vmem:[#allocation0 + $0x8] sm:$0x1] }
  0x89   :  { %60 = vst [vmem:[%s129_s1] sm:$0x1] %v58_v15  ;;  %73 = vst [vmem:[%s129_s1 + $0x1] sm:$0x1] %v62_v16 }

// kernel: tile.23
= control target key start
LH: loop header
LB: loop body
LE: loop exit
PB: predicated region body
PF: predicated region fallthrough
CT: control target
= control target key end

     0   :  { %s22_s0 = inlined_call_operand.vmem [shape: f32[32], index: 0, kind: input, shape index: {}]   ;;  %s23_s1 = inlined_call_operand.vmem [shape: f32[8,32], index: 1, kind: output, shape index: {}]  }
   0x1   :  { %v4_v0 = vld [vmem:[%s22_s0] ss:$0 sm:$0xff] }
   0x2   :  { %5 = vst [vmem:[%s23_s1] sm:$0xff] %v4_v0 }

// kernel: tile.24
= control target key start
LH: loop header
LB: loop body
LE: loop exit
PB: predicated region body
PF: predicated region fallthrough
CT: control target
= control target key end

     0   :  { %s7_s6 = smov 3  ;;  %s14_s9 = smov 3  ;;  %vm4_vm0 = vcmask 261120   ;;  %vm11_vm1 = vcmask 1048320   ;;  %vm18_vm2 = vcmask 785920   ;;  %vm25_vm3 = vcmask 523520   ;;  %s76_s0 = inlined_call_operand.vmem [shape: f32[8,32], index: 0, kind: input, shape index: {}]   ;;  %s77_s1 = inlined_call_operand.vmem [shape: f32[1,256], index: 1, kind: output, shape index: {}]  }
   0x1   :  { %v38_v0 = vld [vmem:[%s76_s0 + $0x3] ss:$4 sm:%s7_s6]   ;;  %s45_s10 = smov 96   ;;  %s21_s11 = smov 3  ;;  %v39_v1 = vld [vmem:[%s76_s0 + $0x2] ss:$4 sm:%s14_s9]  }
   0x2   :  { %9 = vrot.lane.b32.xlu0 %v38_v0, %s45_s10  ;;  %v40_v2 = vld [vmem:[%s76_s0 + $0x1] ss:$4 sm:%s21_s11]   ;;  %s2_s16 = smov 3  ;;  %s46_s17 = smov 32  }
   0x3   :  { %23 = vrot.lane.b32.xlu1 %v40_v2, %s46_s17  ;;  %v3_v3 = vld [vmem:[%s76_s0] ss:$4 sm:%s2_s16]   ;;  %s47_s0 = smov 64  }
   0x4   :  { %5 = vst.msk [vmem:[#allocation0] ss:$8 sm:$0x3] %vm4_vm0, %v3_v3  }
   0x6   :  { %16 = vrot.lane.b32.xlu0 %v39_v1, %s47_s0 }
  0x74   :  { %v10_v4 = vpop.permute.xlu0 %9  }
  0x75   :  { %12 = vst.msk [vmem:[#allocation0] ss:$8 sm:$0x3] %vm11_vm1, %v10_v4   ;;  %v24_v5 = vpop.permute.xlu1 %23  }
  0x78   :  { %v17_v6 = vpop.permute.xlu0 %16  }
  0x79   :  { %19 = vst.msk [vmem:[#allocation0] ss:$8 sm:$0x3] %vm18_vm2, %v17_v6  }
  0x7a   :  { %26 = vst.msk [vmem:[#allocation0] ss:$8 sm:$0x3] %vm25_vm3, %v24_v5  }
  0x81   :  { %v30_v7 = vld [vmem:[#allocation0] sm:$0x1]  ;;  %v34_v8 = vld [vmem:[#allocation0 + $0x8] sm:$0x1] }
  0x82   :  { %32 = vst [vmem:[%s77_s1] sm:$0x1] %v30_v7  ;;  %41 = vst [vmem:[%s77_s1 + $0x1] sm:$0x1] %v34_v8 }

// kernel: tile.28
= control target key start
LH: loop header
LB: loop body
LE: loop exit
PB: predicated region body
PF: predicated region fallthrough
CT: control target
= control target key end

     0   :  { %s22_s0 = inlined_call_operand.vmem [shape: f32[64], index: 0, kind: input, shape index: {}]   ;;  %s23_s1 = inlined_call_operand.vmem [shape: f32[4,64], index: 1, kind: output, shape index: {}]  }
   0x1   :  { %v4_v0 = vld [vmem:[%s22_s0] ss:$0 sm:$0xff] }
   0x2   :  { %5 = vst [vmem:[%s23_s1] sm:$0xf] %v4_v0 }

// kernel: tile.29
= control target key start
LH: loop header
LB: loop body
LE: loop exit
PB: predicated region body
PF: predicated region fallthrough
CT: control target
= control target key end

     0   :  { %s6_s8 = smov 3  ;;  %vm8_vm0 = vcmask 523264   ;;  %s30_s9 = smov 64   ;;  %vm15_vm1 = vcmask 1048064   ;;  %s50_s0 = inlined_call_operand.vmem [shape: f32[4,64], index: 0, kind: input, shape index: {}]   ;;  %s51_s1 = inlined_call_operand.vmem [shape: f32[1,256], index: 1, kind: output, shape index: {}]  }
   0x1   :  { %v4_v0 = vld [vmem:[%s50_s0] sm:$0xf]  ;;  %s11_s0 = smov 3 }
   0x2   :  { %5 = vst [vmem:[#allocation1] sm:$0xf] %v4_v0 }
   0x9   :  { %v12_v1 = vld [vmem:[#allocation1 + $0x1] ss:$2 sm:%s11_s0]   ;;  %v7_v2 = vld [vmem:[#allocation1] ss:$2 sm:%s6_s8]  }
   0xa   :  { %13 = vrot.lane.b32.xlu0 %v12_v1, %s30_s9  ;;  %9 = vst.msk [vmem:[#allocation0] ss:$8 sm:$0x3] %vm8_vm0, %v7_v2  }
  0x7c   :  { %v14_v3 = vpop.permute.xlu0 %13  }
  0x7d   :  { %16 = vst.msk [vmem:[#allocation0] ss:$8 sm:$0x3] %vm15_vm1, %v14_v3  }
  0x84   :  { %v20_v4 = vld [vmem:[#allocation0] sm:$0x1]  ;;  %v24_v5 = vld [vmem:[#allocation0 + $0x8] sm:$0x1] }
  0x85   :  { %22 = vst [vmem:[%s51_s1] sm:$0x1] %v20_v4  ;;  %28 = vst [vmem:[%s51_s1 + $0x1] sm:$0x1] %v24_v5 }

// kernel: net_forward.1
= control target key start
LH: loop header
LB: loop body
LE: loop exit
PB: predicated region body
PF: predicated region fallthrough
CT: control target
= control target key end

     0   :  { %v3688_v3 = vmov 0.0   ;;  %vm122_vm0 = vcmask 785408   ;;  %s3689_s12 = smov 112   ;;  %s3690_s17 = smov 96   ;;  %vm2483_vm4 = vcmask 7168   ;;  %s5982_s1 = inlined_call_operand.vmem [shape: f32[3,96,256], index: 1, kind: input, shape index: {}]   ;;  %s5983_s0 = inlined_call_operand.vmem [shape: f32[18,8,96], index: 0, kind: input, shape index: {}]   ;;  %s5984_s3 = inlined_call_operand.vmem [shape: f32[3,256,256], index: 3, kind: input, shape index: {}]   ;;  %s5985_s2 = inlined_call_operand.vmem [shape: f32[1,256], index: 2, kind: input, shape index: {}]   ;;  %s5986_s5 = inlined_call_operand.vmem [shape: f32[3,256,256], index: 5, kind: input, shape index: {}]   ;;  %s5987_s4 = inlined_call_operand.vmem [shape: f32[1,256], index: 4, kind: input, shape index: {}]   ;;  %s5988_s7 = inlined_call_operand.vmem [shape: f32[2,256,128], index: 7, kind: input, shape index: {}]   ;;  %s5989_s6 = inlined_call_operand.vmem [shape: f32[1,256], index: 6, kind: input, shape index: {}]   ;;  %s5990_s10 = inlined_call_operand.<no memory space> [shape: f32[1,1], index: 10, kind: input, shape index: {}]   ;;  %s5991_s8 = inlined_call_operand.vmem [shape: f32[1,128], index: 8, kind: input, shape index: {}]   ;;  %s5992_s9 = inlined_call_operand.vmem [shape: f32[1,128], index: 9, kind: input, shape index: {}]   ;;  %s5993_s11 = inlined_call_operand.vmem [shape: f32[8,1], index: 11, kind: output, shape index: {}]  }
   0x1   :  { %v57_v0 = vld [vmem:[%s5982_s1 + $0x8] sm:$0xff]  ;;  %v59_v1 = vld [vmem:[%s5982_s1 + $0x18] sm:$0xff]  ;;  %v56_v2 = vld [vmem:[%s5982_s1] sm:$0xff]  ;;  %444 = vmatprep.mubr.f32.mxu0 %v3688_v3  ;;  %235 = vmatprep.mubr.f32.mxu1 %v3688_v3 }
   0x2   :  { %v3002_v4 = vpack.c.bf16 %v59_v1, %v57_v0  ;;  %v58_v5 = vld [vmem:[%s5982_s1 + $0x10] sm:$0xff]  ;;  %v61_v6 = vld [vmem:[%s5982_s1 + $0x28] sm:$0xff]  ;;  %v63_v7 = vld [vmem:[%s5982_s1 + $0x38] sm:$0xff] }
   0x3   :  { %v3004_v8 = vpack.c.bf16 %v58_v5, %v56_v2  ;;  %v3006_v9 = vpack.c.bf16 %v63_v7, %v61_v6  ;;  %v60_v10 = vld [vmem:[%s5982_s1 + $0x20] sm:$0xff]  ;;  %v62_v11 = vld [vmem:[%s5982_s1 + $0x30] sm:$0xff]  ;;  %v65_v12 = vld [vmem:[%s5982_s1 + $0x48] sm:$0xff] }
   0x4   :  { %3003 = vmatprep.subr.bf16.mxu0 %v3002_v4  ;;  %v67_v13 = vld [vmem:[%s5982_s1 + $0x58] sm:$0xff]  ;;  %v3008_v14 = vpack.c.bf16 %v62_v11, %v60_v10  ;;  %v64_v16 = vld [vmem:[%s5982_s1 + $0x40] sm:$0xff]  ;;  %v66_v17 = vld [vmem:[%s5982_s1 + $0x50] sm:$0xff] }
   0x5   :  { %3005 = vmatpush1.bf16.msra.mxu0 %v3004_v8  ;;  %v3010_v15 = vpack.c.bf16 %v67_v13, %v65_v12  ;;  %v69_v18 = vld [vmem:[%s5982_s1 + $0x68] sm:$0xff]  ;;  %v71_v19 = vld [vmem:[%s5982_s1 + $0x78] sm:$0xff]  ;;  %v3012_v20 = vpack.c.bf16 %v66_v17, %v64_v16  ;;  %v68_v22 = vld [vmem:[%s5982_s1 + $0x60] sm:$0xff] }
   0x6   :  { %3007 = vmatprep.subr.bf16.mxu0 %v3006_v9  ;;  %v3014_v21 = vpack.c.bf16 %v71_v19, %v69_v18  ;;  %v70_v23 = vld [vmem:[%s5982_s1 + $0x70] sm:$0xff]  ;;  %v73_v24 = vld [vmem:[%s5982_s1 + $0x88] sm:$0xff]  ;;  %v75_v25 = vld [vmem:[%s5982_s1 + $0x98] sm:$0xff] }
   0x7   :  { %v3016_v26 = vpack.c.bf16 %v70_v23, %v68_v22  ;;  %v3018_v27 = vpack.c.bf16 %v75_v25, %v73_v24  ;;  %v72_v28 = vld [vmem:[%s5982_s1 + $0x80] sm:$0xff]  ;;  %v74_v29 = vld [vmem:[%s5982_s1 + $0x90] sm:$0xff]  ;;  %v77_v30 = vld [vmem:[%s5982_s1 + $0xa8] sm:$0xff] }
   0x8   :  { %v79_v31 = vld [vmem:[%s5982_s1 + $0xb8] sm:$0xff]  ;;  %v3020_v32 = vpack.c.bf16 %v74_v29, %v72_v28  ;;  %v76_v33 = vld [vmem:[%s5982_s1 + $0xa0] sm:$0xff]  ;;  %v2506_v34 = vld [vmem:[%s5982_s1 + $0xc8] sm:$0xff] }
   0x9   :  { %3009 = vmatpush1.bf16.msra.mxu0 %v3008_v14  ;;  %v3022_v35 = vpack.c.bf16 %v79_v31, %v77_v30  ;;  %v78_v36 = vld [vmem:[%s5982_s1 + $0xb0] sm:$0xff]  ;;  %v2508_v37 = vld [vmem:[%s5982_s1 + $0xd8] sm:$0xff]  ;;  %v2505_v38 = vld [vmem:[%s5982_s1 + $0xc0] sm:$0xff] }
   0xa   :  { %3011 = vmatprep.subr.bf16.mxu0 %v3010_v15  ;;  %v2578_v39 = vld [vmem:[%s5982_s1 + $0x188] sm:$0xff]  ;;  %v2580_v40 = vld [vmem:[%s5982_s1 + $0x198] sm:$0xff]  ;;  %v2978_v41 = vpack.c.bf16 %v2508_v37, %v2506_v34  ;;  %v2507_v42 = vld [vmem:[%s5982_s1 + $0xd0] sm:$0xff]  ;;  %v3024_v47 = vpack.c.bf16 %v78_v36, %v76_v33 }
   0xb   :  { %v2577_v43 = vld [vmem:[%s5982_s1 + $0x180] sm:$0xff]  ;;  %v2980_v44 = vpack.c.bf16 %v2507_v42, %v2505_v38  ;;  %v2510_v45 = vld [vmem:[%s5982_s1 + $0xe8] sm:$0xff]  ;;  %v2512_v46 = vld [vmem:[%s5982_s1 + $0xf8] sm:$0xff]  ;;  %v3026_v52 = vpack.c.bf16 %v2580_v40, %v2578_v39 }
   0xc   :  { %v2579_v48 = vld [vmem:[%s5982_s1 + $0x190] sm:$0xff]  ;;  %v2582_v49 = vld [vmem:[%s5982_s1 + $0x1a8] sm:$0xff]  ;;  %2979 = vmatprep.subr.bf16.mxu1 %v2978_v41  ;;  %v2982_v50 = vpack.c.bf16 %v2512_v46, %v2510_v45  ;;  %v2509_v51 = vld [vmem:[%s5982_s1 + $0xe0] sm:$0xff] }
   0xd   :  { %3013 = vmatpush1.bf16.msra.mxu0 %v3012_v20  ;;  %2981 = vmatpush1.bf16.msra.mxu1 %v2980_v44  ;;  %v2511_v53 = vld [vmem:[%s5982_s1 + $0xf0] sm:$0xff]  ;;  %v2514_v54 = vld [vmem:[%s5982_s1 + $0x108] sm:$0xff]  ;;  %v2516_v55 = vld [vmem:[%s5982_s1 + $0x118] sm:$0xff]  ;;  %v3028_v0 = vpack.c.bf16 %v2579_v48, %v2577_v43 }
   0xe   :  { %3015 = vmatprep.subr.bf16.mxu0 %v3014_v21  ;;  %v2584_v56 = vld [vmem:[%s5982_s1 + $0x1b8] sm:$0xff]  ;;  %2983 = vmatprep.subr.bf16.mxu1 %v2982_v50  ;;  %v2984_v57 = vpack.c.bf16 %v2511_v53, %v2509_v51  ;;  %v2986_v58 = vpack.c.bf16 %v2516_v55, %v2514_v54  ;;  %v2513_v59 = vld [vmem:[%s5982_s1 + $0x100] sm:$0xff]  ;;  %v2515_v60 = vld [vmem:[%s5982_s1 + $0x110] sm:$0xff] }
   0xf   :  { %v2518_v61 = vld [vmem:[%s5982_s1 + $0x128] sm:$0xff]  ;;  %v2520_v62 = vld [vmem:[%s5982_s1 + $0x138] sm:$0xff]  ;;  %v40_v63 = vld [vmem:[%s5983_s0] sm:$0xff]  ;;  %v3030_v1 = vpack.c.bf16 %v2584_v56, %v2582_v49  ;;  %v2988_v6 = vpack.c.bf16 %v2515_v60, %v2513_v59 }
  0x10   :  { %v2581_v2 = vld [vmem:[%s5982_s1 + $0x1a0] sm:$0xff]  ;;  %v2583_v4 = vld [vmem:[%s5982_s1 + $0x1b0] sm:$0xff]  ;;  %v2586_v5 = vld [vmem:[%s5982_s1 + $0x1c8] sm:$0xff]  ;;  %v2990_v8 = vpack.c.bf16 %v2520_v62, %v2518_v61 }
  0x11   :  { %3017 = vmatpush1.bf16.msra.mxu0 %v3016_v26  ;;  %2985 = vmatpush1.bf16.msra.mxu1 %v2984_v57  ;;  %v2588_v7 = vld [vmem:[%s5982_s1 + $0x1d8] sm:$0xff]  ;;  %v2517_v9 = vld [vmem:[%s5982_s1 + $0x120] sm:$0xff]  ;;  %v2519_v10 = vld [vmem:[%s5982_s1 + $0x130] sm:$0xff]  ;;  %v3032_v14 = vpack.c.bf16 %v2583_v4, %v2581_v2 }
  0x12   :  { %3019 = vmatprep.subr.bf16.mxu0 %v3018_v27  ;;  %2987 = vmatprep.subr.bf16.mxu1 %v2986_v58  ;;  %v2522_v11 = vld [vmem:[%s5982_s1 + $0x148] sm:$0xff]  ;;  %v2524_v12 = vld [vmem:[%s5982_s1 + $0x158] sm:$0xff]  ;;  %v3034_v15 = vpack.c.bf16 %v2588_v7, %v2586_v5  ;;  %v2585_v16 = vld [vmem:[%s5982_s1 + $0x1c0] sm:$0xff]  ;;  %v2992_v19 = vpack.c.bf16 %v2519_v10, %v2517_v9 }
  0x13   :  { %v3918_v13 = vld [vmem:[%s5983_s0 + $0x8] sm:$0xff]  ;;  %v2587_v17 = vld [vmem:[%s5982_s1 + $0x1d0] sm:$0xff]  ;;  %v2592_v20 = vld [vmem:[%s5982_s1 + $0x1f8] sm:$0xff]  ;;  %v2994_v21 = vpack.c.bf16 %v2524_v12, %v2522_v11 }
  0x14   :  { %v2590_v18 = vld [vmem:[%s5982_s1 + $0x1e8] sm:$0xff]  ;;  %v2521_v22 = vld [vmem:[%s5982_s1 + $0x140] sm:$0xff]  ;;  %v2523_v23 = vld [vmem:[%s5982_s1 + $0x150] sm:$0xff]  ;;  %v3036_v27 = vpack.c.bf16 %v2587_v17, %v2585_v16 }
  0x15   :  { %3021 = vmatpush1.bf16.msra.mxu0 %v3020_v32  ;;  %2989 = vmatpush1.bf16.msra.mxu1 %v2988_v6  ;;  %v2526_v24 = vld [vmem:[%s5982_s1 + $0x168] sm:$0xff]  ;;  %v2528_v25 = vld [vmem:[%s5982_s1 + $0x178] sm:$0xff]  ;;  %v3950_v26 = vld [vmem:[%s5983_s0 + $0x10] sm:$0xff]  ;;  %v3038_v28 = vpack.c.bf16 %v2592_v20, %v2590_v18  ;;  %v2996_v32 = vpack.c.bf16 %v2523_v23, %v2521_v22 }
  0x16   :  { %3023 = vmatprep.subr.bf16.mxu0 %v3022_v35  ;;  %2991 = vmatprep.subr.bf16.mxu1 %v2990_v8  ;;  %v2589_v29 = vld [vmem:[%s5982_s1 + $0x1e0] sm:$0xff]  ;;  %v2591_v30 = vld [vmem:[%s5982_s1 + $0x1f0] sm:$0xff]  ;;  %v2594_v31 = vld [vmem:[%s5982_s1 + $0x208] sm:$0xff]  ;;  %v2998_v34 = vpack.c.bf16 %v2528_v25, %v2526_v24 }
  0x17   :  { %v2596_v33 = vld [vmem:[%s5982_s1 + $0x218] sm:$0xff]  ;;  %v2525_v35 = vld [vmem:[%s5982_s1 + $0x160] sm:$0xff]  ;;  %v2527_v36 = vld [vmem:[%s5982_s1 + $0x170] sm:$0xff]  ;;  %v3040_v38 = vpack.c.bf16 %v2591_v30, %v2589_v29 }
  0x18   :  { %v3976_v37 = vld [vmem:[%s5983_s0 + $0x18] sm:$0xff]  ;;  %v3042_v39 = vpack.c.bf16 %v2596_v33, %v2594_v31  ;;  %v2593_v40 = vld [vmem:[%s5982_s1 + $0x200] sm:$0xff]  ;;  %v2595_v41 = vld [vmem:[%s5982_s1 + $0x210] sm:$0xff]  ;;  %v3000_v42 = vpack.c.bf16 %v2527_v36, %v2525_v35 }
  0x19   :  { %3025 = vmatpush1.bf16.msra.mxu0 %v3024_v47  ;;  %2993 = vmatpush1.bf16.msra.mxu1 %v2992_v19  ;;  %v2598_v43 = vld [vmem:[%s5982_s1 + $0x228] sm:$0xff]  ;;  %v2600_v44 = vld [vmem:[%s5982_s1 + $0x238] sm:$0xff]  ;;  %v3996_v45 = vld [vmem:[%s5983_s0 + $0x20] sm:$0xff]  ;;  %v3044_v46 = vpack.c.bf16 %v2595_v41, %v2593_v40 }
  0x1a   :  { %3027 = vmatprep.subr.bf16.mxu0 %v3026_v52  ;;  %2995 = vmatprep.subr.bf16.mxu1 %v2994_v21  ;;  %v3046_v47 = vpack.c.bf16 %v2600_v44, %v2598_v43  ;;  %v2597_v48 = vld [vmem:[%s5982_s1 + $0x220] sm:$0xff]  ;;  %v2599_v49 = vld [vmem:[%s5982_s1 + $0x230] sm:$0xff]  ;;  %v4010_v50 = vld [vmem:[%s5983_s0 + $0x28] sm:$0xff] }
  0x1b   :  { %v3048_v51 = vpack.c.bf16 %v2599_v49, %v2597_v48  ;;  %v4021_v52 = vld [vmem:[%s5983_s0 + $0x30] sm:$0xff]  ;;  %v4032_v53 = vld [vmem:[%s5983_s0 + $0x38] sm:$0xff]  ;;  %v48_v54 = vld [vmem:[%s5983_s0 + $0x40] sm:$0xff] }
  0x1c   :  { %2545 = vmatmul.mubr.msk.f32.vlgmr.msra.gmra.mrb[0].mxu0 %vm122_vm0, %v40_v63  ;;  %v49_v55 = vld [vmem:[%s5983_s0 + $0x48] sm:$0xff]  ;;  %v50_v56 = vld [vmem:[%s5983_s0 + $0x50] sm:$0xff]  ;;  %v51_v57 = vld [vmem:[%s5983_s0 + $0x58] sm:$0xff] }
  0x1d   :  { %3029 = vmatpush1.bf16.msra.mxu0 %v3028_v0  ;;  %450 = vmatprep.mubr.f32.mxu0 %v3688_v3  ;;  %v52_v58 = vld [vmem:[%s5983_s0 + $0x60] sm:$0xff]  ;;  %v53_v59 = vld [vmem:[%s5983_s0 + $0x68] sm:$0xff]  ;;  %v54_v60 = vld [vmem:[%s5983_s0 + $0x70] sm:$0xff] }
  0x1e   :  { %3031 = vmatprep.subr.bf16.mxu0 %v3030_v1  ;;  %2997 = vmatpush1.bf16.msra.mxu1 %v2996_v32  ;;  %v55_v61 = vld [vmem:[%s5983_s0 + $0x78] sm:$0xff]  ;;  %v2575_v62 = vld [vmem:[%s5983_s0 + $0x80] sm:$0xff]  ;;  %v2576_v63 = vld [vmem:[%s5983_s0 + $0x88] sm:$0xff] }
  0x1f   :  { %2999 = vmatprep.subr.bf16.mxu1 %v2998_v34  ;;  %v2618_v0 = vld [vmem:[%s5984_s3 + $0x208] sm:$0xff]  ;;  %v2620_v1 = vld [vmem:[%s5984_s3 + $0x218] sm:$0xff]  ;;  %v2617_v4 = vld [vmem:[%s5984_s3 + $0x200] sm:$0xff] }
  0x20   :  { %2546 = vmatmul.mubr.msk.f32.gmra.mrb[2].mxu0 %vm122_vm0, %v3918_v13  ;;  %v3050_v2 = vpack.c.bf16 %v2620_v1, %v2618_v0  ;;  %v2619_v5 = vld [vmem:[%s5984_s3 + $0x210] sm:$0xff]  ;;  %v2622_v7 = vld [vmem:[%s5984_s3 + $0x228] sm:$0xff]  ;;  %v2624_v8 = vld [vmem:[%s5984_s3 + $0x238] sm:$0xff] }
  0x21   :  { %456 = vmatprep.mubr.f32.mxu0 %v3688_v3  ;;  %3033 = vmatpush1.bf16.msra.mxu0 %v3032_v14  ;;  %v3052_v6 = vpack.c.bf16 %v2619_v5, %v2617_v4  ;;  %v2621_v9 = vld [vmem:[%s5984_s3 + $0x220] sm:$0xff]  ;;  %v3054_v10 = vpack.c.bf16 %v2624_v8, %v2622_v7  ;;  %v2623_v11 = vld [vmem:[%s5984_s3 + $0x230] sm:$0xff]  ;;  %v2626_v12 = vld [vmem:[%s5984_s3 + $0x248] sm:$0xff] }
  0x22   :  { %3035 = vmatprep.subr.bf16.mxu0 %v3034_v15  ;;  %3001 = vmatpush1.bf16.msra.mxu1 %v3000_v42  ;;  %v3056_v14 = vpack.c.bf16 %v2623_v11, %v2621_v9  ;;  %v2625_v16 = vld [vmem:[%s5984_s3 + $0x240] sm:$0xff]  ;;  %v2627_v17 = vld [vmem:[%s5984_s3 + $0x250] sm:$0xff]  ;;  %v2630_v18 = vld [vmem:[%s5984_s3 + $0x268] sm:$0xff] }
  0x23   :  { %3051 = vmatprep.subr.bf16.mxu1 %v3050_v2  ;;  %v2632_v19 = vld [vmem:[%s5984_s3 + $0x278] sm:$0xff]  ;;  %v3060_v20 = vpack.c.bf16 %v2627_v17, %v2625_v16  ;;  %v2629_v22 = vld [vmem:[%s5984_s3 + $0x260] sm:$0xff]  ;;  %v2631_v23 = vld [vmem:[%s5984_s3 + $0x270] sm:$0xff] }
  0x24   :  { %2547 = vmatmul.mubr.msk.f32.gmra.mrb[4].mxu0 %vm122_vm0, %v3950_v26  ;;  %v3062_v21 = vpack.c.bf16 %v2632_v19, %v2630_v18  ;;  %v2634_v24 = vld [vmem:[%s5984_s3 + $0x288] sm:$0xff]  ;;  %v2636_v25 = vld [vmem:[%s5984_s3 + $0x298] sm:$0xff]  ;;  %v2633_v29 = vld [vmem:[%s5984_s3 + $0x280] sm:$0xff] }
  0x25   :  { %462 = vmatprep.mubr.f32.mxu0 %v3688_v3  ;;  %3037 = vmatpush1.bf16.msra.mxu0 %v3036_v27  ;;  %v2635_v30 = vld [vmem:[%s5984_s3 + $0x290] sm:$0xff]  ;;  %v2638_v32 = vld [vmem:[%s5984_s3 + $0x2a8] sm:$0xff]  ;;  %v2640_v33 = vld [vmem:[%s5984_s3 + $0x2b8] sm:$0xff] }
  0x26   :  { %3039 = vmatprep.subr.bf16.mxu0 %v3038_v28  ;;  %2529 = vmatmul.mubr.msk.f32.vlgmr.msra.gmra.mrb[0].mxu1 %vm122_vm0, %v3918_v13  ;;  %v2628_v13 = vld [vmem:[%s5984_s3 + $0x258] sm:$0xff]  ;;  %v3066_v28 = vpack.c.bf16 %v2636_v25, %v2634_v24  ;;  %v3068_v34 = vpack.c.bf16 %v2635_v30, %v2633_v29  ;;  %v3070_v36 = vpack.c.bf16 %v2640_v33, %v2638_v32  ;;  %v2642_v40 = vld [vmem:[%s5984_s3 + $0x2c8] sm:$0xff]  ;;  %v2655_v7 = vld [vmem:[%s5984_s3 + $0x330] sm:$0xff] }
  0x27   :  { %241 = vmatprep.mubr.f32.mxu1 %v3688_v3  ;;  %3053 = vmatpush1.bf16.msra.mxu1 %v3052_v6  ;;  %v3058_v15 = vpack.c.bf16 %v2628_v13, %v2626_v12  ;;  %v2644_v41 = vld [vmem:[%s5984_s3 + $0x2d8] sm:$0xff]  ;;  %v2646_v48 = vld [vmem:[%s5984_s3 + $0x2e8] sm:$0xff]  ;;  %v2653_v6 = vld [vmem:[%s5984_s3 + $0x320] sm:$0xff] }
  0x28   :  { %2548 = vmatmul.mubr.msk.f32.gmra.mrb[6].mxu0 %vm122_vm0, %v3976_v37  ;;  %3055 = vmatprep.subr.bf16.mxu1 %v3054_v10  ;;  %v3074_v44 = vpack.c.bf16 %v2644_v41, %v2642_v40  ;;  %v2648_v49 = vld [vmem:[%s5984_s3 + $0x2f8] sm:$0xff]  ;;  %v2654_v0 = vld [vmem:[%s5984_s3 + $0x328] sm:$0xff]  ;;  %v3088_v11 = vpack.c.bf16 %v2655_v7, %v2653_v6  ;;  %v2665_v32 = vld [vmem:[%s5984_s3 + $0x380] sm:$0xff] }
  0x29   :  { %468 = vmatprep.mubr.f32.mxu0 %v3688_v3  ;;  %3041 = vmatpush1.bf16.msra.mxu0 %v3040_v38  ;;  %v2639_v38 = vld [vmem:[%s5984_s3 + $0x2b0] sm:$0xff]  ;;  %v2656_v1 = vld [vmem:[%s5984_s3 + $0x338] sm:$0xff]  ;;  %v2658_v9 = vld [vmem:[%s5984_s3 + $0x348] sm:$0xff] }
  0x2a   :  { %3043 = vmatprep.subr.bf16.mxu0 %v3042_v39  ;;  %2530 = vmatmul.mubr.msk.f32.gmra.mrb[2].mxu1 %vm122_vm0, %v3950_v26  ;;  %v3086_v5 = vpack.c.bf16 %v2656_v1, %v2654_v0  ;;  %v2660_v10 = vld [vmem:[%s5984_s3 + $0x358] sm:$0xff]  ;;  %v2662_v17 = vld [vmem:[%s5984_s3 + $0x368] sm:$0xff]  ;;  %v2667_v33 = vld [vmem:[%s5984_s3 + $0x390] sm:$0xff] }
  0x2b   :  { %247 = vmatprep.mubr.f32.mxu1 %v3688_v3  ;;  %3057 = vmatpush1.bf16.msra.mxu1 %v3056_v14  ;;  %v3090_v13 = vpack.c.bf16 %v2660_v10, %v2658_v9  ;;  %v2657_v14 = vld [vmem:[%s5984_s3 + $0x340] sm:$0xff]  ;;  %v2664_v18 = vld [vmem:[%s5984_s3 + $0x378] sm:$0xff]  ;;  %v2666_v25 = vld [vmem:[%s5984_s3 + $0x388] sm:$0xff]  ;;  %v3100_v40 = vpack.c.bf16 %v2667_v33, %v2665_v32 }
  0x2c   :  { %2549 = vmatmul.mubr.msk.f32.gmra.mrb[8].mxu0 %vm122_vm0, %v3996_v45  ;;  %3059 = vmatprep.subr.bf16.mxu1 %v3058_v15  ;;  %v2659_v15 = vld [vmem:[%s5984_s3 + $0x350] sm:$0xff]  ;;  %v2678_v10 = vld [vmem:[%s5984_s3 + $0x3e8] sm:$0xff] }
  0x2d   :  { %474 = vmatprep.mubr.f32.mxu0 %v3688_v3  ;;  %3045 = vmatpush1.bf16.msra.mxu0 %v3044_v46  ;;  %v2643_v46 = vld [vmem:[%s5984_s3 + $0x2d0] sm:$0xff]  ;;  %v3092_v19 = vpack.c.bf16 %v2659_v15, %v2657_v14 }
  0x2e   :  { %3047 = vmatprep.subr.bf16.mxu0 %v3046_v47  ;;  %2531 = vmatmul.mubr.msk.f32.gmra.mrb[4].mxu1 %vm122_vm0, %v3976_v37 }
  0x2f   :  { %253 = vmatprep.mubr.f32.mxu1 %v3688_v3  ;;  %3061 = vmatpush1.bf16.msra.mxu1 %v3060_v20 }
  0x30   :  { %2550 = vmatmul.mubr.msk.f32.gmra.mrb[10].mxu0 %vm122_vm0, %v4010_v50  ;;  %3063 = vmatprep.subr.bf16.mxu1 %v3062_v21  ;;  %v3094_v21 = vpack.c.bf16 %v2664_v18, %v2662_v17  ;;  %v2677_v17 = vld [vmem:[%s5984_s3 + $0x3e0] sm:$0xff]  ;;  %v2679_v18 = vld [vmem:[%s5984_s3 + $0x3f0] sm:$0xff] }
  0x31   :  { %480 = vmatprep.mubr.f32.mxu0 %v3688_v3  ;;  %3049 = vmatpush1.bf16.msra.mxu0 %v3048_v51 }
  0x32   :  { %2532 = vmatmul.mubr.msk.f32.gmra.mrb[6].mxu1 %vm122_vm0, %v3996_v45 }
  0x33   :  { %259 = vmatprep.mubr.f32.mxu1 %v3688_v3 }
  0x34   :  { %2551 = vmatmul.mubr.msk.f32.gmra.mrb[12].mxu0 %vm122_vm0, %v4021_v52 }
  0x35   :  { %486 = vmatprep.mubr.f32.mxu0 %v3688_v3 }
  0x36   :  { %2533 = vmatmul.mubr.msk.f32.gmra.mrb[8].mxu1 %vm122_vm0, %v4010_v50 }
  0x37   :  { %265 = vmatprep.mubr.f32.mxu1 %v3688_v3 }
  0x38   :  { %2552 = vmatmul.mubr.msk.f32.gmra.mrb[14].mxu0 %vm122_vm0, %v4032_v53 }
  0x39   :  { %492 = vmatprep.mubr.f32.mxu0 %v3688_v3 }
  0x3a   :  { %2534 = vmatmul.mubr.msk.f32.gmra.mrb[10].mxu1 %vm122_vm0, %v4021_v52 }
  0x3b   :  { %271 = vmatprep.mubr.f32.mxu1 %v3688_v3 }
  0x3c   :  { %2553 = vmatmul.mubr.msk.f32.gmra.mrb[16].mxu0 %vm122_vm0, %v48_v54 }
  0x3d   :  { %498 = vmatprep.mubr.f32.mxu0 %v3688_v3 }
  0x3e   :  { %2535 = vmatmul.mubr.msk.f32.gmra.mrb[12].mxu1 %vm122_vm0, %v4032_v53 }
  0x3f   :  { %277 = vmatprep.mubr.f32.mxu1 %v3688_v3 }
  0x40   :  { %2554 = vmatmul.mubr.msk.f32.gmra.mrb[18].mxu0 %vm122_vm0, %v49_v55 }
  0x41   :  { %504 = vmatprep.mubr.f32.mxu0 %v3688_v3 }
  0x42   :  { %2536 = vmatmul.mubr.msk.f32.gmra.mrb[14].mxu1 %vm122_vm0, %v48_v54 }
  0x43   :  { %283 = vmatprep.mubr.f32.mxu1 %v3688_v3 }
  0x44   :  { %2555 = vmatmul.mubr.msk.f32.gmra.mrb[20].mxu0 %vm122_vm0, %v50_v56 }
  0x45   :  { %510 = vmatprep.mubr.f32.mxu0 %v3688_v3 }
  0x46   :  { %2537 = vmatmul.mubr.msk.f32.gmra.mrb[16].mxu1 %vm122_vm0, %v49_v55 }
  0x47   :  { %289 = vmatprep.mubr.f32.mxu1 %v3688_v3 }
  0x48   :  { %2556 = vmatmul.mubr.msk.f32.gmra.mrb[22].mxu0 %vm122_vm0, %v51_v57 }
  0x49   :  { %516 = vmatprep.mubr.f32.mxu0 %v3688_v3 }
  0x4a   :  { %2538 = vmatmul.mubr.msk.f32.gmra.mrb[18].mxu1 %vm122_vm0, %v50_v56 }
  0x4b   :  { %295 = vmatprep.mubr.f32.mxu1 %v3688_v3 }
  0x4c   :  { %2557 = vmatmul.mubr.msk.f32.gmra.mrb[24].mxu0 %vm122_vm0, %v52_v58 }
  0x4d   :  { %522 = vmatprep.mubr.f32.mxu0 %v3688_v3 }
  0x4e   :  { %2539 = vmatmul.mubr.msk.f32.gmra.mrb[20].mxu1 %vm122_vm0, %v51_v57 }
  0x4f   :  { %301 = vmatprep.mubr.f32.mxu1 %v3688_v3 }
  0x50   :  { %2558 = vmatmul.mubr.msk.f32.gmra.mrb[26].mxu0 %vm122_vm0, %v53_v59 }
  0x51   :  { %528 = vmatprep.mubr.f32.mxu0 %v3688_v3 }
  0x52   :  { %2540 = vmatmul.mubr.msk.f32.gmra.mrb[22].mxu1 %vm122_vm0, %v52_v58 }
  0x53   :  { %307 = vmatprep.mubr.f32.mxu1 %v3688_v3 }
  0x54   :  { %2559 = vmatmul.mubr.msk.f32.gmra.mrb[28].mxu0 %vm122_vm0, %v54_v60 }
  0x55   :  { %534 = vmatprep.mubr.f32.mxu0 %v3688_v3 }
  0x56   :  { %2541 = vmatmul.mubr.msk.f32.gmra.mrb[24].mxu1 %vm122_vm0, %v53_v59 }
  0x57   :  { %313 = vmatprep.mubr.f32.mxu1 %v3688_v3 }
  0x58   :  { %2560 = vmatmul.mubr.msk.f32.gmra.mrb[30].mxu0 %vm122_vm0, %v55_v61 }
  0x59   :  { %695 = vmatprep.mubr.f32.mxu0 %v3688_v3 }
  0x5a   :  { %2542 = vmatmul.mubr.msk.f32.gmra.mrb[26].mxu1 %vm122_vm0, %v54_v60 }
  0x5b   :  { %319 = vmatprep.mubr.f32.mxu1 %v3688_v3 }
  0x5c   :  { %2601 = vmatmul.mubr.msk.f32.vlgmr.msra.gmra.mrb[0].mxu0 %vm122_vm0, %v3950_v26  ;;  %v3064_v26 = vpack.c.bf16 %v2631_v23, %v2629_v22  ;;  %v2661_v22 = vld [vmem:[%s5984_s3 + $0x360] sm:$0xff]  ;;  %v2663_v23 = vld [vmem:[%s5984_s3 + $0x370] sm:$0xff] }
  0x5d   :  { %701 = vmatprep.mubr.f32.mxu0 %v3688_v3 }
  0x5e   :  { %2543 = vmatmul.mubr.msk.f32.gmra.mrb[28].mxu1 %vm122_vm0, %v55_v61 }
  0x5f   :  { %325 = vmatprep.mubr.f32.mxu1 %v3688_v3  ;;  %3065 = vmatpush1.bf16.msra.mxu1 %v3064_v26  ;;  %v2668_v26 = vld [vmem:[%s5984_s3 + $0x398] sm:$0xff] }
  0x60   :  { %2602 = vmatmul.mubr.msk.f32.gmra.mrb[2].mxu0 %vm122_vm0, %v3976_v37  ;;  %3067 = vmatprep.subr.bf16.mxu1 %v3066_v28  ;;  %v2637_v37 = vld [vmem:[%s5984_s3 + $0x2a0] sm:$0xff]  ;;  %v3096_v28 = vpack.c.bf16 %v2663_v23, %v2661_v22  ;;  %v3098_v30 = vpack.c.bf16 %v2668_v26, %v2666_v25  ;;  %v1022_v26 = vld [vmem:[%s5984_s3 + $0x8] sm:$0xff] }
  0x61   :  { %707 = vmatprep.mubr.f32.mxu0 %v3688_v3  ;;  %v3072_v42 = vpack.c.bf16 %v2639_v38, %v2637_v37  ;;  %v2672_v37 = vld [vmem:[%s5984_s3 + $0x3b8] sm:$0xff]  ;;  %v826_v38 = vlaneseq }
  0x62   :  { %2544 = vmatmul.mubr.msk.f32.gmra.mrb[30].mxu1 %vm122_vm0, %v2575_v62 }
  0x63   :  { %3069 = vmatpush1.bf16.msra.mxu1 %v3068_v34 }
  0x64   :  { %2603 = vmatmul.mubr.msk.f32.gmra.mrb[4].mxu0 %vm122_vm0, %v3996_v45  ;;  %3071 = vmatprep.subr.bf16.mxu1 %v3070_v36  ;;  %v2641_v45 = vld [vmem:[%s5984_s3 + $0x2c0] sm:$0xff]  ;;  %v2670_v36 = vld [vmem:[%s5984_s3 + $0x3a8] sm:$0xff] }
  0x65   :  { %713 = vmatprep.mubr.f32.mxu0 %v3688_v3 }
  0x67   :  { %3073 = vmatpush1.bf16.msra.mxu1 %v3072_v42  ;;  %v3102_v42 = vpack.c.bf16 %v2672_v37, %v2670_v36 }
  0x68   :  { %2604 = vmatmul.mubr.msk.f32.gmra.mrb[6].mxu0 %vm122_vm0, %v4010_v50  ;;  %v3076_v50 = vpack.c.bf16 %v2643_v46, %v2641_v45  ;;  %3075 = vmatprep.subr.bf16.mxu1 %v3074_v44  ;;  %v2669_v44 = vld [vmem:[%s5984_s3 + $0x3a0] sm:$0xff]  ;;  %v2671_v45 = vld [vmem:[%s5984_s3 + $0x3b0] sm:$0xff] }
  0x69   :  { %719 = vmatprep.mubr.f32.mxu0 %v3688_v3 }
  0x6b   :  { %3077 = vmatpush1.bf16.msra.mxu1 %v3076_v50  ;;  %v827_v50 = vshrl.u32 %v826_v38, 7 }
  0x6c   :  { %2605 = vmatmul.mubr.msk.f32.gmra.mrb[8].mxu0 %vm122_vm0, %v4021_v52  ;;  %v3078_v52 = vpack.c.bf16 %v2648_v49, %v2646_v48  ;;  %v2674_v48 = vld [vmem:[%s5984_s3 + $0x3c8] sm:$0xff]  ;;  %v2676_v49 = vld [vmem:[%s5984_s3 + $0x3d8] sm:$0xff] }
  0x6d   :  { %725 = vmatprep.mubr.f32.mxu0 %v3688_v3  ;;  %v4382_v0 = vsub.s32 1, %v827_v50 }
  0x6e   :  { %3079 = vmatprep.subr.bf16.mxu1 %v3078_v52  ;;  %v3104_v52 = vpack.c.bf16 %v2671_v45, %v2669_v44 }
  0x70   :  { %2606 = vmatmul.mubr.msk.f32.gmra.mrb[10].mxu0 %vm122_vm0, %v4032_v53  ;;  %v2645_v53 = vld [vmem:[%s5984_s3 + $0x2e0] sm:$0xff] }
  0x71   :  { %731 = vmatprep.mubr.f32.mxu0 %v3688_v3 }
  0x74   :  { %2607 = vmatmul.mubr.msk.f32.gmra.mrb[12].mxu0 %vm122_vm0, %v48_v54  ;;  %v2647_v54 = vld [vmem:[%s5984_s3 + $0x2f0] sm:$0xff] }
  0x75   :  { %737 = vmatprep.mubr.f32.mxu0 %v3688_v3 }
  0x78   :  { %2608 = vmatmul.mubr.msk.f32.gmra.mrb[14].mxu0 %vm122_vm0, %v49_v55 }
  0x79   :  { %743 = vmatprep.mubr.f32.mxu0 %v3688_v3 }
  0x7c   :  { %2609 = vmatmul.mubr.msk.f32.gmra.mrb[16].mxu0 %vm122_vm0, %v50_v56  ;;  %v2650_v56 = vld [vmem:[%s5984_s3 + $0x308] sm:$0xff] }
  0x7d   :  { %749 = vmatprep.mubr.f32.mxu0 %v3688_v3 }
  0x80   :  { %2610 = vmatmul.mubr.msk.f32.gmra.mrb[18].mxu0 %vm122_vm0, %v51_v57  ;;  %v2652_v57 = vld [vmem:[%s5984_s3 + $0x318] sm:$0xff] }
  0x81   :  { %755 = vmatprep.mubr.f32.mxu0 %v3688_v3 }
  0x84   :  { %2611 = vmatmul.mubr.msk.f32.gmra.mrb[20].mxu0 %vm122_vm0, %v52_v58  ;;  %v3080_v58 = vpack.c.bf16 %v2647_v54, %v2645_v53  ;;  %v3106_v54 = vpack.c.bf16 %v2676_v49, %v2674_v48 }
  0x85   :  { %761 = vmatprep.mubr.f32.mxu0 %v3688_v3 }
  0x86   :  { %3081 = vmatpush1.bf16.msra.mxu1 %v3080_v58 }
  0x88   :  { %2612 = vmatmul.mubr.msk.f32.gmra.mrb[22].mxu0 %vm122_vm0, %v53_v59 }
  0x89   :  { %767 = vmatprep.mubr.f32.mxu0 %v3688_v3 }
  0x8c   :  { %2613 = vmatmul.mubr.msk.f32.gmra.mrb[24].mxu0 %vm122_vm0, %v54_v60  ;;  %v3082_v60 = vpack.c.bf16 %v2652_v57, %v2650_v56  ;;  %v2673_v56 = vld [vmem:[%s5984_s3 + $0x3c0] sm:$0xff]  ;;  %v2675_v57 = vld [vmem:[%s5984_s3 + $0x3d0] sm:$0xff] }
  0x8d   :  { %773 = vmatprep.mubr.f32.mxu0 %v3688_v3 }
  0x8e   :  { %3083 = vmatprep.subr.bf16.mxu1 %v3082_v60  ;;  %v4377_v60 = vsub.s32 0, %v827_v50 }
  0x90   :  { %2614 = vmatmul.mubr.msk.f32.gmra.mrb[26].mxu0 %vm122_vm0, %v55_v61  ;;  %v2649_v61 = vld [vmem:[%s5984_s3 + $0x300] sm:$0xff] }
  0x91   :  { %779 = vmatprep.mubr.f32.mxu0 %v3688_v3 }
  0x94   :  { %2615 = vmatmul.mubr.msk.f32.gmra.mrb[28].mxu0 %vm122_vm0, %v2575_v62  ;;  %v2651_v62 = vld [vmem:[%s5984_s3 + $0x310] sm:$0xff] }
  0x95   :  { %785 = vmatprep.mubr.f32.mxu0 %v3688_v3  ;;  %v3084_v2 = vpack.c.bf16 %v2651_v62, %v2649_v61  ;;  %v3108_v61 = vpack.c.bf16 %v2675_v57, %v2673_v56  ;;  %v824_v62 = vld [vmem:[%s5985_s2] sm:$0x3]  ;;  %s3691_s2 = smov 64  }
  0x96   :  { %v4390_v7 = vrot.slane %v824_v62, %v4377_v60  ;;  %v4400_v14 = vrot.slane %v824_v62, %v4382_v0 }
  0x97   :  { %3085 = vmatpush1.bf16.msra.mxu1 %v3084_v2 }
  0x98   :  { %2616 = vmatmul.mubr.msk.f32.gmra.mrb[30].mxu0 %vm122_vm0, %v2576_v63  ;;  %3087 = vmatprep.subr.bf16.mxu1 %v3086_v5 }
  0x9b   :  { %3089 = vmatpush1.bf16.msra.mxu1 %v3088_v11  ;;  %v2680_v11 = vld [vmem:[%s5984_s3 + $0x3f8] sm:$0xff] }
  0x9c   :  { %3091 = vmatprep.subr.bf16.mxu1 %v3090_v13 }
  0x9f   :  { %3093 = vmatpush1.bf16.msra.mxu1 %v3092_v19 }
  0xa0   :  { %3095 = vmatprep.subr.bf16.mxu1 %v3094_v21  ;;  %v3112_v21 = vpack.c.bf16 %v2679_v18, %v2677_v17 }
  0xa3   :  { %3097 = vmatpush1.bf16.msra.mxu1 %v3096_v28  ;;  %v1024_v28 = vld [vmem:[%s5984_s3 + $0x18] sm:$0xff] }
  0xa4   :  { %3099 = vmatprep.subr.bf16.mxu1 %v3098_v30  ;;  %v3114_v36 = vpack.c.bf16 %v1024_v28, %v1022_v26 }
  0xa7   :  { %3101 = vmatpush1.bf16.msra.mxu1 %v3100_v40 }
  0xa8   :  { %3103 = vmatprep.subr.bf16.mxu1 %v3102_v42 }
  0xab   :  { %3105 = vmatpush1.bf16.msra.mxu1 %v3104_v52 }
  0xac   :  { %3107 = vmatprep.subr.bf16.mxu1 %v3106_v54 }
  0xaf   :  { %3109 = vmatpush1.bf16.msra.mxu1 %v3108_v61 }
  0xf9   :  { %v4206_v27 = vpop.f32.mrb[0].mxu1 }
  0xfa   :  { %v4214_v31 = vpop.f32.mrb[1].mxu1 }
  0xfd   :  { %v4222_v35 = vpop.f32.mrb[2].mxu1 }
  0xfe   :  { %v4230_v39 = vpop.f32.mrb[3].mxu1 }
 0x101   :  { %v4238_v43 = vpop.f32.mrb[4].mxu1 }
 0x102   :  { %v4246_v47 = vpop.f32.mrb[5].mxu1 }
 0x105   :  { %v4254_v51 = vpop.f32.mrb[6].mxu1 }
 0x106   :  { %v4262_v55 = vpop.f32.mrb[7].mxu1 }
 0x109   :  { %v4270_v59 = vpop.f32.mrb[8].mxu1 }
 0x10a   :  { %v4278_v63 = vpop.f32.mrb[9].mxu1 }
 0x10d   :  { %v4286_v4 = vpop.f32.mrb[10].mxu1 }
 0x10e   :  { %v4294_v8 = vpop.f32.mrb[11].mxu1 }
 0x111   :  { %v4302_v12 = vpop.f32.mrb[12].mxu1 }
 0x112   :  { %v4310_v16 = vpop.f32.mrb[13].mxu1 }
 0x115   :  { %v4318_v20 = vpop.f32.mrb[14].mxu1 }
 0x116   :  { %v4326_v24 = vpop.f32.mrb[15].mxu1 }
 0x119   :  { %v4334_v29 = vpop.f32.mrb[16].mxu1 }
 0x11a   :  { %v4342_v34 = vpop.f32.mrb[17].mxu1 }
 0x11d   :  { %v4350_v41 = vpop.f32.mrb[18].mxu1 }
 0x11e   :  { %v4358_v46 = vpop.f32.mrb[19].mxu1 }
 0x121   :  { %v4367_v53 = vpop.f32.mrb[20].mxu1 }
 0x122   :  { %v4375_v58 = vpop.f32.mrb[21].mxu1 }
 0x125   :  { %v4384_v1 = vpop.f32.mrb[22].mxu1 }
 0x126   :  { %v4386_v2 = vpop.f32.mrb[23].mxu1 }
 0x129   :  { %v4402_v15 = vpop.f32.mrb[24].mxu1 }
 0x12a   :  { %v4410_v19 = vpop.f32.mrb[25].mxu1 }
 0x12d   :  { %v4422_v33 = vpop.f32.mrb[26].mxu1 }
 0x12f   :  { %v697_v5 = vpop.f32.mrb[0].mxu0 }
 0x130   :  { %v3498_v6 = vadd.f32 %v697_v5, %v4206_v27  ;;  %v699_v9 = vpop.f32.mrb[1].mxu0  ;;  %v3110_v27 = vpack.c.bf16 %v2680_v11, %v2678_v10 }
 0x131   :  { %v3499_v13 = vadd.f32 %v699_v9, %v4214_v31 }
 0x132   :  { %3111 = vmatprep.subr.bf16.mxu1 %v3110_v27  ;;  %v836_v31 = vadd.f32 %v3498_v6, %v4390_v7 }
 0x133   :  { %v703_v22 = vpop.f32.mrb[2].mxu0  ;;  %3113 = vmatpush1.bf16.msra.mxu1 %v3112_v21  ;;  %v837_v30 = vadd.f32 %v3499_v13, %v4400_v14 }
 0x134   :  { %v3500_v23 = vadd.f32 %v703_v22, %v4222_v35  ;;  %v705_v25 = vpop.f32.mrb[3].mxu0  ;;  %v4425_v35 = vpop.f32.mrb[27].mxu1  ;;  %3115 = vmatprep.subr.bf16.mxu1 %v3114_v36  ;;  %v868_v44 = vmax.f32 %v836_v31, 0.0 }
 0x135   :  { %v3501_v32 = vadd.f32 %v705_v25, %v4230_v39  ;;  %v869_v50 = vmax.f32 %v837_v30, 0.0  ;;  %v4430_v54 = vpop.f32.mrb[28].mxu1 }
 0x136   :  { %v838_v37 = vadd.f32 %v3500_v23, %v4390_v7  ;;  %v4434_v57 = vpop.f32.mrb[29].mxu1 }
 0x137   :  { %v839_v40 = vadd.f32 %v3501_v32, %v4400_v14  ;;  %v709_v42 = vpop.f32.mrb[4].mxu0  ;;  %v4444_v11 = vpop.f32.mrb[30].mxu1 }
 0x138   :  { %v870_v45 = vmax.f32 %v838_v37, 0.0  ;;  %v3502_v48 = vadd.f32 %v709_v42, %v4238_v43  ;;  %v711_v49 = vpop.f32.mrb[5].mxu0  ;;  %v4447_v27 = vpop.f32.mrb[31].mxu1 }
 0x139   :  { %v871_v52 = vmax.f32 %v839_v40, 0.0  ;;  %v3503_v39 = vadd.f32 %v711_v49, %v4246_v47 }
 0x13a   :  { %v4432_v56 = vmax.f32 %v868_v44, %v870_v45  ;;  %v840_v5 = vadd.f32 %v3502_v48, %v4390_v7 }
 0x13b   :  { %v715_v61 = vpop.f32.mrb[6].mxu0  ;;  %v4436_v62 = vmax.f32 %v869_v50, %v871_v52  ;;  %v841_v43 = vadd.f32 %v3503_v39, %v4400_v14 }
 0x13c   :  { %v3504_v6 = vadd.f32 %v715_v61, %v4254_v51  ;;  %v717_v9 = vpop.f32.mrb[7].mxu0  ;;  %v872_v18 = vmax.f32 %v840_v5, 0.0 }
 0x13d   :  { %v3505_v10 = vadd.f32 %v717_v9, %v4262_v55  ;;  %v3614_v47 = vpack.i.bf16 %v4436_v62, %v4432_v56  ;;  %v873_v31 = vmax.f32 %v841_v43, 0.0 }
 0x13e   :  { %v842_v13 = vadd.f32 %v3504_v6, %v4390_v7 }
 0x13f   :  { %v843_v17 = vadd.f32 %v3505_v10, %v4400_v14  ;;  %3615 = vrot.lane.b32.xlu0 %v3614_v47, %s3689_s12  ;;  %v721_v51 = vpop.f32.mrb[8].mxu0 }
 0x140   :  { %v874_v21 = vmax.f32 %v842_v13, 0.0  ;;  %v3506_v22 = vadd.f32 %v721_v51, %v4270_v59  ;;  %v723_v55 = vpop.f32.mrb[9].mxu0 }
 0x141   :  { %v875_v23 = vmax.f32 %v843_v17, 0.0  ;;  %v3507_v25 = vadd.f32 %v723_v55, %v4278_v63 }
 0x142   :  { %v4453_v26 = vmax.f32 %v872_v18, %v874_v21  ;;  %v844_v32 = vadd.f32 %v3506_v22, %v4390_v7 }
 0x143   :  { %v4455_v28 = vmax.f32 %v873_v31, %v875_v23  ;;  %v727_v30 = vpop.f32.mrb[10].mxu0  ;;  %v845_v40 = vadd.f32 %v3507_v25, %v4400_v14 }
 0x144   :  { %v3508_v36 = vadd.f32 %v727_v30, %v4286_v4  ;;  %v729_v37 = vpop.f32.mrb[11].mxu0  ;;  %v876_v48 = vmax.f32 %v844_v32, 0.0 }
 0x145   :  { %v3509_v42 = vadd.f32 %v729_v37, %v4294_v8  ;;  %v3619_v59 = vpack.i.bf16 %v4455_v28, %v4453_v26  ;;  %v877_v52 = vmax.f32 %v845_v40, 0.0 }
 0x146   :  { %v846_v44 = vadd.f32 %v3508_v36, %v4390_v7 }
 0x147   :  { %v847_v63 = vadd.f32 %v3509_v42, %v4400_v14  ;;  %3620 = vrot.lane.b32.xlu0 %v3619_v59, %s3689_s12  ;;  %v733_v45 = vpop.f32.mrb[12].mxu0 }
 0x148   :  { %v878_v49 = vmax.f32 %v846_v44, 0.0  ;;  %v3510_v50 = vadd.f32 %v733_v45, %v4302_v12  ;;  %v735_v4 = vpop.f32.mrb[13].mxu0 }
 0x149   :  { %v879_v39 = vmax.f32 %v847_v63, 0.0  ;;  %v3511_v61 = vadd.f32 %v735_v4, %v4310_v16 }
 0x14a   :  { %v4468_v8 = vmax.f32 %v876_v48, %v878_v49  ;;  %v848_v9 = vadd.f32 %v3510_v50, %v4390_v7 }
 0x14b   :  { %v739_v5 = vpop.f32.mrb[14].mxu0  ;;  %v4470_v6 = vmax.f32 %v877_v52, %v879_v39  ;;  %v849_v47 = vadd.f32 %v3511_v61, %v4400_v14 }
 0x14c   :  { %v3512_v43 = vadd.f32 %v739_v5, %v4318_v20  ;;  %v741_v10 = vpop.f32.mrb[15].mxu0  ;;  %v880_v18 = vmax.f32 %v848_v9, 0.0 }
 0x14d   :  { %v3513_v13 = vadd.f32 %v741_v10, %v4326_v24  ;;  %v3624_v12 = vpack.i.bf16 %v4470_v6, %v4468_v8  ;;  %v881_v55 = vmax.f32 %v849_v47, 0.0 }
 0x14e   :  { %v850_v17 = vadd.f32 %v3512_v43, %v4390_v7 }
 0x14f   :  { %v851_v16 = vadd.f32 %v3513_v13, %v4400_v14  ;;  %3625 = vrot.lane.b32.xlu1 %v3624_v12, %s3689_s12  ;;  %v745_v51 = vpop.f32.mrb[16].mxu0 }
 0x150   :  { %v882_v21 = vmax.f32 %v850_v17, 0.0  ;;  %v3514_v22 = vadd.f32 %v745_v51, %v4334_v29  ;;  %v747_v20 = vpop.f32.mrb[17].mxu0 }
 0x151   :  { %v883_v31 = vmax.f32 %v851_v16, 0.0  ;;  %v3515_v23 = vadd.f32 %v747_v20, %v4342_v34 }
 0x152   :  { %v4483_v24 = vmax.f32 %v880_v18, %v882_v21  ;;  %v852_v32 = vadd.f32 %v3514_v22, %v4390_v7 }
 0x153   :  { %v4485_v25 = vmax.f32 %v881_v55, %v883_v31  ;;  %v751_v30 = vpop.f32.mrb[18].mxu0  ;;  %v853_v40 = vadd.f32 %v3515_v23, %v4400_v14 }
 0x154   :  { %v3516_v36 = vadd.f32 %v751_v30, %v4350_v41  ;;  %v753_v37 = vpop.f32.mrb[19].mxu0  ;;  %v884_v63 = vmax.f32 %v852_v32, 0.0 }
 0x155   :  { %v3517_v42 = vadd.f32 %v753_v37, %v4358_v46  ;;  %v3629_v29 = vpack.i.bf16 %v4485_v25, %v4483_v24  ;;  %v885_v49 = vmax.f32 %v853_v40, 0.0 }
 0x156   :  { %v854_v59 = vadd.f32 %v3516_v36, %v4390_v7 }
 0x157   :  { %v855_v34 = vadd.f32 %v3517_v42, %v4400_v14  ;;  %3630 = vrot.lane.b32.xlu1 %v3629_v29, %s3689_s12  ;;  %v757_v44 = vpop.f32.mrb[20].mxu0 }
 0x158   :  { %v886_v45 = vmax.f32 %v854_v59, 0.0  ;;  %v3518_v48 = vadd.f32 %v757_v44, %v4367_v53  ;;  %v759_v41 = vpop.f32.mrb[21].mxu0 }
 0x159   :  { %v887_v50 = vmax.f32 %v855_v34, 0.0  ;;  %v3519_v4 = vadd.f32 %v759_v41, %v4375_v58 }
 0x15a   :  { %v4498_v46 = vmax.f32 %v884_v63, %v886_v45  ;;  %v856_v61 = vadd.f32 %v3518_v48, %v4390_v7 }
 0x15b   :  { %v4500_v52 = vmax.f32 %v885_v49, %v887_v50  ;;  %v763_v39 = vpop.f32.mrb[22].mxu0  ;;  %v857_v43 = vadd.f32 %v3519_v4, %v4400_v14 }
 0x15c   :  { %v3520_v5 = vadd.f32 %v763_v39, %v4384_v1  ;;  %v765_v9 = vpop.f32.mrb[23].mxu0  ;;  %v888_v12 = vmax.f32 %v856_v61, 0.0 }
 0x15d   :  { %v3521_v10 = vadd.f32 %v765_v9, %v4386_v2  ;;  %v3634_v53 = vpack.i.bf16 %v4500_v52, %v4498_v46  ;;  %v889_v51 = vmax.f32 %v857_v43, 0.0 }
 0x15e   :  { %v858_v47 = vadd.f32 %v3520_v5, %v4390_v7 }
 0x15f   :  { %v859_v58 = vadd.f32 %v3521_v10, %v4400_v14  ;;  %3635 = vrot.lane.b32.xlu0 %v3634_v53, %s3689_s12  ;;  %v769_v13 = vpop.f32.mrb[24].mxu0  ;;  %v4549_v53 = vand.u32 127, %v826_v38  ;;  %v1028_v38 = vld [vmem:[%s5984_s3 + $0x38] sm:$0xff] }
 0x160   :  { %v890_v17 = vmax.f32 %v858_v47, 0.0  ;;  %v3522_v16 = vadd.f32 %v769_v13, %v4402_v15  ;;  %v771_v1 = vpop.f32.mrb[25].mxu0  ;;  %v1023_v13 = vld [vmem:[%s5984_s3 + $0x10] sm:$0xff] }
 0x161   :  { %v891_v18 = vmax.f32 %v859_v58, 0.0  ;;  %v3523_v21 = vadd.f32 %v771_v1, %v4410_v19  ;;  %vm950_vm1 = vcmp.lt.s32.totalorder %v4549_v53, 112  ;;  %v1021_v58 = vld [vmem:[%s5984_s3] sm:$0xff]  ;;  %vm1671_vm2 = vcmp.lt.s32.totalorder %v4549_v53, 96 }
 0x162   :  { %v4513_v2 = vmax.f32 %v888_v12, %v890_v17  ;;  %v860_v55 = vadd.f32 %v3522_v16, %v4390_v7  ;;  %v1026_v12 = vld [vmem:[%s5984_s3 + $0x28] sm:$0xff]  ;;  %vm2236_vm3 = vcmp.lt.s32.totalorder %v4549_v53, 64  ;;  %v2905_v53 = vld [vmem:[%s5991_s8] ss:$0 sm:$0xff] }
 0x163   :  { %v4515_v22 = vmax.f32 %v889_v51, %v891_v18  ;;  %v775_v20 = vpop.f32.mrb[26].mxu0  ;;  %v861_v30 = vadd.f32 %v3523_v21, %v4400_v14  ;;  %v3116_v18 = vpack.c.bf16 %v1023_v13, %v1021_v58  ;;  %v3118_v21 = vpack.c.bf16 %v1028_v38, %v1026_v12  ;;  %v1041_v58 = vld [vmem:[%s5984_s3 + $0xa0] sm:$0xff]  ;;  %v1043_v13 = vld [vmem:[%s5984_s3 + $0xb0] sm:$0xff] }
 0x164   :  { %v3524_v31 = vadd.f32 %v775_v20, %v4422_v33  ;;  %v777_v23 = vpop.f32.mrb[27].mxu0  ;;  %v892_v40 = vmax.f32 %v860_v55, 0.0  ;;  %v1025_v20 = vld [vmem:[%s5984_s3 + $0x20] sm:$0xff]  ;;  %v1027_v55 = vld [vmem:[%s5984_s3 + $0x30] sm:$0xff]  ;;  %v3136_v38 = vpack.c.bf16 %v1043_v13, %v1041_v58  ;;  %v1066_v13 = vld [vmem:[%s5984_s3 + $0x168] sm:$0xff] }
 0x165   :  { %v3525_v32 = vadd.f32 %v777_v23, %v4425_v35  ;;  %v3639_v15 = vpack.i.bf16 %v4515_v22, %v4513_v2  ;;  %v893_v59 = vmax.f32 %v861_v30, 0.0  ;;  %v3120_v23 = vpack.c.bf16 %v1027_v55, %v1025_v20  ;;  %v1047_v20 = vld [vmem:[%s5984_s3 + $0xd0] sm:$0xff]  ;;  %v1050_v55 = vld [vmem:[%s5984_s3 + $0xe8] sm:$0xff] }
 0x166   :  { %v862_v36 = vadd.f32 %v3524_v31, %v4390_v7  ;;  %v1063_v58 = vld [vmem:[%s5984_s3 + $0x150] sm:$0xff] }
 0x167   :  { %v863_v19 = vadd.f32 %v3525_v32, %v4400_v14  ;;  %3640 = vrot.lane.b32.xlu1 %v3639_v15, %s3689_s12  ;;  %v781_v37 = vpop.f32.mrb[28].mxu0 }
 0x168   :  { %v894_v42 = vmax.f32 %v862_v36, 0.0  ;;  %v3526_v29 = vadd.f32 %v781_v37, %v4430_v54  ;;  %v783_v33 = vpop.f32.mrb[29].mxu0  ;;  %v1029_v36 = vld [vmem:[%s5984_s3 + $0x40] sm:$0xff]  ;;  %v1034_v37 = vld [vmem:[%s5984_s3 + $0x68] sm:$0xff] }
 0x169   :  { %v895_v34 = vmax.f32 %v863_v19, 0.0  ;;  %v3527_v44 = vadd.f32 %v783_v33, %v4434_v57  ;;  %v1031_v19 = vld [vmem:[%s5984_s3 + $0x50] sm:$0xff] }
 0x16a   :  { %v4528_v35 = vmax.f32 %v892_v40, %v894_v42  ;;  %v864_v48 = vadd.f32 %v3526_v29, %v4390_v7  ;;  %v1036_v40 = vld [vmem:[%s5984_s3 + $0x78] sm:$0xff] }
 0x16b   :  { %v4530_v63 = vmax.f32 %v893_v59, %v895_v34  ;;  %v787_v45 = vpop.f32.mrb[30].mxu0  ;;  %v865_v50 = vadd.f32 %v3527_v44, %v4400_v14  ;;  %v3124_v34 = vpack.c.bf16 %v1031_v19, %v1029_v36  ;;  %v3126_v44 = vpack.c.bf16 %v1036_v40, %v1034_v37  ;;  %v1049_v36 = vld [vmem:[%s5984_s3 + $0xe0] sm:$0xff]  ;;  %v1051_v19 = vld [vmem:[%s5984_s3 + $0xf0] sm:$0xff] }
 0x16c   :  { %v3528_v41 = vadd.f32 %v787_v45, %v4444_v11  ;;  %v789_v49 = vpop.f32.mrb[31].mxu0  ;;  %v896_v61 = vmax.f32 %v864_v48, 0.0  ;;  %v1033_v45 = vld [vmem:[%s5984_s3 + $0x60] sm:$0xff]  ;;  %v1035_v48 = vld [vmem:[%s5984_s3 + $0x70] sm:$0xff]  ;;  %v3144_v40 = vpack.c.bf16 %v1051_v19, %v1049_v36  ;;  %v1074_v19 = vld [vmem:[%s5984_s3 + $0x1a8] sm:$0xff] }
 0x16d   :  { %v3529_v4 = vadd.f32 %v789_v49, %v4447_v27  ;;  %v3644_v54 = vpack.i.bf16 %v4530_v63, %v4528_v35  ;;  %v897_v9 = vmax.f32 %v865_v50, 0.0  ;;  %v3128_v49 = vpack.c.bf16 %v1035_v48, %v1033_v45  ;;  %v1055_v45 = vld [vmem:[%s5984_s3 + $0x110] sm:$0xff]  ;;  %v1058_v48 = vld [vmem:[%s5984_s3 + $0x128] sm:$0xff] }
 0x16e   :  { %v866_v39 = vadd.f32 %v3528_v41, %v4390_v7  ;;  %v1071_v36 = vld [vmem:[%s5984_s3 + $0x190] sm:$0xff] }
 0x16f   :  { %v867_v57 = vadd.f32 %v3529_v4, %v4400_v14  ;;  %3645 = vrot.lane.b32.xlu0 %v3644_v54, %s3689_s12 }
 0x170   :  { %v898_v5 = vmax.f32 %v866_v39, 0.0  ;;  %v1037_v39 = vld [vmem:[%s5984_s3 + $0x80] sm:$0xff] }
 0x171   :  { %v899_v43 = vmax.f32 %v867_v57, 0.0  ;;  %v1039_v57 = vld [vmem:[%s5984_s3 + $0x90] sm:$0xff] }
 0x172   :  { %v4541_v10 = vmax.f32 %v896_v61, %v898_v5  ;;  %v1042_v61 = vld [vmem:[%s5984_s3 + $0xa8] sm:$0xff]  ;;  %v1044_v5 = vld [vmem:[%s5984_s3 + $0xb8] sm:$0xff] }
 0x173   :  { %v4543_v11 = vmax.f32 %v897_v9, %v899_v43 }
 0x175   :  { %v3649_v27 = vpack.i.bf16 %v4543_v11, %v4541_v10 }
 0x177   :  { %3650 = vrot.lane.b32.xlu1 %v3649_v27, %s3689_s12 }
 0x1b1   :  { %v3616_v7 = vpop.permute.xlu0 %3615 }
 0x1b2   :  { %v3618_v14 = vunpack.i.h.bf16 %v3616_v7  ;;  %v3617_v47 = vunpack.i.l.bf16 %v3616_v7 }
 0x1b4   :  { %v951_v17 = vsel %vm950_vm1, %v3617_v47, %v3618_v14  ;;  %v959_v16 = vsel %vm950_vm1, %v3618_v14, %v3617_v47  ;;  %v3132_v14 = vpack.c.bf16 %v1039_v57, %v1037_v39  ;;  %v3134_v47 = vpack.c.bf16 %v1044_v5, %v1042_v61  ;;  %v1057_v39 = vld [vmem:[%s5984_s3 + $0x120] sm:$0xff]  ;;  %v1059_v57 = vld [vmem:[%s5984_s3 + $0x130] sm:$0xff] }
 0x1b5   :  { %v4569_v1 = vmax.f32 %v4432_v56, %v951_v17  ;;  %v4572_v51 = vmax.f32 %v4436_v62, %v959_v16  ;;  %v1030_v56 = vld [vmem:[%s5984_s3 + $0x48] sm:$0xff]  ;;  %v1032_v62 = vld [vmem:[%s5984_s3 + $0x58] sm:$0xff]  ;;  %v3152_v5 = vpack.c.bf16 %v1059_v57, %v1057_v39  ;;  %v1079_v39 = vld [vmem:[%s5984_s3 + $0x1d0] sm:$0xff] }
 0x1b6   :  { %v3122_v15 = vpack.c.bf16 %v1032_v62, %v1030_v56  ;;  %v1052_v56 = vld [vmem:[%s5984_s3 + $0xf8] sm:$0xff]  ;;  %v1082_v57 = vld [vmem:[%s5984_s3 + $0x1e8] sm:$0xff] }
 0x1b7   :  { %1230 = vmatprep.mubr.f32.mxu1 %v4572_v51 }
 0x1b8   :  { %1231 = vmatmul.mubr.f32.vlgmr.msra.gmra.mrb[32].mxu1 %v4569_v1 }
 0x1b9   :  { %3117 = vmatpush1.bf16.msra.mxu1 %v3116_v18  ;;  %v3621_v31 = vpop.permute.xlu0 %3620 }
 0x1ba   :  { %v3623_v30 = vunpack.i.h.bf16 %v3621_v31  ;;  %v3622_v32 = vunpack.i.l.bf16 %v3621_v31  ;;  %3119 = vmatprep.subr.bf16.mxu1 %v3118_v21  ;;  %v1045_v21 = vld [vmem:[%s5984_s3 + $0xc0] sm:$0xff] }
 0x1bc   :  { %v960_v42 = vsel %vm950_vm1, %v3623_v30, %v3622_v32  ;;  %v952_v29 = vsel %vm950_vm1, %v3622_v32, %v3623_v30  ;;  %v3140_v32 = vpack.c.bf16 %v1047_v20, %v1045_v21  ;;  %v1065_v21 = vld [vmem:[%s5984_s3 + $0x160] sm:$0xff]  ;;  %v1067_v20 = vld [vmem:[%s5984_s3 + $0x170] sm:$0xff] }
 0x1bd   :  { %3121 = vmatpush1.bf16.msra.mxu1 %v3120_v23  ;;  %v4605_v33 = vmax.f32 %v4455_v28, %v960_v42  ;;  %v4608_v59 = vmax.f32 %v4453_v26, %v952_v29  ;;  %v1038_v28 = vld [vmem:[%s5984_s3 + $0x88] sm:$0xff]  ;;  %v1040_v26 = vld [vmem:[%s5984_s3 + $0x98] sm:$0xff] }
 0x1be   :  { %3123 = vmatprep.subr.bf16.mxu1 %v3122_v15  ;;  %v3130_v54 = vpack.c.bf16 %v1040_v26, %v1038_v28  ;;  %v3142_v15 = vpack.c.bf16 %v1052_v56, %v1050_v55  ;;  %v1060_v28 = vld [vmem:[%s5984_s3 + $0x138] sm:$0xff]  ;;  %v3160_v56 = vpack.c.bf16 %v1067_v20, %v1065_v21 }
 0x1bf   :  { %1236 = vmatprep.mubr.f32.mxu1 %v4605_v33 }
 0x1c0   :  { %1237 = vmatmul.mubr.f32.gmra.mrb[34].mxu1 %v4608_v59 }
 0x1c1   :  { %3125 = vmatpush1.bf16.msra.mxu1 %v3124_v34  ;;  %v3626_v41 = vpop.permute.xlu1 %3625 }
 0x1c2   :  { %v3628_v50 = vunpack.i.h.bf16 %v3626_v41  ;;  %v3627_v4 = vunpack.i.l.bf16 %v3626_v41  ;;  %3127 = vmatprep.subr.bf16.mxu1 %v3126_v44  ;;  %v1053_v44 = vld [vmem:[%s5984_s3 + $0x100] sm:$0xff] }
 0x1c4   :  { %v961_v9 = vsel %vm950_vm1, %v3628_v50, %v3627_v4  ;;  %v953_v43 = vsel %vm950_vm1, %v3627_v4, %v3628_v50  ;;  %v3148_v4 = vpack.c.bf16 %v1055_v45, %v1053_v44  ;;  %v1073_v44 = vld [vmem:[%s5984_s3 + $0x1a0] sm:$0xff]  ;;  %v1075_v45 = vld [vmem:[%s5984_s3 + $0x1b0] sm:$0xff] }
 0x1c5   :  { %3129 = vmatpush1.bf16.msra.mxu1 %v3128_v49  ;;  %v4641_v27 = vmax.f32 %v4470_v6, %v961_v9  ;;  %v4644_v7 = vmax.f32 %v4468_v8, %v953_v43  ;;  %v1046_v6 = vld [vmem:[%s5984_s3 + $0xc8] sm:$0xff]  ;;  %v1048_v8 = vld [vmem:[%s5984_s3 + $0xd8] sm:$0xff] }
 0x1c6   :  { %3131 = vmatprep.subr.bf16.mxu1 %v3130_v54  ;;  %v3138_v18 = vpack.c.bf16 %v1048_v8, %v1046_v6  ;;  %v3150_v54 = vpack.c.bf16 %v1060_v28, %v1058_v48  ;;  %v1068_v6 = vld [vmem:[%s5984_s3 + $0x178] sm:$0xff]  ;;  %v3168_v28 = vpack.c.bf16 %v1075_v45, %v1073_v44  ;;  %v2697_v45 = vld [vmem:[%s5984_s3 + $0x480] sm:$0xff] }
 0x1c7   :  { %1242 = vmatprep.mubr.f32.mxu1 %v4641_v27 }
 0x1c8   :  { %1243 = vmatmul.mubr.f32.gmra.mrb[36].mxu1 %v4644_v7 }
 0x1c9   :  { %3133 = vmatpush1.bf16.msra.mxu1 %v3132_v14  ;;  %v3631_v12 = vpop.permute.xlu1 %3630 }
 0x1ca   :  { %v3633_v17 = vunpack.i.h.bf16 %v3631_v12  ;;  %v3632_v16 = vunpack.i.l.bf16 %v3631_v12  ;;  %3135 = vmatprep.subr.bf16.mxu1 %v3134_v47  ;;  %v1061_v47 = vld [vmem:[%s5984_s3 + $0x140] sm:$0xff] }
 0x1cc   :  { %v962_v62 = vsel %vm950_vm1, %v3633_v17, %v3632_v16  ;;  %v954_v31 = vsel %vm950_vm1, %v3632_v16, %v3633_v17  ;;  %v3156_v16 = vpack.c.bf16 %v1063_v58, %v1061_v47  ;;  %v1081_v47 = vld [vmem:[%s5984_s3 + $0x1e0] sm:$0xff]  ;;  %v1083_v58 = vld [vmem:[%s5984_s3 + $0x1f0] sm:$0xff] }
 0x1cd   :  { %3137 = vmatpush1.bf16.msra.mxu1 %v3136_v38  ;;  %v4677_v23 = vmax.f32 %v4485_v25, %v962_v62  ;;  %v4680_v30 = vmax.f32 %v4483_v24, %v954_v31  ;;  %v1054_v25 = vld [vmem:[%s5984_s3 + $0x108] sm:$0xff]  ;;  %v1056_v24 = vld [vmem:[%s5984_s3 + $0x118] sm:$0xff] }
 0x1ce   :  { %3139 = vmatprep.subr.bf16.mxu1 %v3138_v18  ;;  %v3146_v34 = vpack.c.bf16 %v1056_v24, %v1054_v25  ;;  %v3158_v18 = vpack.c.bf16 %v1068_v6, %v1066_v13  ;;  %v1076_v25 = vld [vmem:[%s5984_s3 + $0x1b8] sm:$0xff]  ;;  %v3176_v13 = vpack.c.bf16 %v1083_v58, %v1081_v47 }
 0x1cf   :  { %1248 = vmatprep.mubr.f32.mxu1 %v4677_v23 }
 0x1d0   :  { %1249 = vmatmul.mubr.f32.gmra.mrb[38].mxu1 %v4680_v30 }
 0x1d1   :  { %3141 = vmatpush1.bf16.msra.mxu1 %v3140_v32  ;;  %v3636_v37 = vpop.permute.xlu0 %3635 }
 0x1d2   :  { %v3638_v42 = vunpack.i.h.bf16 %v3636_v37  ;;  %v3637_v29 = vunpack.i.l.bf16 %v3636_v37  ;;  %3143 = vmatprep.subr.bf16.mxu1 %v3142_v15  ;;  %v1069_v15 = vld [vmem:[%s5984_s3 + $0x180] sm:$0xff] }
 0x1d4   :  { %v963_v26 = vsel %vm950_vm1, %v3638_v42, %v3637_v29  ;;  %v955_v41 = vsel %vm950_vm1, %v3637_v29, %v3638_v42  ;;  %v3164_v29 = vpack.c.bf16 %v1071_v36, %v1069_v15  ;;  %v2691_v15 = vld [vmem:[%s5984_s3 + $0x450] sm:$0xff]  ;;  %v2694_v36 = vld [vmem:[%s5984_s3 + $0x468] sm:$0xff] }
 0x1d5   :  { %3145 = vmatpush1.bf16.msra.mxu1 %v3144_v40  ;;  %v4713_v49 = vmax.f32 %v4500_v52, %v963_v26  ;;  %v4716_v50 = vmax.f32 %v4498_v46, %v955_v41  ;;  %v1062_v52 = vld [vmem:[%s5984_s3 + $0x148] sm:$0xff]  ;;  %v1064_v46 = vld [vmem:[%s5984_s3 + $0x158] sm:$0xff] }
 0x1d6   :  { %3147 = vmatprep.subr.bf16.mxu1 %v3146_v34  ;;  %v3154_v14 = vpack.c.bf16 %v1064_v46, %v1062_v52  ;;  %v3166_v34 = vpack.c.bf16 %v1076_v25, %v1074_v19  ;;  %v1084_v52 = vld [vmem:[%s5984_s3 + $0x1f8] sm:$0xff] }
 0x1d7   :  { %1254 = vmatprep.mubr.f32.mxu1 %v4713_v49 }
 0x1d8   :  { %1255 = vmatmul.mubr.f32.gmra.mrb[40].mxu1 %v4716_v50 }
 0x1d9   :  { %3149 = vmatpush1.bf16.msra.mxu1 %v3148_v4  ;;  %v3641_v61 = vpop.permute.xlu1 %3640 }
 0x1da   :  { %v3643_v9 = vunpack.i.h.bf16 %v3641_v61  ;;  %v3642_v43 = vunpack.i.l.bf16 %v3641_v61  ;;  %3151 = vmatprep.subr.bf16.mxu1 %v3150_v54  ;;  %v1077_v54 = vld [vmem:[%s5984_s3 + $0x1c0] sm:$0xff] }
 0x1dc   :  { %v964_v8 = vsel %vm950_vm1, %v3643_v9, %v3642_v43  ;;  %v956_v12 = vsel %vm950_vm1, %v3642_v43, %v3643_v9  ;;  %v3172_v43 = vpack.c.bf16 %v1079_v39, %v1077_v54  ;;  %v2706_v54 = vld [vmem:[%s5984_s3 + $0x4c8] sm:$0xff]  ;;  %v2708_v39 = vld [vmem:[%s5984_s3 + $0x4d8] sm:$0xff] }
 0x1dd   :  { %3153 = vmatpush1.bf16.msra.mxu1 %v3152_v5  ;;  %v4749_v38 = vmax.f32 %v4515_v22, %v964_v8  ;;  %v4752_v17 = vmax.f32 %v4513_v2, %v956_v12  ;;  %v1070_v22 = vld [vmem:[%s5984_s3 + $0x188] sm:$0xff]  ;;  %v1072_v2 = vld [vmem:[%s5984_s3 + $0x198] sm:$0xff]  ;;  %v2681_v8 = vld [vmem:[%s5984_s3 + $0x400] sm:$0xff] }
 0x1de   :  { %3155 = vmatprep.subr.bf16.mxu1 %v3154_v14  ;;  %v3162_v32 = vpack.c.bf16 %v1072_v2, %v1070_v22  ;;  %v3174_v14 = vpack.c.bf16 %v1084_v52, %v1082_v57  ;;  %v2683_v12 = vld [vmem:[%s5984_s3 + $0x410] sm:$0xff]  ;;  %v2685_v22 = vld [vmem:[%s5984_s3 + $0x420] sm:$0xff]  ;;  %v3202_v52 = vpack.c.bf16 %v2708_v39, %v2706_v54  ;;  %v2738_v39 = vld [vmem:[%s5984_s3 + $0x5c8] sm:$0xff] }
 0x1df   :  { %1260 = vmatprep.mubr.f32.mxu1 %v4749_v38  ;;  %v3180_v21 = vpack.c.bf16 %v2683_v12, %v2681_v8  ;;  %v2687_v2 = vld [vmem:[%s5984_s3 + $0x430] sm:$0xff] }
 0x1e0   :  { %1261 = vmatmul.mubr.f32.gmra.mrb[42].mxu1 %v4752_v17  ;;  %v2735_v54 = vld [vmem:[%s5984_s3 + $0x5b0] sm:$0xff] }
 0x1e1   :  { %3157 = vmatpush1.bf16.msra.mxu1 %v3156_v16  ;;  %v3646_v55 = vpop.permute.xlu0 %3645  ;;  %v2686_v16 = vld [vmem:[%s5984_s3 + $0x428] sm:$0xff] }
 0x1e2   :  { %v3648_v62 = vunpack.i.h.bf16 %v3646_v55  ;;  %v3647_v31 = vunpack.i.l.bf16 %v3646_v55  ;;  %3159 = vmatprep.subr.bf16.mxu1 %v3158_v18  ;;  %v2688_v18 = vld [vmem:[%s5984_s3 + $0x438] sm:$0xff]  ;;  %v2690_v55 = vld [vmem:[%s5984_s3 + $0x448] sm:$0xff] }
 0x1e3   :  { %v3182_v20 = vpack.c.bf16 %v2688_v18, %v2686_v16  ;;  %v2713_v16 = vld [vmem:[%s5984_s3 + $0x500] sm:$0xff]  ;;  %v2715_v18 = vld [vmem:[%s5984_s3 + $0x510] sm:$0xff] }
 0x1e4   :  { %v965_v24 = vsel %vm950_vm1, %v3648_v62, %v3647_v31  ;;  %v957_v37 = vsel %vm950_vm1, %v3647_v31, %v3648_v62  ;;  %v3184_v62 = vpack.c.bf16 %v2687_v2, %v2685_v22  ;;  %v3212_v22 = vpack.c.bf16 %v2715_v18, %v2713_v16  ;;  %v2753_v16 = vld [vmem:[%s5986_s5 + $0x240] sm:$0xff]  ;;  %v2755_v18 = vld [vmem:[%s5986_s5 + $0x250] sm:$0xff] }
 0x1e5   :  { %3161 = vmatpush1.bf16.msra.mxu1 %v3160_v56  ;;  %v4785_v40 = vmax.f32 %v4530_v63, %v965_v24  ;;  %v4788_v42 = vmax.f32 %v4528_v35, %v957_v37  ;;  %v1078_v63 = vld [vmem:[%s5984_s3 + $0x1c8] sm:$0xff]  ;;  %v1080_v35 = vld [vmem:[%s5984_s3 + $0x1d8] sm:$0xff]  ;;  %v2693_v24 = vld [vmem:[%s5984_s3 + $0x460] sm:$0xff] }
 0x1e6   :  { %3163 = vmatprep.subr.bf16.mxu1 %v3162_v32  ;;  %v3170_v4 = vpack.c.bf16 %v1080_v35, %v1078_v63  ;;  %v2692_v56 = vld [vmem:[%s5984_s3 + $0x458] sm:$0xff]  ;;  %v2689_v32 = vld [vmem:[%s5984_s3 + $0x440] sm:$0xff]  ;;  %v2695_v37 = vld [vmem:[%s5984_s3 + $0x470] sm:$0xff] }
 0x1e7   :  { %1266 = vmatprep.mubr.f32.mxu1 %v4785_v40  ;;  %v3186_v31 = vpack.c.bf16 %v2692_v56, %v2690_v55  ;;  %v3188_v19 = vpack.c.bf16 %v2691_v15, %v2689_v32  ;;  %v2699_v63 = vld [vmem:[%s5984_s3 + $0x490] sm:$0xff]  ;;  %v2702_v35 = vld [vmem:[%s5984_s3 + $0x4a8] sm:$0xff]  ;;  %v2717_v55 = vld [vmem:[%s5984_s3 + $0x520] sm:$0xff] }
 0x1e8   :  { %1267 = vmatmul.mubr.f32.gmra.mrb[44].mxu1 %v4788_v42  ;;  %v2719_v56 = vld [vmem:[%s5984_s3 + $0x530] sm:$0xff]  ;;  %v2721_v15 = vld [vmem:[%s5984_s3 + $0x540] sm:$0xff] }
 0x1e9   :  { %3165 = vmatpush1.bf16.msra.mxu1 %v3164_v29  ;;  %v3651_v48 = vpop.permute.xlu1 %3650  ;;  %v2698_v29 = vld [vmem:[%s5984_s3 + $0x488] sm:$0xff] }
 0x1ea   :  { %v3653_v26 = vunpack.i.h.bf16 %v3651_v48  ;;  %v3652_v41 = vunpack.i.l.bf16 %v3651_v48  ;;  %3167 = vmatprep.subr.bf16.mxu1 %v3166_v34  ;;  %v3192_v34 = vpack.c.bf16 %v2695_v37, %v2693_v24  ;;  %v2704_v48 = vld [vmem:[%s5984_s3 + $0x4b8] sm:$0xff]  ;;  %v2725_v37 = vld [vmem:[%s5984_s3 + $0x560] sm:$0xff] }
 0x1ec   :  { %v966_v46 = vsel %vm950_vm1, %v3653_v26, %v3652_v41  ;;  %v958_v61 = vsel %vm950_vm1, %v3652_v41, %v3653_v26  ;;  %v3198_v26 = vpack.c.bf16 %v2704_v48, %v2702_v35  ;;  %v2701_v41 = vld [vmem:[%s5984_s3 + $0x4a0] sm:$0xff]  ;;  %v2731_v35 = vld [vmem:[%s5984_s3 + $0x590] sm:$0xff]  ;;  %v2734_v48 = vld [vmem:[%s5984_s3 + $0x5a8] sm:$0xff] }
 0x1ed   :  { %3169 = vmatpush1.bf16.msra.mxu1 %v3168_v28  ;;  %v4821_v5 = vmax.f32 %v4543_v11, %v966_v46  ;;  %v4824_v9 = vmax.f32 %v4541_v10, %v958_v61  ;;  %v2682_v11 = vld [vmem:[%s5984_s3 + $0x408] sm:$0xff]  ;;  %v2684_v10 = vld [vmem:[%s5984_s3 + $0x418] sm:$0xff]  ;;  %v3196_v28 = vpack.c.bf16 %v2699_v63, %v2697_v45  ;;  %v2705_v46 = vld [vmem:[%s5984_s3 + $0x4c0] sm:$0xff] }
 0x1ee   :  { %3171 = vmatprep.subr.bf16.mxu1 %v3170_v4  ;;  %v3178_v6 = vpack.c.bf16 %v2684_v10, %v2682_v11  ;;  %v2703_v4 = vld [vmem:[%s5984_s3 + $0x4b0] sm:$0xff]  ;;  %v2709_v11 = vld [vmem:[%s5984_s3 + $0x4e0] sm:$0xff] }
 0x1ef   :  { %1272 = vmatprep.mubr.f32.mxu1 %v4821_v5  ;;  %v3200_v57 = vpack.c.bf16 %v2703_v4, %v2701_v41  ;;  %v2707_v61 = vld [vmem:[%s5984_s3 + $0x4d0] sm:$0xff]  ;;  %v2729_v63 = vld [vmem:[%s5984_s3 + $0x580] sm:$0xff] }
 0x1f0   :  { %1273 = vmatmul.mubr.f32.gmra.mrb[46].mxu1 %v4824_v9  ;;  %v3204_v47 = vpack.c.bf16 %v2707_v61, %v2705_v46  ;;  %v2711_v10 = vld [vmem:[%s5984_s3 + $0x4f0] sm:$0xff]  ;;  %v2733_v4 = vld [vmem:[%s5984_s3 + $0x5a0] sm:$0xff] }
 0x1f1   :  { %3173 = vmatpush1.bf16.msra.mxu1 %v3172_v43  ;;  %1343 = vmatprep.mubr.f32.mxu1 %v3688_v3  ;;  %v2710_v43 = vld [vmem:[%s5984_s3 + $0x4e8] sm:$0xff]  ;;  %v3208_v8 = vpack.c.bf16 %v2711_v10, %v2709_v11  ;;  %v2737_v61 = vld [vmem:[%s5984_s3 + $0x5c0] sm:$0xff] }
 0x1f2   :  { %3175 = vmatprep.subr.bf16.mxu1 %v3174_v14  ;;  %v2712_v14 = vld [vmem:[%s5984_s3 + $0x4f8] sm:$0xff]  ;;  %v2741_v10 = vld [vmem:[%s5984_s3 + $0x5e0] sm:$0xff] }
 0x1f3   :  { %v3206_v58 = vpack.c.bf16 %v2712_v14, %v2710_v43  ;;  %v2739_v43 = vld [vmem:[%s5984_s3 + $0x5d0] sm:$0xff]  ;;  %v2742_v14 = vld [vmem:[%s5984_s3 + $0x5e8] sm:$0xff] }
 0x1f5   :  { %3177 = vmatpush1.bf16.msra.mxu1 %v3176_v13  ;;  %v2714_v13 = vld [vmem:[%s5984_s3 + $0x508] sm:$0xff] }
 0x1f6   :  { %3179 = vmatprep.subr.bf16.mxu1 %v3178_v6  ;;  %v2716_v6 = vld [vmem:[%s5984_s3 + $0x518] sm:$0xff] }
 0x1f7   :  { %v3210_v12 = vpack.c.bf16 %v2716_v6, %v2714_v13  ;;  %v2743_v13 = vld [vmem:[%s5984_s3 + $0x5f0] sm:$0xff] }
 0x1f8   :  { %1344 = vmatmul.mubr.f32.vlgmr.msra.gmra.mrb[32].mxu1 %v3688_v3  ;;  %v3240_v6 = vpack.c.bf16 %v2743_v13, %v2741_v10  ;;  %v2781_v10 = vld [vmem:[%s5986_s5 + $0x320] sm:$0xff]  ;;  %v2783_v13 = vld [vmem:[%s5986_s5 + $0x330] sm:$0xff] }
 0x1f9   :  { %1349 = vmatprep.mubr.f32.mxu1 %v4572_v51  ;;  %3181 = vmatpush1.bf16.msra.mxu1 %v3180_v21  ;;  %v2696_v51 = vld [vmem:[%s5984_s3 + $0x478] sm:$0xff]  ;;  %v2718_v21 = vld [vmem:[%s5984_s3 + $0x528] sm:$0xff] }
 0x1fa   :  { %3183 = vmatprep.subr.bf16.mxu1 %v3182_v20  ;;  %v3190_v25 = vpack.c.bf16 %v2696_v51, %v2694_v36  ;;  %v2720_v20 = vld [vmem:[%s5984_s3 + $0x538] sm:$0xff]  ;;  %v2723_v36 = vld [vmem:[%s5984_s3 + $0x550] sm:$0xff]  ;;  %v2726_v51 = vld [vmem:[%s5984_s3 + $0x568] sm:$0xff] }
 0x1fb   :  { %v3214_v2 = vpack.c.bf16 %v2720_v20, %v2718_v21  ;;  %v2758_v21 = vld [vmem:[%s5986_s5 + $0x268] sm:$0xff]  ;;  %v2760_v20 = vld [vmem:[%s5986_s5 + $0x278] sm:$0xff] }
 0x1fc   :  { %1350 = vmatmul.mubr.f32.gmra.mrb[34].mxu1 %v4569_v1  ;;  %v2700_v1 = vld [vmem:[%s5984_s3 + $0x498] sm:$0xff] }
 0x1fd   :  { %1355 = vmatprep.mubr.f32.mxu1 %v4605_v33  ;;  %3185 = vmatpush1.bf16.msra.mxu1 %v3184_v62  ;;  %v3194_v44 = vpack.c.bf16 %v2700_v1, %v2698_v29  ;;  %v2722_v62 = vld [vmem:[%s5984_s3 + $0x548] sm:$0xff]  ;;  %v2727_v29 = vld [vmem:[%s5984_s3 + $0x570] sm:$0xff] }
 0x1fe   :  { %3187 = vmatprep.subr.bf16.mxu1 %v3186_v31  ;;  %v2724_v31 = vld [vmem:[%s5984_s3 + $0x558] sm:$0xff]  ;;  %v2730_v1 = vld [vmem:[%s5984_s3 + $0x588] sm:$0xff] }
 0x1ff   :  { %v3218_v32 = vpack.c.bf16 %v2724_v31, %v2722_v62  ;;  %v2762_v62 = vld [vmem:[%s5986_s5 + $0x288] sm:$0xff]  ;;  %v2764_v31 = vld [vmem:[%s5986_s5 + $0x298] sm:$0xff] }
 0x200   :  { %1356 = vmatmul.mubr.f32.gmra.mrb[36].mxu1 %v4608_v59 }
 0x201   :  { %1361 = vmatprep.mubr.f32.mxu1 %v4641_v27  ;;  %3189 = vmatpush1.bf16.msra.mxu1 %v3188_v19  ;;  %v2728_v19 = vld [vmem:[%s5984_s3 + $0x578] sm:$0xff] }
 0x202   :  { %3191 = vmatprep.subr.bf16.mxu1 %v3190_v25  ;;  %v3220_v25 = vpack.c.bf16 %v2723_v36, %v2721_v15  ;;  %v3222_v24 = vpack.c.bf16 %v2728_v19, %v2726_v51  ;;  %v2761_v15 = vld [vmem:[%s5986_s5 + $0x280] sm:$0xff]  ;;  %v2763_v36 = vld [vmem:[%s5986_s5 + $0x290] sm:$0xff]  ;;  %v2766_v51 = vld [vmem:[%s5986_s5 + $0x2a8] sm:$0xff] }
 0x203   :  { %v2768_v19 = vld [vmem:[%s5986_s5 + $0x2b8] sm:$0xff] }
 0x204   :  { %1362 = vmatmul.mubr.f32.gmra.mrb[38].mxu1 %v4644_v7 }
 0x205   :  { %1367 = vmatprep.mubr.f32.mxu1 %v4677_v23  ;;  %3193 = vmatpush1.bf16.msra.mxu1 %v3192_v34  ;;  %v2732_v34 = vld [vmem:[%s5984_s3 + $0x598] sm:$0xff] }
 0x206   :  { %3195 = vmatprep.subr.bf16.mxu1 %v3194_v44  ;;  %v3224_v44 = vpack.c.bf16 %v2727_v29, %v2725_v37  ;;  %v3226_v45 = vpack.c.bf16 %v2732_v34, %v2730_v1  ;;  %v2765_v37 = vld [vmem:[%s5986_s5 + $0x2a0] sm:$0xff]  ;;  %v2767_v29 = vld [vmem:[%s5986_s5 + $0x2b0] sm:$0xff]  ;;  %v2770_v1 = vld [vmem:[%s5986_s5 + $0x2c8] sm:$0xff] }
 0x207   :  { %v2772_v34 = vld [vmem:[%s5986_s5 + $0x2d8] sm:$0xff] }
 0x208   :  { %1368 = vmatmul.mubr.f32.gmra.mrb[40].mxu1 %v4680_v30 }
 0x209   :  { %1373 = vmatprep.mubr.f32.mxu1 %v4713_v49  ;;  %3197 = vmatpush1.bf16.msra.mxu1 %v3196_v28  ;;  %v2736_v28 = vld [vmem:[%s5984_s3 + $0x5b8] sm:$0xff] }
 0x20a   :  { %3199 = vmatprep.subr.bf16.mxu1 %v3198_v26  ;;  %v3228_v26 = vpack.c.bf16 %v2731_v35, %v2729_v63  ;;  %v3230_v41 = vpack.c.bf16 %v2736_v28, %v2734_v48  ;;  %v2769_v63 = vld [vmem:[%s5986_s5 + $0x2c0] sm:$0xff]  ;;  %v2771_v35 = vld [vmem:[%s5986_s5 + $0x2d0] sm:$0xff]  ;;  %v2774_v48 = vld [vmem:[%s5986_s5 + $0x2e8] sm:$0xff] }
 0x20b   :  { %v2776_v28 = vld [vmem:[%s5986_s5 + $0x2f8] sm:$0xff] }
 0x20c   :  { %1374 = vmatmul.mubr.f32.gmra.mrb[42].mxu1 %v4716_v50 }
 0x20d   :  { %1379 = vmatprep.mubr.f32.mxu1 %v4749_v38  ;;  %3201 = vmatpush1.bf16.msra.mxu1 %v3200_v57  ;;  %v2740_v57 = vld [vmem:[%s5984_s3 + $0x5d8] sm:$0xff] }
 0x20e   :  { %3203 = vmatprep.subr.bf16.mxu1 %v3202_v52  ;;  %v3232_v52 = vpack.c.bf16 %v2735_v54, %v2733_v4  ;;  %v3234_v46 = vpack.c.bf16 %v2740_v57, %v2738_v39  ;;  %v2773_v4 = vld [vmem:[%s5986_s5 + $0x2e0] sm:$0xff]  ;;  %v2775_v54 = vld [vmem:[%s5986_s5 + $0x2f0] sm:$0xff]  ;;  %v2778_v39 = vld [vmem:[%s5986_s5 + $0x308] sm:$0xff] }
 0x20f   :  { %v2780_v57 = vld [vmem:[%s5986_s5 + $0x318] sm:$0xff] }
 0x210   :  { %1380 = vmatmul.mubr.f32.gmra.mrb[44].mxu1 %v4752_v17 }
 0x211   :  { %1385 = vmatprep.mubr.f32.mxu1 %v4785_v40  ;;  %3205 = vmatpush1.bf16.msra.mxu1 %v3204_v47  ;;  %v2744_v47 = vld [vmem:[%s5984_s3 + $0x5f8] sm:$0xff] }
 0x212   :  { %3207 = vmatprep.subr.bf16.mxu1 %v3206_v58  ;;  %v3236_v58 = vpack.c.bf16 %v2739_v43, %v2737_v61  ;;  %v3238_v11 = vpack.c.bf16 %v2744_v47, %v2742_v14  ;;  %v2777_v61 = vld [vmem:[%s5986_s5 + $0x300] sm:$0xff]  ;;  %v2779_v43 = vld [vmem:[%s5986_s5 + $0x310] sm:$0xff]  ;;  %v2782_v14 = vld [vmem:[%s5986_s5 + $0x328] sm:$0xff] }
 0x213   :  { %v2784_v47 = vld [vmem:[%s5986_s5 + $0x338] sm:$0xff] }
 0x214   :  { %1386 = vmatmul.mubr.f32.gmra.mrb[46].mxu1 %v4788_v42 }
 0x215   :  { %3209 = vmatpush1.bf16.msra.mxu1 %v3208_v8  ;;  %1538 = vmatprep.mubr.f32.mxu1 %v4605_v33  ;;  %v3216_v33 = vpack.c.bf16 %v2719_v56, %v2717_v55  ;;  %v2757_v55 = vld [vmem:[%s5986_s5 + $0x260] sm:$0xff]  ;;  %v2759_v56 = vld [vmem:[%s5986_s5 + $0x270] sm:$0xff] }
 0x216   :  { %3211 = vmatprep.subr.bf16.mxu1 %v3210_v12 }
 0x219   :  { %3213 = vmatpush1.bf16.msra.mxu1 %v3212_v22  ;;  %v3252_v22 = vpack.c.bf16 %v2755_v18, %v2753_v16  ;;  %v2793_v16 = vld [vmem:[%s5986_s5 + $0x380] sm:$0xff]  ;;  %v2795_v18 = vld [vmem:[%s5986_s5 + $0x390] sm:$0xff] }
 0x21a   :  { %3215 = vmatprep.subr.bf16.mxu1 %v3214_v2  ;;  %v3254_v2 = vpack.c.bf16 %v2760_v20, %v2758_v21  ;;  %v2798_v21 = vld [vmem:[%s5986_s5 + $0x3a8] sm:$0xff]  ;;  %v2800_v20 = vld [vmem:[%s5986_s5 + $0x3b8] sm:$0xff] }
 0x21d   :  { %3217 = vmatpush1.bf16.msra.mxu1 %v3216_v33  ;;  %v3256_v33 = vpack.c.bf16 %v2759_v56, %v2757_v55  ;;  %v2797_v55 = vld [vmem:[%s5986_s5 + $0x3a0] sm:$0xff]  ;;  %v2799_v56 = vld [vmem:[%s5986_s5 + $0x3b0] sm:$0xff] }
 0x21e   :  { %3219 = vmatprep.subr.bf16.mxu1 %v3218_v32  ;;  %v3258_v32 = vpack.c.bf16 %v2764_v31, %v2762_v62  ;;  %v2802_v62 = vld [vmem:[%s5986_s5 + $0x3c8] sm:$0xff]  ;;  %v2804_v31 = vld [vmem:[%s5986_s5 + $0x3d8] sm:$0xff] }
 0x221   :  { %3221 = vmatpush1.bf16.msra.mxu1 %v3220_v25  ;;  %v3260_v25 = vpack.c.bf16 %v2763_v36, %v2761_v15  ;;  %v2801_v15 = vld [vmem:[%s5986_s5 + $0x3c0] sm:$0xff]  ;;  %v2803_v36 = vld [vmem:[%s5986_s5 + $0x3d0] sm:$0xff] }
 0x222   :  { %3223 = vmatprep.subr.bf16.mxu1 %v3222_v24  ;;  %v3262_v24 = vpack.c.bf16 %v2768_v19, %v2766_v51  ;;  %v3300_v51 = vpack.c.bf16 %v2803_v36, %v2801_v15  ;;  %v1603_v19 = vld [vmem:[%s5987_s4] sm:$0x3] }
 0x225   :  { %3225 = vmatpush1.bf16.msra.mxu1 %v3224_v44  ;;  %v3264_v44 = vpack.c.bf16 %v2767_v29, %v2765_v37  ;;  %v2808_v37 = vld [vmem:[%s5986_s5 + $0x3f8] sm:$0xff] }
 0x226   :  { %3227 = vmatprep.subr.bf16.mxu1 %v3226_v45  ;;  %v3266_v45 = vpack.c.bf16 %v2772_v34, %v2770_v1  ;;  %v5251_v1 = vrot.slane %v1603_v19, %v4382_v0 }
 0x229   :  { %3229 = vmatpush1.bf16.msra.mxu1 %v3228_v26  ;;  %v3268_v26 = vpack.c.bf16 %v2771_v35, %v2769_v63 }
 0x22a   :  { %3231 = vmatprep.subr.bf16.mxu1 %v3230_v41  ;;  %v3270_v41 = vpack.c.bf16 %v2776_v28, %v2774_v48  ;;  %v1711_v28 = vld [vmem:[%s5986_s5 + $0x8] sm:$0xff] }
 0x22d   :  { %3233 = vmatpush1.bf16.msra.mxu1 %v3232_v52  ;;  %v3272_v52 = vpack.c.bf16 %v2775_v54, %v2773_v4 }
 0x22e   :  { %3235 = vmatprep.subr.bf16.mxu1 %v3234_v46  ;;  %v3274_v46 = vpack.c.bf16 %v2780_v57, %v2778_v39 }
 0x231   :  { %3237 = vmatpush1.bf16.msra.mxu1 %v3236_v58  ;;  %v3276_v58 = vpack.c.bf16 %v2779_v43, %v2777_v61 }
 0x232   :  { %3239 = vmatprep.subr.bf16.mxu1 %v3238_v11  ;;  %v3278_v11 = vpack.c.bf16 %v2784_v47, %v2782_v14 }
 0x235   :  { %3241 = vmatpush1.bf16.msra.mxu1 %v3240_v6  ;;  %v2786_v6 = vld [vmem:[%s5986_s5 + $0x348] sm:$0xff] }
 0x238   :  { %1539 = vmatmul.mubr.f32.vlgmr.msra.gmra.mrb[32].mxu1 %v4608_v59  ;;  %v2746_v59 = vld [vmem:[%s5986_s5 + $0x208] sm:$0xff] }
 0x239   :  { %1544 = vmatprep.mubr.f32.mxu1 %v4641_v27  ;;  %v2748_v27 = vld [vmem:[%s5986_s5 + $0x218] sm:$0xff] }
 0x23c   :  { %1545 = vmatmul.mubr.f32.gmra.mrb[34].mxu1 %v4644_v7  ;;  %v2745_v7 = vld [vmem:[%s5986_s5 + $0x200] sm:$0xff] }
 0x23d   :  { %1550 = vmatprep.mubr.f32.mxu1 %v4677_v23  ;;  %v3242_v23 = vpack.c.bf16 %v2748_v27, %v2746_v59  ;;  %v2788_v59 = vld [vmem:[%s5986_s5 + $0x358] sm:$0xff]  ;;  %v3280_v27 = vpack.c.bf16 %v2783_v13, %v2781_v10 }
 0x23f   :  { %3243 = vmatprep.subr.bf16.mxu0 %v3242_v23  ;;  %v2785_v23 = vld [vmem:[%s5986_s5 + $0x340] sm:$0xff] }
 0x240   :  { %1551 = vmatmul.mubr.f32.gmra.mrb[36].mxu1 %v4680_v30  ;;  %v2747_v30 = vld [vmem:[%s5986_s5 + $0x210] sm:$0xff] }
 0x241   :  { %1556 = vmatprep.mubr.f32.mxu1 %v4713_v49  ;;  %v2750_v49 = vld [vmem:[%s5986_s5 + $0x228] sm:$0xff] }
 0x244   :  { %1557 = vmatmul.mubr.f32.gmra.mrb[38].mxu1 %v4716_v50  ;;  %v2752_v50 = vld [vmem:[%s5986_s5 + $0x238] sm:$0xff] }
 0x245   :  { %1562 = vmatprep.mubr.f32.mxu1 %v4749_v38  ;;  %v3244_v38 = vpack.c.bf16 %v2747_v30, %v2745_v7  ;;  %v3282_v7 = vpack.c.bf16 %v2788_v59, %v2786_v6  ;;  %v2787_v30 = vld [vmem:[%s5986_s5 + $0x350] sm:$0xff] }
 0x247   :  { %3245 = vmatpush1.bf16.msra.mxu0 %v3244_v38  ;;  %v3284_v38 = vpack.c.bf16 %v2787_v30, %v2785_v23 }
 0x248   :  { %1563 = vmatmul.mubr.f32.gmra.mrb[40].mxu1 %v4752_v17  ;;  %v3246_v17 = vpack.c.bf16 %v2752_v50, %v2750_v49  ;;  %v2790_v49 = vld [vmem:[%s5986_s5 + $0x368] sm:$0xff]  ;;  %v2792_v50 = vld [vmem:[%s5986_s5 + $0x378] sm:$0xff] }
 0x249   :  { %1568 = vmatprep.mubr.f32.mxu1 %v4785_v40  ;;  %v2749_v40 = vld [vmem:[%s5986_s5 + $0x220] sm:$0xff] }
 0x24a   :  { %3247 = vmatprep.subr.bf16.mxu0 %v3246_v17  ;;  %v3286_v17 = vpack.c.bf16 %v2792_v50, %v2790_v49 }
 0x24c   :  { %1569 = vmatmul.mubr.f32.gmra.mrb[42].mxu1 %v4788_v42  ;;  %v2751_v42 = vld [vmem:[%s5986_s5 + $0x230] sm:$0xff] }
 0x24d   :  { %1574 = vmatprep.mubr.f32.mxu1 %v4821_v5  ;;  %v2754_v5 = vld [vmem:[%s5986_s5 + $0x248] sm:$0xff]  ;;  %v3248_v8 = vpack.c.bf16 %v2751_v42, %v2749_v40  ;;  %v2789_v40 = vld [vmem:[%s5986_s5 + $0x360] sm:$0xff]  ;;  %v2791_v42 = vld [vmem:[%s5986_s5 + $0x370] sm:$0xff] }
 0x24f   :  { %3249 = vmatpush1.bf16.msra.mxu0 %v3248_v8  ;;  %v3288_v8 = vpack.c.bf16 %v2791_v42, %v2789_v40 }
 0x250   :  { %1575 = vmatmul.mubr.f32.gmra.mrb[44].mxu1 %v4824_v9  ;;  %v2756_v9 = vld [vmem:[%s5986_s5 + $0x258] sm:$0xff] }
 0x251   :  { %1580 = vmatprep.mubr.f32.mxu1 %v3688_v3  ;;  %v3250_v12 = vpack.c.bf16 %v2756_v9, %v2754_v5  ;;  %v2794_v5 = vld [vmem:[%s5986_s5 + $0x388] sm:$0xff]  ;;  %v2796_v9 = vld [vmem:[%s5986_s5 + $0x398] sm:$0xff] }
 0x253   :  { %3251 = vmatprep.subr.bf16.mxu0 %v3250_v12  ;;  %v3290_v12 = vpack.c.bf16 %v2796_v9, %v2794_v5 }
 0x254   :  { %1581 = vmatmul.mubr.f32.gmra.mrb[46].mxu1 %v3688_v3  ;;  %3253 = vmatpush1.bf16.msra.mxu0 %v3252_v22  ;;  %v3292_v22 = vpack.c.bf16 %v2795_v18, %v2793_v16 }
 0x255   :  { %3255 = vmatprep.subr.bf16.mxu0 %v3254_v2  ;;  %v3294_v2 = vpack.c.bf16 %v2800_v20, %v2798_v21 }
 0x258   :  { %3257 = vmatpush1.bf16.msra.mxu0 %v3256_v33  ;;  %v3296_v33 = vpack.c.bf16 %v2799_v56, %v2797_v55 }
 0x259   :  { %3259 = vmatprep.subr.bf16.mxu0 %v3258_v32  ;;  %v3298_v32 = vpack.c.bf16 %v2804_v31, %v2802_v62 }
 0x25c   :  { %3261 = vmatpush1.bf16.msra.mxu0 %v3260_v25  ;;  %v5242_v25 = vrot.slane %v1603_v19, %v4377_v60 }
 0x25d   :  { %3263 = vmatprep.subr.bf16.mxu0 %v3262_v24  ;;  %v2806_v24 = vld [vmem:[%s5986_s5 + $0x3e8] sm:$0xff] }
 0x25e   :  { %v3302_v34 = vpack.c.bf16 %v2808_v37, %v2806_v24 }
 0x260   :  { %3265 = vmatpush1.bf16.msra.mxu0 %v3264_v44  ;;  %v2805_v44 = vld [vmem:[%s5986_s5 + $0x3e0] sm:$0xff] }
 0x261   :  { %3267 = vmatprep.subr.bf16.mxu0 %v3266_v45  ;;  %v2807_v45 = vld [vmem:[%s5986_s5 + $0x3f0] sm:$0xff] }
 0x262   :  { %v3304_v35 = vpack.c.bf16 %v2807_v45, %v2805_v44 }
 0x264   :  { %3269 = vmatpush1.bf16.msra.mxu0 %v3268_v26  ;;  %v1713_v26 = vld [vmem:[%s5986_s5 + $0x18] sm:$0xff] }
 0x265   :  { %3271 = vmatprep.subr.bf16.mxu0 %v3270_v41  ;;  %v3306_v54 = vpack.c.bf16 %v1713_v26, %v1711_v28 }
 0x268   :  { %3273 = vmatpush1.bf16.msra.mxu0 %v3272_v52 }
 0x269   :  { %3275 = vmatprep.subr.bf16.mxu0 %v3274_v46 }
 0x26c   :  { %3277 = vmatpush1.bf16.msra.mxu0 %v3276_v58 }
 0x26d   :  { %3279 = vmatprep.subr.bf16.mxu0 %v3278_v11 }
 0x270   :  { %3281 = vmatpush1.bf16.msra.mxu0 %v3280_v27 }
 0x271   :  { %3283 = vmatprep.subr.bf16.mxu0 %v3282_v7 }
 0x274   :  { %3285 = vmatpush1.bf16.msra.mxu0 %v3284_v38 }
 0x275   :  { %3287 = vmatprep.subr.bf16.mxu0 %v3286_v17 }
 0x278   :  { %3289 = vmatpush1.bf16.msra.mxu0 %v3288_v8 }
 0x279   :  { %3291 = vmatprep.subr.bf16.mxu0 %v3290_v12 }
 0x27c   :  { %3293 = vmatpush1.bf16.msra.mxu0 %v3292_v22 }
 0x27d   :  { %3295 = vmatprep.subr.bf16.mxu0 %v3294_v2 }
 0x280   :  { %3297 = vmatpush1.bf16.msra.mxu0 %v3296_v33 }
 0x281   :  { %3299 = vmatprep.subr.bf16.mxu0 %v3298_v32 }
 0x284   :  { %3301 = vmatpush1.bf16.msra.mxu0 %v3300_v51 }
 0x285   :  { %3303 = vmatprep.subr.bf16.mxu0 %v3302_v34 }
 0x288   :  { %3305 = vmatpush1.bf16.msra.mxu0 %v3304_v35 }
 0x289   :  { %3307 = vmatprep.subr.bf16.mxu0 %v3306_v54  ;;  %v1712_v54 = vld [vmem:[%s5986_s5 + $0x10] sm:$0xff] }
 0x30b   :  { %v1540_v29 = vpop.f32.mrb[32].mxu1 }
 0x30c   :  { %v1542_v63 = vpop.f32.mrb[33].mxu1  ;;  %v1615_v48 = vadd.f32 %v5242_v25, %v1540_v29 }
 0x30d   :  { %v1616_v41 = vadd.f32 %v5251_v1, %v1542_v63 }
 0x30e   :  { %v1631_v46 = vmax.f32 %v1615_v48, 0.0 }
 0x30f   :  { %v1546_v4 = vpop.f32.mrb[34].mxu1  ;;  %v1632_v43 = vmax.f32 %v1616_v41, 0.0 }
 0x310   :  { %v1617_v39 = vadd.f32 %v5242_v25, %v1546_v4  ;;  %v1548_v57 = vpop.f32.mrb[35].mxu1  ;;  %v1710_v4 = vld [vmem:[%s5986_s5] sm:$0xff] }
 0x311   :  { %v1618_v52 = vadd.f32 %v5251_v1, %v1548_v57  ;;  %v1717_v57 = vld [vmem:[%s5986_s5 + $0x38] sm:$0xff] }
 0x312   :  { %v1633_v61 = vmax.f32 %v1617_v39, 0.0  ;;  %v1715_v39 = vld [vmem:[%s5986_s5 + $0x28] sm:$0xff] }
 0x313   :  { %v1634_v14 = vmax.f32 %v1618_v52, 0.0  ;;  %v1552_v47 = vpop.f32.mrb[36].mxu1 }
 0x314   :  { %v5269_v58 = vmax.f32 %v1631_v46, %v1633_v61  ;;  %v1554_v11 = vpop.f32.mrb[37].mxu1  ;;  %v1619_v13 = vadd.f32 %v5242_v25, %v1552_v47  ;;  %v3310_v47 = vpack.c.bf16 %v1717_v57, %v1715_v39  ;;  %v1741_v39 = vld [vmem:[%s5986_s5 + $0xf8] sm:$0xff] }
 0x315   :  { %v1648_v10 = vmax.f32 %v1632_v43, %v1634_v14  ;;  %v1620_v6 = vadd.f32 %v5251_v1, %v1554_v11  ;;  %v3308_v14 = vpack.c.bf16 %v1712_v54, %v1710_v4  ;;  %v1714_v11 = vld [vmem:[%s5986_s5 + $0x20] sm:$0xff]  ;;  %v1736_v4 = vld [vmem:[%s5986_s5 + $0xd0] sm:$0xff]  ;;  %v1739_v54 = vld [vmem:[%s5986_s5 + $0xe8] sm:$0xff] }
 0x316   :  { %v1635_v49 = vmax.f32 %v1619_v13, 0.0  ;;  %v1716_v13 = vld [vmem:[%s5986_s5 + $0x30] sm:$0xff] }
 0x317   :  { %v1558_v59 = vpop.f32.mrb[38].mxu1  ;;  %v3654_v27 = vpack.i.bf16 %v1648_v10, %v5269_v58  ;;  %v1636_v38 = vmax.f32 %v1620_v6, 0.0  ;;  %v1719_v6 = vld [vmem:[%s5986_s5 + $0x48] sm:$0xff] }
 0x318   :  { %v1621_v7 = vadd.f32 %v5242_v25, %v1558_v59  ;;  %v1560_v23 = vpop.f32.mrb[39].mxu1  ;;  %v3312_v59 = vpack.c.bf16 %v1716_v13, %v1714_v11  ;;  %v3334_v11 = vpack.c.bf16 %v1741_v39, %v1739_v54  ;;  %v1738_v13 = vld [vmem:[%s5986_s5 + $0xe0] sm:$0xff] }
 0x319   :  { %v1622_v30 = vadd.f32 %v5251_v1, %v1560_v23  ;;  %3655 = vrot.lane.b32.xlu0 %v3654_v27, %s3690_s17 }
 0x31a   :  { %v1637_v50 = vmax.f32 %v1621_v7, 0.0 }
 0x31b   :  { %v1638_v17 = vmax.f32 %v1622_v30, 0.0  ;;  %v1564_v40 = vpop.f32.mrb[40].mxu1  ;;  %v1718_v30 = vld [vmem:[%s5986_s5 + $0x40] sm:$0xff] }
 0x31c   :  { %v5277_v42 = vmax.f32 %v1635_v49, %v1637_v50  ;;  %v1566_v5 = vpop.f32.mrb[41].mxu1  ;;  %v1623_v8 = vadd.f32 %v5242_v25, %v1564_v40  ;;  %v1720_v49 = vld [vmem:[%s5986_s5 + $0x50] sm:$0xff]  ;;  %v1723_v50 = vld [vmem:[%s5986_s5 + $0x68] sm:$0xff] }
 0x31d   :  { %v5279_v9 = vmax.f32 %v1636_v38, %v1638_v17  ;;  %v1624_v12 = vadd.f32 %v5251_v1, %v1566_v5  ;;  %v1725_v38 = vld [vmem:[%s5986_s5 + $0x78] sm:$0xff] }
 0x31e   :  { %v1639_v2 = vmax.f32 %v1623_v8, 0.0 }
 0x31f   :  { %v1570_v16 = vpop.f32.mrb[42].mxu1  ;;  %v3659_v18 = vpack.i.bf16 %v5279_v9, %v5277_v42  ;;  %v1640_v56 = vmax.f32 %v1624_v12, 0.0  ;;  %v3316_v12 = vpack.c.bf16 %v1720_v49, %v1718_v30 }
 0x320   :  { %v1625_v21 = vadd.f32 %v5242_v25, %v1570_v16  ;;  %v1572_v20 = vpop.f32.mrb[43].mxu1  ;;  %v3318_v16 = vpack.c.bf16 %v1725_v38, %v1723_v50  ;;  %v1746_v50 = vld [vmem:[%s5986_s5 + $0x120] sm:$0xff]  ;;  %v1748_v38 = vld [vmem:[%s5986_s5 + $0x130] sm:$0xff] }
 0x321   :  { %v1626_v22 = vadd.f32 %v5251_v1, %v1572_v20  ;;  %3660 = vrot.lane.b32.xlu1 %v3659_v18, %s3690_s17  ;;  %v1722_v18 = vld [vmem:[%s5986_s5 + $0x60] sm:$0xff] }
 0x322   :  { %v1641_v55 = vmax.f32 %v1625_v21, 0.0  ;;  %v1724_v21 = vld [vmem:[%s5986_s5 + $0x70] sm:$0xff] }
 0x323   :  { %v1642_v62 = vmax.f32 %v1626_v22, 0.0  ;;  %v1576_v31 = vpop.f32.mrb[44].mxu1  ;;  %v3320_v22 = vpack.c.bf16 %v1724_v21, %v1722_v18  ;;  %v1750_v18 = vld [vmem:[%s5986_s5 + $0x140] sm:$0xff]  ;;  %v1752_v21 = vld [vmem:[%s5986_s5 + $0x150] sm:$0xff] }
 0x324   :  { %v5288_v33 = vmax.f32 %v1639_v2, %v1641_v55  ;;  %v1578_v32 = vpop.f32.mrb[45].mxu1  ;;  %v1627_v36 = vadd.f32 %v5242_v25, %v1576_v31  ;;  %v1728_v31 = vld [vmem:[%s5986_s5 + $0x90] sm:$0xff] }
 0x325   :  { %v5290_v15 = vmax.f32 %v1640_v56, %v1642_v62  ;;  %v1628_v51 = vadd.f32 %v5251_v1, %v1578_v32  ;;  %v1726_v62 = vld [vmem:[%s5986_s5 + $0x80] sm:$0xff]  ;;  %v1731_v32 = vld [vmem:[%s5986_s5 + $0xa8] sm:$0xff] }
 0x326   :  { %v1643_v44 = vmax.f32 %v1627_v36, 0.0  ;;  %v1733_v36 = vld [vmem:[%s5986_s5 + $0xb8] sm:$0xff] }
 0x327   :  { %v1582_v19 = vpop.f32.mrb[46].mxu1  ;;  %v3664_v24 = vpack.i.bf16 %v5290_v15, %v5288_v33  ;;  %v1644_v63 = vmax.f32 %v1628_v51, 0.0 }
 0x328   :  { %v1629_v37 = vadd.f32 %v5242_v25, %v1582_v19  ;;  %v1584_v29 = vpop.f32.mrb[47].mxu1 }
 0x329   :  { %v1630_v34 = vadd.f32 %v5251_v1, %v1584_v29  ;;  %3665 = vrot.lane.b32.xlu0 %v3664_v24, %s3690_s17  ;;  %v3324_v29 = vpack.c.bf16 %v1728_v31, %v1726_v62  ;;  %v1761_v62 = vld [vmem:[%s5986_s5 + $0x198] sm:$0xff] }
 0x32a   :  { %v1645_v45 = vmax.f32 %v1629_v37, 0.0 }
 0x32b   :  { %v1646_v35 = vmax.f32 %v1630_v34, 0.0  ;;  %v3326_v34 = vpack.c.bf16 %v1733_v36, %v1731_v32  ;;  %v1758_v36 = vld [vmem:[%s5986_s5 + $0x180] sm:$0xff] }
 0x32c   :  { %v5299_v48 = vmax.f32 %v1643_v44, %v1645_v45  ;;  %v1730_v44 = vld [vmem:[%s5986_s5 + $0xa0] sm:$0xff]  ;;  %v1732_v45 = vld [vmem:[%s5986_s5 + $0xb0] sm:$0xff] }
 0x32d   :  { %v5301_v28 = vmax.f32 %v1644_v63, %v1646_v35  ;;  %v3328_v35 = vpack.c.bf16 %v1732_v45, %v1730_v44  ;;  %v1762_v45 = vld [vmem:[%s5986_s5 + $0x1a0] sm:$0xff] }
 0x32f   :  { %v3669_v26 = vpack.i.bf16 %v5301_v28, %v5299_v48 }
 0x331   :  { %3670 = vrot.lane.b32.xlu1 %v3669_v26, %s3690_s17 }
 0x38b   :  { %v3656_v25 = vpop.permute.xlu0 %3655 }
 0x38c   :  { %v3658_v41 = vunpack.i.h.bf16 %v3656_v25  ;;  %v3657_v1 = vunpack.i.l.bf16 %v3656_v25 }
 0x38e   :  { %v1672_v52 = vsel %vm1671_vm2, %v3657_v1, %v3658_v41  ;;  %v1676_v46 = vsel %vm1671_vm2, %v3658_v41, %v3657_v1  ;;  %v1734_v1 = vld [vmem:[%s5986_s5 + $0xc0] sm:$0xff] }
 0x38f   :  { %v5324_v61 = vmax.f32 %v5269_v58, %v1672_v52  ;;  %v5326_v43 = vmax.f32 %v1648_v10, %v1676_v46  ;;  %v1721_v58 = vld [vmem:[%s5986_s5 + $0x58] sm:$0xff] }
 0x390   :  { %v3314_v23 = vpack.c.bf16 %v1721_v58, %v1719_v6  ;;  %v1740_v6 = vld [vmem:[%s5986_s5 + $0xf0] sm:$0xff] }
 0x391   :  { %1911 = vmatprep.mubr.f32.mxu0 %v5326_v43  ;;  %v3336_v58 = vpack.c.bf16 %v1740_v6, %v1738_v13 }
 0x392   :  { %1912 = vmatmul.mubr.f32.vlgmr.msra.gmra.mrb[32].mxu0 %v5324_v61 }
 0x393   :  { %3309 = vmatpush1.bf16.msra.mxu0 %v3308_v14  ;;  %v3661_v10 = vpop.permute.xlu1 %3660 }
 0x394   :  { %v3663_v27 = vunpack.i.h.bf16 %v3661_v10  ;;  %v3662_v7 = vunpack.i.l.bf16 %v3661_v10  ;;  %3311 = vmatprep.subr.bf16.mxu0 %v3310_v47  ;;  %v3332_v47 = vpack.c.bf16 %v1736_v4, %v1734_v1  ;;  %v1771_v1 = vld [vmem:[%s5986_s5 + $0x1e8] sm:$0xff]  ;;  %v1773_v4 = vld [vmem:[%s5986_s5 + $0x1f8] sm:$0xff] }
 0x395   :  { %v3366_v39 = vpack.c.bf16 %v1773_v4, %v1771_v1  ;;  %v2844_v1 = vld [vmem:[%s5986_s5 + $0x518] sm:$0xff] }
 0x396   :  { %v1677_v17 = vsel %vm1671_vm2, %v3663_v27, %v3662_v7  ;;  %v1673_v40 = vsel %vm1671_vm2, %v3662_v7, %v3663_v27  ;;  %v1744_v27 = vld [vmem:[%s5986_s5 + $0x110] sm:$0xff]  ;;  %v1747_v7 = vld [vmem:[%s5986_s5 + $0x128] sm:$0xff] }
 0x397   :  { %3313 = vmatpush1.bf16.msra.mxu0 %v3312_v59  ;;  %v5359_v5 = vmax.f32 %v5279_v9, %v1677_v17  ;;  %v5362_v8 = vmax.f32 %v5277_v42, %v1673_v40  ;;  %v1727_v9 = vld [vmem:[%s5986_s5 + $0x88] sm:$0xff]  ;;  %v1729_v42 = vld [vmem:[%s5986_s5 + $0x98] sm:$0xff]  ;;  %v1742_v59 = vld [vmem:[%s5986_s5 + $0x100] sm:$0xff] }
 0x398   :  { %3315 = vmatprep.subr.bf16.mxu0 %v3314_v23  ;;  %v3322_v56 = vpack.c.bf16 %v1729_v42, %v1727_v9  ;;  %v1749_v23 = vld [vmem:[%s5986_s5 + $0x138] sm:$0xff]  ;;  %v3340_v30 = vpack.c.bf16 %v1744_v27, %v1742_v59  ;;  %v1751_v17 = vld [vmem:[%s5986_s5 + $0x148] sm:$0xff] }
 0x399   :  { %1917 = vmatprep.mubr.f32.mxu0 %v5359_v5  ;;  %v3342_v49 = vpack.c.bf16 %v1749_v23, %v1747_v7  ;;  %v1753_v40 = vld [vmem:[%s5986_s5 + $0x158] sm:$0xff]  ;;  %v1755_v9 = vld [vmem:[%s5986_s5 + $0x168] sm:$0xff]  ;;  %v2813_v7 = vld [vmem:[%s5986_s5 + $0x420] sm:$0xff] }
 0x39a   :  { %1918 = vmatmul.mubr.f32.gmra.mrb[34].mxu0 %v5362_v8  ;;  %v1757_v42 = vld [vmem:[%s5986_s5 + $0x178] sm:$0xff]  ;;  %v2815_v23 = vld [vmem:[%s5986_s5 + $0x430] sm:$0xff] }
 0x39b   :  { %3317 = vmatpush1.bf16.msra.mxu0 %v3316_v12  ;;  %v3666_v20 = vpop.permute.xlu0 %3665  ;;  %v3344_v12 = vpack.c.bf16 %v1748_v38, %v1746_v50  ;;  %v3376_v50 = vpack.c.bf16 %v2815_v23, %v2813_v7  ;;  %v2851_v7 = vld [vmem:[%s5986_s5 + $0x550] sm:$0xff]  ;;  %v2854_v23 = vld [vmem:[%s5986_s5 + $0x568] sm:$0xff] }
 0x39c   :  { %v3668_v2 = vunpack.i.h.bf16 %v3666_v20  ;;  %v3667_v55 = vunpack.i.l.bf16 %v3666_v20  ;;  %3319 = vmatprep.subr.bf16.mxu0 %v3318_v16  ;;  %v3346_v16 = vpack.c.bf16 %v1753_v40, %v1751_v17  ;;  %v3348_v20 = vpack.c.bf16 %v1752_v21, %v1750_v18  ;;  %v2817_v17 = vld [vmem:[%s5986_s5 + $0x440] sm:$0xff]  ;;  %v2819_v40 = vld [vmem:[%s5986_s5 + $0x450] sm:$0xff] }
 0x39d   :  { %v2821_v21 = vld [vmem:[%s5986_s5 + $0x460] sm:$0xff] }
 0x39e   :  { %v1678_v51 = vsel %vm1671_vm2, %v3668_v2, %v3667_v55  ;;  %v1674_v19 = vsel %vm1671_vm2, %v3667_v55, %v3668_v2  ;;  %v1754_v2 = vld [vmem:[%s5986_s5 + $0x160] sm:$0xff]  ;;  %v1756_v55 = vld [vmem:[%s5986_s5 + $0x170] sm:$0xff] }
 0x39f   :  { %3321 = vmatpush1.bf16.msra.mxu0 %v3320_v22  ;;  %v5395_v24 = vmax.f32 %v5290_v15, %v1678_v51  ;;  %v5398_v37 = vmax.f32 %v5288_v33, %v1674_v19  ;;  %v1735_v15 = vld [vmem:[%s5986_s5 + $0xc8] sm:$0xff]  ;;  %v1737_v33 = vld [vmem:[%s5986_s5 + $0xd8] sm:$0xff]  ;;  %v3350_v22 = vpack.c.bf16 %v1757_v42, %v1755_v9  ;;  %v3352_v31 = vpack.c.bf16 %v1756_v55, %v1754_v2  ;;  %v1760_v51 = vld [vmem:[%s5986_s5 + $0x190] sm:$0xff] }
 0x3a0   :  { %3323 = vmatprep.subr.bf16.mxu0 %v3322_v56  ;;  %v3330_v41 = vpack.c.bf16 %v1737_v33, %v1735_v15  ;;  %v1759_v56 = vld [vmem:[%s5986_s5 + $0x188] sm:$0xff]  ;;  %v1764_v15 = vld [vmem:[%s5986_s5 + $0x1b0] sm:$0xff]  ;;  %v2825_v2 = vld [vmem:[%s5986_s5 + $0x480] sm:$0xff] }
 0x3a1   :  { %1923 = vmatprep.mubr.f32.mxu0 %v5395_v24  ;;  %v3354_v32 = vpack.c.bf16 %v1761_v62, %v1759_v56  ;;  %v1763_v19 = vld [vmem:[%s5986_s5 + $0x1a8] sm:$0xff]  ;;  %v2823_v9 = vld [vmem:[%s5986_s5 + $0x470] sm:$0xff]  ;;  %v2832_v62 = vld [vmem:[%s5986_s5 + $0x4b8] sm:$0xff] }
 0x3a2   :  { %1924 = vmatmul.mubr.f32.gmra.mrb[36].mxu0 %v5398_v37  ;;  %v1767_v33 = vld [vmem:[%s5986_s5 + $0x1c8] sm:$0xff]  ;;  %v2827_v55 = vld [vmem:[%s5986_s5 + $0x490] sm:$0xff] }
 0x3a3   :  { %3325 = vmatpush1.bf16.msra.mxu0 %v3324_v29  ;;  %v3671_v63 = vpop.permute.xlu1 %3670  ;;  %v1765_v29 = vld [vmem:[%s5986_s5 + $0x1b8] sm:$0xff]  ;;  %v2826_v42 = vld [vmem:[%s5986_s5 + $0x488] sm:$0xff] }
 0x3a4   :  { %v3673_v26 = vunpack.i.h.bf16 %v3671_v63  ;;  %v3672_v25 = vunpack.i.l.bf16 %v3671_v63  ;;  %3327 = vmatprep.subr.bf16.mxu0 %v3326_v34  ;;  %v3356_v34 = vpack.c.bf16 %v1760_v51, %v1758_v36  ;;  %v3358_v44 = vpack.c.bf16 %v1765_v29, %v1763_v19  ;;  %v1769_v63 = vld [vmem:[%s5986_s5 + $0x1d8] sm:$0xff]  ;;  %v2830_v56 = vld [vmem:[%s5986_s5 + $0x4a8] sm:$0xff]  ;;  %v2829_v36 = vld [vmem:[%s5986_s5 + $0x4a0] sm:$0xff] }
 0x3a5   :  { %v2831_v51 = vld [vmem:[%s5986_s5 + $0x4b0] sm:$0xff]  ;;  %v2834_v19 = vld [vmem:[%s5986_s5 + $0x4c8] sm:$0xff]  ;;  %v2836_v29 = vld [vmem:[%s5986_s5 + $0x4d8] sm:$0xff] }
 0x3a6   :  { %v1679_v57 = vsel %vm1671_vm2, %v3673_v26, %v3672_v25  ;;  %v1675_v52 = vsel %vm1671_vm2, %v3672_v25, %v3673_v26  ;;  %v3362_v26 = vpack.c.bf16 %v1769_v63, %v1767_v33  ;;  %v1766_v25 = vld [vmem:[%s5986_s5 + $0x1c0] sm:$0xff]  ;;  %v2840_v33 = vld [vmem:[%s5986_s5 + $0x4f8] sm:$0xff] }
 0x3a7   :  { %3329 = vmatpush1.bf16.msra.mxu0 %v3328_v35  ;;  %v5431_v46 = vmax.f32 %v5301_v28, %v1679_v57  ;;  %v5434_v14 = vmax.f32 %v5299_v48, %v1675_v52  ;;  %v1743_v28 = vld [vmem:[%s5986_s5 + $0x108] sm:$0xff]  ;;  %v1745_v48 = vld [vmem:[%s5986_s5 + $0x118] sm:$0xff]  ;;  %v3360_v35 = vpack.c.bf16 %v1764_v15, %v1762_v45  ;;  %v1770_v57 = vld [vmem:[%s5986_s5 + $0x1e0] sm:$0xff] }
 0x3a8   :  { %3331 = vmatprep.subr.bf16.mxu0 %v3330_v41  ;;  %v3338_v10 = vpack.c.bf16 %v1745_v48, %v1743_v28  ;;  %v1768_v41 = vld [vmem:[%s5986_s5 + $0x1d0] sm:$0xff]  ;;  %v2809_v28 = vld [vmem:[%s5986_s5 + $0x400] sm:$0xff]  ;;  %v2838_v15 = vld [vmem:[%s5986_s5 + $0x4e8] sm:$0xff] }
 0x3a9   :  { %1929 = vmatprep.mubr.f32.mxu0 %v5431_v46  ;;  %v3364_v54 = vpack.c.bf16 %v1768_v41, %v1766_v25  ;;  %v1772_v52 = vld [vmem:[%s5986_s5 + $0x1f0] sm:$0xff]  ;;  %v2842_v41 = vld [vmem:[%s5986_s5 + $0x508] sm:$0xff] }
 0x3aa   :  { %1930 = vmatmul.mubr.f32.gmra.mrb[38].mxu0 %v5434_v14  ;;  %v3368_v13 = vpack.c.bf16 %v1772_v52, %v1770_v57  ;;  %v2811_v48 = vld [vmem:[%s5986_s5 + $0x410] sm:$0xff]  ;;  %v2846_v52 = vld [vmem:[%s5986_s5 + $0x528] sm:$0xff] }
 0x3ab   :  { %3333 = vmatpush1.bf16.msra.mxu0 %v3332_v47  ;;  %2000 = vmatprep.mubr.f32.mxu0 %v3688_v3  ;;  %v2810_v47 = vld [vmem:[%s5986_s5 + $0x408] sm:$0xff]  ;;  %v3372_v59 = vpack.c.bf16 %v2811_v48, %v2809_v28  ;;  %v2835_v45 = vld [vmem:[%s5986_s5 + $0x4d0] sm:$0xff] }
 0x3ac   :  { %3335 = vmatprep.subr.bf16.mxu0 %v3334_v11  ;;  %v2812_v11 = vld [vmem:[%s5986_s5 + $0x418] sm:$0xff]  ;;  %v2839_v25 = vld [vmem:[%s5986_s5 + $0x4f0] sm:$0xff]  ;;  %v2850_v48 = vld [vmem:[%s5986_s5 + $0x548] sm:$0xff] }
 0x3ad   :  { %v3370_v6 = vpack.c.bf16 %v2812_v11, %v2810_v47  ;;  %v2843_v57 = vld [vmem:[%s5986_s5 + $0x510] sm:$0xff]  ;;  %v2848_v47 = vld [vmem:[%s5986_s5 + $0x538] sm:$0xff] }
 0x3ae   :  { %v2847_v28 = vld [vmem:[%s5986_s5 + $0x530] sm:$0xff] }
 0x3af   :  { %3337 = vmatpush1.bf16.msra.mxu0 %v3336_v58  ;;  %v2814_v58 = vld [vmem:[%s5986_s5 + $0x428] sm:$0xff] }
 0x3b0   :  { %3339 = vmatprep.subr.bf16.mxu0 %v3338_v10  ;;  %v2816_v10 = vld [vmem:[%s5986_s5 + $0x438] sm:$0xff] }
 0x3b1   :  { %v3374_v27 = vpack.c.bf16 %v2816_v10, %v2814_v58  ;;  %v2852_v58 = vld [vmem:[%s5986_s5 + $0x558] sm:$0xff] }
 0x3b3   :  { %3341 = vmatpush1.bf16.msra.mxu0 %v3340_v30  ;;  %v2818_v30 = vld [vmem:[%s5986_s5 + $0x448] sm:$0xff] }
 0x3b4   :  { %3343 = vmatprep.subr.bf16.mxu0 %v3342_v49  ;;  %v2820_v49 = vld [vmem:[%s5986_s5 + $0x458] sm:$0xff] }
 0x3b5   :  { %v3378_v38 = vpack.c.bf16 %v2820_v49, %v2818_v30  ;;  %v2856_v30 = vld [vmem:[%s5986_s5 + $0x578] sm:$0xff] }
 0x3b7   :  { %3345 = vmatpush1.bf16.msra.mxu0 %v3344_v12  ;;  %v2822_v12 = vld [vmem:[%s5986_s5 + $0x468] sm:$0xff] }
 0x3b8   :  { %3347 = vmatprep.subr.bf16.mxu0 %v3346_v16  ;;  %v3380_v16 = vpack.c.bf16 %v2819_v40, %v2817_v17  ;;  %v2855_v17 = vld [vmem:[%s5986_s5 + $0x570] sm:$0xff]  ;;  %v2858_v40 = vld [vmem:[%s5986_s5 + $0x588] sm:$0xff] }
 0x3bb   :  { %3349 = vmatpush1.bf16.msra.mxu0 %v3348_v20  ;;  %v3384_v20 = vpack.c.bf16 %v2823_v9, %v2821_v21  ;;  %v2859_v21 = vld [vmem:[%s5986_s5 + $0x590] sm:$0xff]  ;;  %v2862_v9 = vld [vmem:[%s5986_s5 + $0x5a8] sm:$0xff] }
 0x3bc   :  { %3351 = vmatprep.subr.bf16.mxu0 %v3350_v22 }
 0x3bf   :  { %3353 = vmatpush1.bf16.msra.mxu0 %v3352_v31  ;;  %v3388_v31 = vpack.c.bf16 %v2827_v55, %v2825_v2  ;;  %v2863_v2 = vld [vmem:[%s5986_s5 + $0x5b0] sm:$0xff]  ;;  %v2866_v55 = vld [vmem:[%s5986_s5 + $0x5c8] sm:$0xff] }
 0x3c0   :  { %3355 = vmatprep.subr.bf16.mxu0 %v3354_v32  ;;  %v3390_v32 = vpack.c.bf16 %v2832_v62, %v2830_v56  ;;  %v2868_v56 = vld [vmem:[%s5986_s5 + $0x5d8] sm:$0xff] }
 0x3c3   :  { %3357 = vmatpush1.bf16.msra.mxu0 %v3356_v34  ;;  %v3394_v34 = vpack.c.bf16 %v2836_v29, %v2834_v19  ;;  %v2872_v19 = vld [vmem:[%s5986_s5 + $0x5f8] sm:$0xff] }
 0x3c4   :  { %3359 = vmatprep.subr.bf16.mxu0 %v3358_v44  ;;  %v2833_v44 = vld [vmem:[%s5986_s5 + $0x4c0] sm:$0xff] }
 0x3c5   :  { %v3396_v63 = vpack.c.bf16 %v2835_v45, %v2833_v44  ;;  %v2871_v44 = vld [vmem:[%s5986_s5 + $0x5f0] sm:$0xff] }
 0x3c7   :  { %3361 = vmatpush1.bf16.msra.mxu0 %v3360_v35  ;;  %v3398_v35 = vpack.c.bf16 %v2840_v33, %v2838_v15  ;;  %v2889_v15 = vld [vmem:[%s5988_s7 + $0x180] sm:$0xff] }
 0x3c8   :  { %3363 = vmatprep.subr.bf16.mxu0 %v3362_v26  ;;  %v2837_v26 = vld [vmem:[%s5986_s5 + $0x4e0] sm:$0xff] }
 0x3c9   :  { %v3400_v4 = vpack.c.bf16 %v2839_v25, %v2837_v26  ;;  %v2876_v26 = vld [vmem:[%s5988_s7 + $0x118] sm:$0xff]  ;;  %v2893_v25 = vld [vmem:[%s5988_s7 + $0x1a0] sm:$0xff] }
 0x3cb   :  { %3365 = vmatpush1.bf16.msra.mxu0 %v3364_v54  ;;  %v3402_v54 = vpack.c.bf16 %v2844_v1, %v2842_v41  ;;  %v2894_v41 = vld [vmem:[%s5988_s7 + $0x1a8] sm:$0xff] }
 0x3cc   :  { %3367 = vmatprep.subr.bf16.mxu0 %v3366_v39  ;;  %v2841_v39 = vld [vmem:[%s5986_s5 + $0x500] sm:$0xff] }
 0x3cd   :  { %v3404_v11 = vpack.c.bf16 %v2843_v57, %v2841_v39  ;;  %v2878_v39 = vld [vmem:[%s5988_s7 + $0x128] sm:$0xff]  ;;  %v2895_v57 = vld [vmem:[%s5988_s7 + $0x1b0] sm:$0xff] }
 0x3cf   :  { %3369 = vmatpush1.bf16.msra.mxu0 %v3368_v13  ;;  %v3406_v13 = vpack.c.bf16 %v2848_v47, %v2846_v52  ;;  %v2896_v52 = vld [vmem:[%s5988_s7 + $0x1b8] sm:$0xff] }
 0x3d0   :  { %3371 = vmatprep.subr.bf16.mxu0 %v3370_v6  ;;  %v2845_v6 = vld [vmem:[%s5986_s5 + $0x520] sm:$0xff] }
 0x3d1   :  { %v3408_v10 = vpack.c.bf16 %v2847_v28, %v2845_v6  ;;  %v2880_v6 = vld [vmem:[%s5988_s7 + $0x138] sm:$0xff]  ;;  %v2897_v28 = vld [vmem:[%s5988_s7 + $0x1c0] sm:$0xff] }
 0x3d2   :  { %2001 = vmatmul.mubr.f32.vlgmr.msra.gmra.mrb[32].mxu0 %v3688_v3 }
 0x3d3   :  { %2006 = vmatprep.mubr.f32.mxu0 %v5326_v43  ;;  %3373 = vmatpush1.bf16.msra.mxu0 %v3372_v59  ;;  %v2824_v43 = vld [vmem:[%s5986_s5 + $0x478] sm:$0xff]  ;;  %v3410_v59 = vpack.c.bf16 %v2852_v58, %v2850_v48  ;;  %v2898_v48 = vld [vmem:[%s5988_s7 + $0x1c8] sm:$0xff] }
 0x3d4   :  { %3375 = vmatprep.subr.bf16.mxu0 %v3374_v27  ;;  %v3382_v18 = vpack.c.bf16 %v2824_v43, %v2822_v12  ;;  %v2849_v27 = vld [vmem:[%s5986_s5 + $0x540] sm:$0xff]  ;;  %v2860_v12 = vld [vmem:[%s5986_s5 + $0x598] sm:$0xff] }
 0x3d5   :  { %v3412_v49 = vpack.c.bf16 %v2851_v7, %v2849_v27  ;;  %v2882_v27 = vld [vmem:[%s5988_s7 + $0x148] sm:$0xff] }
 0x3d6   :  { %2007 = vmatmul.mubr.f32.gmra.mrb[34].mxu0 %v5324_v61  ;;  %v2828_v61 = vld [vmem:[%s5986_s5 + $0x498] sm:$0xff] }
 0x3d7   :  { %2012 = vmatprep.mubr.f32.mxu0 %v5359_v5  ;;  %3377 = vmatpush1.bf16.msra.mxu0 %v3376_v50  ;;  %v3386_v22 = vpack.c.bf16 %v2828_v61, %v2826_v42  ;;  %v3414_v50 = vpack.c.bf16 %v2856_v30, %v2854_v23  ;;  %v2864_v42 = vld [vmem:[%s5986_s5 + $0x5b8] sm:$0xff]  ;;  %v2196_v23 = vld [vmem:[%s5989_s6] sm:$0x3] }
 0x3d8   :  { %3379 = vmatprep.subr.bf16.mxu0 %v3378_v38  ;;  %v2853_v38 = vld [vmem:[%s5986_s5 + $0x560] sm:$0xff]  ;;  %v2201_v30 = vrot.slane %v2196_v23, %v4377_v60  ;;  %v2884_v60 = vld [vmem:[%s5988_s7 + $0x158] sm:$0xff] }
 0x3d9   :  { %v3416_v43 = vpack.c.bf16 %v2855_v17, %v2853_v38  ;;  %v2205_v17 = vrot.slane %v2196_v23, %v4382_v0  ;;  %v2902_v0 = vld [vmem:[%s5988_s7 + $0x1e8] sm:$0xff]  ;;  %v2264_v23 = vld [vmem:[%s5988_s7 + $0x98] sm:$0xff] }
 0x3da   :  { %2013 = vmatmul.mubr.f32.gmra.mrb[36].mxu0 %v5362_v8 }
 0x3db   :  { %2018 = vmatprep.mubr.f32.mxu0 %v5395_v24  ;;  %3381 = vmatpush1.bf16.msra.mxu0 %v3380_v16  ;;  %v3418_v16 = vpack.c.bf16 %v2860_v12, %v2858_v40  ;;  %v2883_v12 = vld [vmem:[%s5988_s7 + $0x150] sm:$0xff] }
 0x3dc   :  { %3383 = vmatprep.subr.bf16.mxu0 %v3382_v18  ;;  %v2857_v18 = vld [vmem:[%s5986_s5 + $0x580] sm:$0xff] }
 0x3dd   :  { %v3420_v61 = vpack.c.bf16 %v2859_v21, %v2857_v18  ;;  %v2901_v21 = vld [vmem:[%s5988_s7 + $0x1e0] sm:$0xff] }
 0x3de   :  { %2019 = vmatmul.mubr.f32.gmra.mrb[38].mxu0 %v5398_v37 }
 0x3df   :  { %3385 = vmatpush1.bf16.msra.mxu0 %v3384_v20  ;;  %2163 = vmatprep.mubr.f32.mxu0 %v5359_v5  ;;  %v3392_v5 = vpack.c.bf16 %v2831_v51, %v2829_v36  ;;  %v3422_v20 = vpack.c.bf16 %v2864_v42, %v2862_v9  ;;  %v2867_v36 = vld [vmem:[%s5986_s5 + $0x5d0] sm:$0xff]  ;;  %v2870_v51 = vld [vmem:[%s5986_s5 + $0x5e8] sm:$0xff] }
 0x3e0   :  { %3387 = vmatprep.subr.bf16.mxu0 %v3386_v22  ;;  %v2861_v22 = vld [vmem:[%s5986_s5 + $0x5a0] sm:$0xff] }
 0x3e1   :  { %v3424_v62 = vpack.c.bf16 %v2863_v2, %v2861_v22  ;;  %v2886_v22 = vld [vmem:[%s5988_s7 + $0x168] sm:$0xff] }
 0x3e3   :  { %3389 = vmatpush1.bf16.msra.mxu0 %v3388_v31  ;;  %v3426_v31 = vpack.c.bf16 %v2868_v56, %v2866_v55 }
 0x3e4   :  { %3391 = vmatprep.subr.bf16.mxu0 %v3390_v32  ;;  %v2865_v32 = vld [vmem:[%s5986_s5 + $0x5c0] sm:$0xff] }
 0x3e5   :  { %v3428_v29 = vpack.c.bf16 %v2867_v36, %v2865_v32  ;;  %v2903_v36 = vld [vmem:[%s5988_s7 + $0x1f0] sm:$0xff] }
 0x3e7   :  { %3393 = vmatpush1.bf16.msra.mxu0 %v3392_v5  ;;  %v3430_v5 = vpack.c.bf16 %v2872_v19, %v2870_v51  ;;  %v2904_v51 = vld [vmem:[%s5988_s7 + $0x1f8] sm:$0xff] }
 0x3e8   :  { %3395 = vmatprep.subr.bf16.mxu0 %v3394_v34  ;;  %v2869_v34 = vld [vmem:[%s5986_s5 + $0x5e0] sm:$0xff] }
 0x3e9   :  { %v3432_v45 = vpack.c.bf16 %v2871_v44, %v2869_v34  ;;  %v3462_v34 = vpack.c.bf16 %v2904_v51, %v2903_v36  ;;  %v2887_v44 = vld [vmem:[%s5988_s7 + $0x170] sm:$0xff] }
 0x3eb   :  { %3397 = vmatpush1.bf16.msra.mxu0 %v3396_v63 }
 0x3ec   :  { %3399 = vmatprep.subr.bf16.mxu0 %v3398_v35  ;;  %v2875_v35 = vld [vmem:[%s5988_s7 + $0x110] sm:$0xff] }
 0x3ed   :  { %v3440_v1 = vpack.c.bf16 %v2876_v26, %v2875_v35 }
 0x3ef   :  { %3401 = vmatpush1.bf16.msra.mxu0 %v3400_v4  ;;  %v3442_v4 = vpack.c.bf16 %v2894_v41, %v2893_v25 }
 0x3f0   :  { %3403 = vmatprep.subr.bf16.mxu0 %v3402_v54  ;;  %v2877_v54 = vld [vmem:[%s5988_s7 + $0x120] sm:$0xff] }
 0x3f1   :  { %v3444_v47 = vpack.c.bf16 %v2878_v39, %v2877_v54 }
 0x3f3   :  { %3405 = vmatpush1.bf16.msra.mxu0 %v3404_v11  ;;  %v3446_v11 = vpack.c.bf16 %v2896_v52, %v2895_v57 }
 0x3f4   :  { %3407 = vmatprep.subr.bf16.mxu0 %v3406_v13  ;;  %v2879_v13 = vld [vmem:[%s5988_s7 + $0x130] sm:$0xff] }
 0x3f5   :  { %v3448_v58 = vpack.c.bf16 %v2880_v6, %v2879_v13 }
 0x3f7   :  { %3409 = vmatpush1.bf16.msra.mxu0 %v3408_v10  ;;  %v3450_v10 = vpack.c.bf16 %v2898_v48, %v2897_v28 }
 0x3f8   :  { %3411 = vmatprep.subr.bf16.mxu0 %v3410_v59  ;;  %v2881_v59 = vld [vmem:[%s5988_s7 + $0x140] sm:$0xff] }
 0x3f9   :  { %v3452_v7 = vpack.c.bf16 %v2882_v27, %v2881_v59  ;;  %v2245_v59 = vld [vmem:[%s5988_s7] sm:$0xff]  ;;  %v2246_v27 = vld [vmem:[%s5988_s7 + $0x8] sm:$0xff] }
 0x3fb   :  { %3413 = vmatpush1.bf16.msra.mxu0 %v3412_v49  ;;  %v2899_v49 = vld [vmem:[%s5988_s7 + $0x1d0] sm:$0xff] }
 0x3fc   :  { %3415 = vmatprep.subr.bf16.mxu0 %v3414_v50  ;;  %v2900_v50 = vld [vmem:[%s5988_s7 + $0x1d8] sm:$0xff] }
 0x3fd   :  { %v3454_v40 = vpack.c.bf16 %v2900_v50, %v2899_v49 }
 0x3ff   :  { %3417 = vmatpush1.bf16.msra.mxu0 %v3416_v43 }
 0x400   :  { %3419 = vmatprep.subr.bf16.mxu0 %v3418_v16  ;;  %v3456_v16 = vpack.c.bf16 %v2884_v60, %v2883_v12  ;;  %v2247_v60 = vld [vmem:[%s5988_s7 + $0x10] sm:$0xff] }
 0x403   :  { %3421 = vmatpush1.bf16.msra.mxu0 %v3420_v61  ;;  %v3458_v61 = vpack.c.bf16 %v2902_v0, %v2901_v21  ;;  %v2266_v21 = vld [vmem:[%s5988_s7 + $0xa8] sm:$0xff] }
 0x404   :  { %3423 = vmatprep.subr.bf16.mxu0 %v3422_v20  ;;  %v2885_v20 = vld [vmem:[%s5988_s7 + $0x160] sm:$0xff] }
 0x405   :  { %v3460_v56 = vpack.c.bf16 %v2886_v22, %v2885_v20  ;;  %v2267_v20 = vld [vmem:[%s5988_s7 + $0xb0] sm:$0xff]  ;;  %v2268_v22 = vld [vmem:[%s5988_s7 + $0xb8] sm:$0xff] }
 0x407   :  { %3425 = vmatpush1.bf16.msra.mxu0 %v3424_v62 }
 0x408   :  { %3427 = vmatprep.subr.bf16.mxu0 %v3426_v31 }
 0x40b   :  { %3429 = vmatpush1.bf16.msra.mxu0 %v3428_v29 }
 0x40c   :  { %3431 = vmatprep.subr.bf16.mxu0 %v3430_v5 }
 0x40f   :  { %3433 = vmatpush1.bf16.msra.mxu0 %v3432_v45  ;;  %v2888_v45 = vld [vmem:[%s5988_s7 + $0x178] sm:$0xff] }
 0x412   :  { %2164 = vmatmul.mubr.f32.vlgmr.msra.gmra.mrb[32].mxu0 %v5362_v8  ;;  %v2890_v8 = vld [vmem:[%s5988_s7 + $0x188] sm:$0xff] }
 0x413   :  { %2169 = vmatprep.mubr.f32.mxu0 %v5395_v24  ;;  %v2873_v24 = vld [vmem:[%s5988_s7 + $0x100] sm:$0xff] }
 0x416   :  { %2170 = vmatmul.mubr.f32.gmra.mrb[34].mxu0 %v5398_v37  ;;  %v3434_v37 = vpack.c.bf16 %v2890_v8, %v2889_v15 }
 0x417   :  { %2175 = vmatprep.mubr.f32.mxu0 %v5431_v46  ;;  %v2874_v46 = vld [vmem:[%s5988_s7 + $0x108] sm:$0xff] }
 0x418   :  { %v3436_v33 = vpack.c.bf16 %v2874_v46, %v2873_v24  ;;  %3435 = vmatprep.subr.bf16.mxu1 %v3434_v37  ;;  %v3464_v24 = vpack.c.bf16 %v2888_v45, %v2887_v44 }
 0x41a   :  { %2176 = vmatmul.mubr.f32.gmra.mrb[36].mxu0 %v5434_v14  ;;  %v2892_v14 = vld [vmem:[%s5988_s7 + $0x198] sm:$0xff]  ;;  %3437 = vmatpush3.bf16.msra.mxu1 %v3436_v33 }
 0x41b   :  { %2181 = vmatprep.mubr.f32.mxu0 %v3688_v3 }
 0x41e   :  { %2182 = vmatmul.mubr.f32.gmra.mrb[38].mxu0 %v3688_v3  ;;  %v2891_v3 = vld [vmem:[%s5988_s7 + $0x190] sm:$0xff] }
 0x41f   :  { %v3438_v63 = vpack.c.bf16 %v2892_v14, %v2891_v3  ;;  %v2261_v3 = vld [vmem:[%s5988_s7 + $0x80] sm:$0xff]  ;;  %v2262_v14 = vld [vmem:[%s5988_s7 + $0x88] sm:$0xff] }
 0x420   :  { %v3466_v26 = vpack.c.bf16 %v2262_v14, %v2261_v3 }
 0x421   :  { %3439 = vmatprep.subr.bf16.mxu1 %v3438_v63 }
 0x422   :  { %3441 = vmatpush3.bf16.msra.mxu1 %v3440_v1 }
 0x423   :  { %3443 = vmatprep.subr.bf16.mxu1 %v3442_v4 }
 0x426   :  { %3445 = vmatpush3.bf16.msra.mxu1 %v3444_v47 }
 0x427   :  { %3447 = vmatprep.subr.bf16.mxu1 %v3446_v11 }
 0x42a   :  { %3449 = vmatpush3.bf16.msra.mxu1 %v3448_v58 }
 0x42b   :  { %3451 = vmatprep.subr.bf16.mxu1 %v3450_v10 }
 0x42e   :  { %3453 = vmatpush3.bf16.msra.mxu1 %v3452_v7  ;;  %v2263_v7 = vld [vmem:[%s5988_s7 + $0x90] sm:$0xff] }
 0x42f   :  { %3455 = vmatprep.subr.bf16.mxu1 %v3454_v40  ;;  %v3468_v40 = vpack.c.bf16 %v2246_v27, %v2245_v59  ;;  %v3470_v12 = vpack.c.bf16 %v2264_v23, %v2263_v7 }
 0x432   :  { %3457 = vmatpush3.bf16.msra.mxu1 %v3456_v16 }
 0x433   :  { %3459 = vmatprep.subr.bf16.mxu1 %v3458_v61  ;;  %v2250_v61 = vld [vmem:[%s5988_s7 + $0x28] sm:$0xff] }
 0x436   :  { %3461 = vmatpush3.bf16.msra.mxu1 %v3460_v56  ;;  %v2251_v56 = vld [vmem:[%s5988_s7 + $0x30] sm:$0xff] }
 0x437   :  { %3463 = vmatprep.subr.bf16.mxu1 %v3462_v34  ;;  %v2272_v34 = vld [vmem:[%s5988_s7 + $0xd8] sm:$0xff] }
 0x43a   :  { %3465 = vmatpush3.bf16.msra.mxu1 %v3464_v24  ;;  %v2256_v24 = vld [vmem:[%s5988_s7 + $0x58] sm:$0xff] }
 0x43b   :  { %3467 = vmatprep.subr.bf16.mxu1 %v3466_v26  ;;  %v2276_v26 = vld [vmem:[%s5988_s7 + $0xf8] sm:$0xff] }
 0x4e5   :  { %v2165_v38 = vpop.f32.mrb[32].mxu0 }
 0x4e6   :  { %v2167_v43 = vpop.f32.mrb[33].mxu0  ;;  %v2208_v18 = vadd.f32 %v2201_v30, %v2165_v38 }
 0x4e7   :  { %v2209_v9 = vadd.f32 %v2205_v17, %v2167_v43  ;;  %v2248_v43 = vld [vmem:[%s5988_s7 + $0x18] sm:$0xff] }
 0x4e8   :  { %v2216_v31 = vmax.f32 %v2208_v18, 0.0  ;;  %v2265_v18 = vld [vmem:[%s5988_s7 + $0xa0] sm:$0xff]  ;;  %v3472_v0 = vpack.c.bf16 %v2248_v43, %v2247_v60 }
 0x4e9   :  { %v2171_v42 = vpop.f32.mrb[34].mxu0  ;;  %v2217_v19 = vmax.f32 %v2209_v9, 0.0  ;;  %v3474_v9 = vpack.c.bf16 %v2266_v21, %v2265_v18 }
 0x4ea   :  { %v2210_v2 = vadd.f32 %v2201_v30, %v2171_v42  ;;  %v2173_v55 = vpop.f32.mrb[35].mxu0  ;;  %v2249_v42 = vld [vmem:[%s5988_s7 + $0x20] sm:$0xff] }
 0x4eb   :  { %v2211_v62 = vadd.f32 %v2205_v17, %v2173_v55  ;;  %v3478_v55 = vpack.c.bf16 %v2268_v22, %v2267_v20 }
 0x4ec   :  { %v2218_v32 = vmax.f32 %v2210_v2, 0.0  ;;  %v3476_v2 = vpack.c.bf16 %v2250_v61, %v2249_v42 }
 0x4ed   :  { %v2219_v29 = vmax.f32 %v2211_v62, 0.0  ;;  %v2177_v5 = vpop.f32.mrb[36].mxu0  ;;  %v2252_v62 = vld [vmem:[%s5988_s7 + $0x38] sm:$0xff] }
 0x4ee   :  { %v5849_v15 = vmax.f32 %v2216_v31, %v2218_v32  ;;  %v2179_v8 = vpop.f32.mrb[37].mxu0  ;;  %v2212_v46 = vadd.f32 %v2201_v30, %v2177_v5  ;;  %v2269_v31 = vld [vmem:[%s5988_s7 + $0xc0] sm:$0xff]  ;;  %v2270_v32 = vld [vmem:[%s5988_s7 + $0xc8] sm:$0xff]  ;;  %v3480_v36 = vpack.c.bf16 %v2252_v62, %v2251_v56  ;;  %v2271_v5 = vld [vmem:[%s5988_s7 + $0xd0] sm:$0xff] }
 0x4ef   :  { %v2225_v37 = vmax.f32 %v2217_v19, %v2219_v29  ;;  %v2213_v33 = vadd.f32 %v2205_v17, %v2179_v8  ;;  %v3482_v51 = vpack.c.bf16 %v2270_v32, %v2269_v31  ;;  %v2253_v19 = vld [vmem:[%s5988_s7 + $0x40] sm:$0xff]  ;;  %v2254_v29 = vld [vmem:[%s5988_s7 + $0x48] sm:$0xff]  ;;  %v3486_v45 = vpack.c.bf16 %v2272_v34, %v2271_v5  ;;  %v2255_v8 = vld [vmem:[%s5988_s7 + $0x50] sm:$0xff] }
 0x4f0   :  { %v2220_v4 = vmax.f32 %v2212_v46, 0.0  ;;  %v3484_v44 = vpack.c.bf16 %v2254_v29, %v2253_v19  ;;  %v2274_v46 = vld [vmem:[%s5988_s7 + $0xe8] sm:$0xff]  ;;  %v3488_v3 = vpack.c.bf16 %v2256_v24, %v2255_v8 }
 0x4f1   :  { %v2183_v63 = vpop.f32.mrb[38].mxu0  ;;  %v3679_v35 = vpack.i.bf16 %v2225_v37, %v5849_v15  ;;  %v2221_v39 = vmax.f32 %v2213_v33, 0.0  ;;  %v2257_v33 = vld [vmem:[%s5988_s7 + $0x60] sm:$0xff] }
 0x4f2   :  { %v2214_v25 = vadd.f32 %v2201_v30, %v2183_v63  ;;  %v2185_v41 = vpop.f32.mrb[39].mxu0  ;;  %v2258_v63 = vld [vmem:[%s5988_s7 + $0x68] sm:$0xff] }
 0x4f3   :  { %v2215_v1 = vadd.f32 %v2205_v17, %v2185_v41  ;;  %3680 = vrot.lane.b32.xlu1 %v3679_v35, %s3691_s2  ;;  %v2275_v35 = vld [vmem:[%s5988_s7 + $0xf0] sm:$0xff] }
 0x4f4   :  { %v2222_v54 = vmax.f32 %v2214_v25, 0.0  ;;  %v3492_v25 = vpack.c.bf16 %v2258_v63, %v2257_v33  ;;  %v3494_v41 = vpack.c.bf16 %v2276_v26, %v2275_v35 }
 0x4f5   :  { %v2223_v57 = vmax.f32 %v2215_v1, 0.0  ;;  %v2259_v1 = vld [vmem:[%s5988_s7 + $0x70] sm:$0xff] }
 0x4f6   :  { %v2226_v52 = vmax.f32 %v2220_v4, %v2222_v54  ;;  %v2260_v4 = vld [vmem:[%s5988_s7 + $0x78] sm:$0xff] }
 0x4f7   :  { %v2227_v47 = vmax.f32 %v2221_v39, %v2223_v57  ;;  %v3496_v54 = vpack.c.bf16 %v2260_v4, %v2259_v1 }
 0x4f9   :  { %v3674_v11 = vpack.i.bf16 %v2227_v47, %v2226_v52 }
 0x4fb   :  { %3675 = vrot.lane.b32.xlu0 %v3674_v11, %s3691_s2 }
 0x565   :  { %v5858_v13 = vpop.permute.xlu1 %3680 }
 0x566   :  { %v3683_v6 = vunpack.i.h.bf16 %v5858_v13  ;;  %v3682_v28 = vunpack.i.l.bf16 %v5858_v13 }
 0x568   :  { %v2239_v50 = vsel %vm2236_vm3, %v3683_v6, %v3682_v28  ;;  %v2237_v39 = vsel %vm2236_vm3, %v3682_v28, %v3683_v6 }
 0x569   :  { %v2242_v16 = vmax.f32 %v2225_v37, %v2239_v50  ;;  %v2273_v37 = vld [vmem:[%s5988_s7 + $0xe0] sm:$0xff]  ;;  %v2241_v57 = vmax.f32 %v5849_v15, %v2237_v39 }
 0x56a   :  { %v3490_v14 = vpack.c.bf16 %v2274_v46, %v2273_v37  ;;  %v2906_v15 = vld [vmem:[%s5992_s9] ss:$0 sm:$0xff] }
 0x56d   :  { %v3676_v48 = vpop.permute.xlu0 %3675 }
 0x56e   :  { %v3678_v58 = vunpack.i.h.bf16 %v3676_v48  ;;  %v3677_v10 = vunpack.i.l.bf16 %v3676_v48 }
 0x570   :  { %v2238_v30 = vsel %vm2236_vm3, %v3677_v10, %v3678_v58  ;;  %v2240_v49 = vsel %vm2236_vm3, %v3678_v58, %v3677_v10 }
 0x571   :  { %v2243_v38 = vmax.f32 %v2226_v52, %v2238_v30  ;;  %v2244_v17 = vmax.f32 %v2227_v47, %v2240_v49  ;;  %v16_v52 = vstv %s5990_s10 }
 0x572   :  { %17 = vst [vmem:[#allocation4] sm:$0x1] %v16_v52 }
 0x573   :  { %2374 = vmatprep.mubr.f32.mxu1 %v2244_v17 }
 0x574   :  { %2375 = vmatmul.mubr.f32.vlgmr.msra.gmra.mrb[48].mxu1 %v2243_v38 }
 0x575   :  { %3469 = vmatpush3.bf16.msra.mxu1 %v3468_v40  ;;  %2444 = vmatprep.mubr.f32.mxu1 %v2242_v16 }
 0x576   :  { %3471 = vmatprep.subr.bf16.mxu1 %v3470_v12 }
 0x579   :  { %3473 = vmatpush3.bf16.msra.mxu1 %v3472_v0  ;;  %v2907_v7 = vld [vmem:[#allocation4] ss:$0 sm:$0xff] }
 0x57a   :  { %3475 = vmatprep.subr.bf16.mxu1 %v3474_v9 }
 0x57d   :  { %3477 = vmatpush3.bf16.msra.mxu1 %v3476_v2 }
 0x57e   :  { %3479 = vmatprep.subr.bf16.mxu1 %v3478_v55 }
 0x581   :  { %3481 = vmatpush3.bf16.msra.mxu1 %v3480_v36 }
 0x582   :  { %3483 = vmatprep.subr.bf16.mxu1 %v3482_v51 }
 0x585   :  { %3485 = vmatpush3.bf16.msra.mxu1 %v3484_v44 }
 0x586   :  { %3487 = vmatprep.subr.bf16.mxu1 %v3486_v45 }
 0x589   :  { %3489 = vmatpush3.bf16.msra.mxu1 %v3488_v3 }
 0x58a   :  { %3491 = vmatprep.subr.bf16.mxu1 %v3490_v14 }
 0x58d   :  { %3493 = vmatpush3.bf16.msra.mxu1 %v3492_v25 }
 0x58e   :  { %3495 = vmatprep.subr.bf16.mxu1 %v3494_v41 }
 0x591   :  { %3497 = vmatpush3.bf16.msra.mxu1 %v3496_v54 }
 0x594   :  { %2445 = vmatmul.mubr.f32.vlgmr.msra.gmra.mrb[50].mxu1 %v2241_v57 }
 0x647   :  { %v2940_v47 = vpop.f32.mrb[48].mxu1 }
 0x648   :  { %v2941_v11 = vpop.f32.mrb[49].mxu1 }
 0x649   :  { %v2942_v48 = vadd.f32 %v2941_v11, %v2940_v47 }
 0x667   :  { %v2975_v58 = vpop.f32.mrb[50].mxu1 }
 0x668   :  { %v2976_v10 = vpop.f32.mrb[51].mxu1 }
 0x669   :  { %v2977_v59 = vadd.f32 %v2976_v10, %v2975_v58 }
 0x66b   :  { %v2447_v13 = vadd.f32 %v2977_v59, %v2942_v48 }
 0x66d   :  { %v2457_v6 = vadd.f32 %v2905_v53, %v2447_v13 }
 0x66f   :  { %v2458_v28 = vmax.f32 %v2457_v6, 0.0 }
 0x671   :  { %v2466_v27 = vmul.f32 %v2906_v15, %v2458_v28 }
 0x673   :  { %2467 = vadd.xlane.f32.xlu0 %v2466_v27 }
 0x700   :  { %v2468_v23 = vpop.xlane.xlu0 %2467 }
 0x701   :  { %v2476_v30 = vadd.f32 %v2907_v7, %v2468_v23 }
 0x703   :  { %v2477_v49 = vsub.f32 0.0, %v2476_v30 }
 0x705   :  { %v2478_v50 = vmul.f32 1.442695, %v2477_v49 }
 0x707   :  { %3684 = vpow2.f32 %v2478_v50 }
 0x711   :  { %v3685_v38 = vpop.eup %3684 }
 0x712   :  { %v2480_v17 = vadd.f32 1.0, %v3685_v38 }
 0x714   :  { %3686 = vrcp.f32 %v2480_v17 }
 0x71e   :  { %v3687_v40 = vpop.eup %3686 }
 0x71f   :  { %2484 = vst.msk [vmem:[%s5993_s11] sm:$0xff] %vm2483_vm4, %v3687_v40 }

</bundles_post_ra>
